<compile_context>
chip_gen: v7x
topology: tpu7x:2x2x1
jax: 0.10.0
libtpu: 0.0.40
codegen_flags: <defaults>
</compile_context>

<pallas_src>
import functools

import jax
import jax.numpy as jnp
from jax import lax
from jax.experimental import pallas as pl
from jax.experimental.pallas import tpu as pltpu

BN_EPS = 1e-5


# ----------------------------- small helpers -----------------------------

def _full_spec(shape):
    """BlockSpec covering the whole array, constant across the (size-1) grid."""
    zeros = (0,) * len(shape)
    return pl.BlockSpec(shape, lambda *_g, _z=zeros: _z)


def _params(n_grid_dims=1):
    return pltpu.CompilerParams(dimension_semantics=("parallel",) * n_grid_dims)


def _dot(a, w):
    """bf16 x bf16 MXU matmul with f32 accumulation."""
    return jnp.dot(a.astype(jnp.bfloat16), w.astype(jnp.bfloat16),
                   preferred_element_type=jnp.float32)


def _conv3(x, w3, b, L):
    """Conv1d(kernel=3, padding=1) on a flattened (B*L, Cin) channels-last
    activation as a single matmul against a (3*Cin, Cout) weight.

    The [l-1, l, l+1] halo is built with sublane rolls; rows that would read
    across a per-sample boundary are zeroed (== zero padding)."""
    N, Cin = x.shape
    l_idx = lax.broadcasted_iota(jnp.int32, (N, Cin), 0) % L
    x_prev = jnp.where(l_idx >= 1, pltpu.roll(x, shift=1, axis=0), 0.0)
    x_next = jnp.where(l_idx < L - 1, pltpu.roll(x, shift=N - 1, axis=0), 0.0)
    x3 = jnp.concatenate([x_prev, x, x_next], axis=-1)          # (N, 3*Cin)
    return _dot(x3, w3) + b


# ----------------------------- Pallas kernels -----------------------------

def stem_kernel(x_ref, w_ref, b_ref, o_ref, *, L):
    """resnet.conv1 (k=3, pad=1) with resnet.bn1 folded in, then ReLU."""
    y = _conv3(x_ref[...], w_ref[...], b_ref[...], L)
    o_ref[...] = jnp.maximum(y, 0.0).astype(o_ref.dtype)


def block_kernel(x_ref, s1_ref, t1_ref, w1_ref, b1_ref, w2_ref, b2_ref,
                 w1s_ref, w2s_ref, w1d_ref, w2d_ref, w3d_ref, *rest,
                 B, L, use_res_conv, emit_mean):
    """One fused BasicBlock:
       bn1 -> relu -> conv1 (bn2 folded) -> relu -> conv2 -> DualSE -> +residual.
       If emit_mean, writes only the per-sample mean over L of the output."""
    if use_res_conv:
        wres_ref, bres_ref, o_ref = rest
    else:
        (o_ref,) = rest

    x = x_ref[...]                                              # (B*L, Cin) f32

    # BasicBlock.bn1 + ReLU (BN precomputed to per-channel scale/shift).
    a = jnp.maximum(x * s1_ref[...] + t1_ref[...], 0.0)
    # conv1 with BasicBlock.bn2 folded into its weight/bias, then ReLU.
    y = jnp.maximum(_conv3(a, w1_ref[...], b1_ref[...], L), 0.0)
    # conv2 (no BN after it in the reference module).
    z = _conv3(y, w2_ref[...], b2_ref[...], L)                  # (B*L, Cout)
    Cout = z.shape[-1]

    # DualSEBlock: per-sample channel means over L, then two gating branches.
    z3 = z.reshape(B, L, Cout)
    m = jnp.mean(z3, axis=1)                                    # (B, Cout)
    y_se = jax.nn.sigmoid(_dot(jnp.maximum(_dot(m, w1s_ref[...]), 0.0),
                               w2s_ref[...]))
    hd = jnp.maximum(_dot(m, w1d_ref[...]), 0.0)
    hd = jnp.maximum(_dot(hd, w2d_ref[...]), 0.0)
    y_dual = jax.nn.sigmoid(_dot(hd, w3d_ref[...]))
    gate = y_se + y_dual                                        # (B, Cout)

    # Residual path uses the raw block input (1x1 conv when channels change).
    if use_res_conv:
        res = _dot(x, wres_ref[...]) + bres_ref[...]            # (B*L, Cout)
    else:
        res = x
    out3 = z3 * gate[:, None, :] + res.reshape(B, L, Cout)

    if emit_mean:
        o_ref[...] = jnp.mean(out3, axis=1).astype(o_ref.dtype)        # (B, Cout)
    else:
        o_ref[...] = out3.reshape(B * L, Cout).astype(o_ref.dtype)     # (B*L, Cout)


def tail_kernel(m_ref, wfc_ref, bfc_ref, wg_ref, bg_ref, bhn_ref, wo_ref, bo_ref,
                o_ref, *, H):
    """fc_resnet + BiGRU over a length-1 sequence (h0 == 0) + final Linear.

    With h0 == 0 the recurrent matmul W_hh @ h0 is exactly zero, so only b_hh
    enters the gates (PyTorch gate order r, z, n).  Both directions' gate
    weights are packed into one (256, 6H) matrix with column blocks
    [r_f | r_b | z_f | z_b | n_f | n_b], so the hidden state h == concat(h_f, h_b)
    comes out already laid out for the final Linear."""
    feat = _dot(m_ref[...], wfc_ref[...]) + bfc_ref[...]        # (B, 256)
    g = _dot(feat, wg_ref[...]) + bg_ref[...]                   # (B, 6H)
    r = jax.nn.sigmoid(g[:, : 2 * H])
    z = jax.nn.sigmoid(g[:, 2 * H: 4 * H])
    n = jnp.tanh(g[:, 4 * H:] + r * bhn_ref[...])
    h = (1.0 - z) * n                                           # (B, 2H)
    o_ref[...] = (_dot(h, wo_ref[...]) + bo_ref[...]).astype(o_ref.dtype)


# ----------------------------- pallas_call wrappers -----------------------------

def stem(x, p, *, L):
    N, _ = x.shape
    Cout = p['w'].shape[-1]
    return pl.pallas_call(
        functools.partial(stem_kernel, L=L),
        out_shape=jax.ShapeDtypeStruct((N, Cout), jnp.float32),
        grid=(1,),
        in_specs=[_full_spec(x.shape), _full_spec(p['w'].shape),
                  _full_spec(p['b'].shape)],
        out_specs=_full_spec((N, Cout)),
        compiler_params=_params(),
    )(x, p['w'], p['b'])


def block(x, p, *, B, L, emit_mean=False):
    N, _ = x.shape
    Cout = p['w2'].shape[-1]
    use_res_conv = 'wres' in p
    args = [x, p['s1'], p['t1'], p['w1'], p['b1'], p['w2'], p['b2'],
            p['w1s'], p['w2s'], p['w1d'], p['w2d'], p['w3d']]
    if use_res_conv:
        args += [p['wres'], p['bres']]
    out_shape = (B, Cout) if emit_mean else (N, Cout)
    kern = functools.partial(block_kernel, B=B, L=L,
                             use_res_conv=use_res_conv, emit_mean=emit_mean)
    return pl.pallas_call(
        kern,
        out_shape=jax.ShapeDtypeStruct(out_shape, jnp.float32),
        grid=(1,),
        in_specs=[_full_spec(a.shape) for a in args],
        out_specs=_full_spec(out_shape),
        compiler_params=_params(),
    )(*args)


def tail(m, p, *, H):
    B = m.shape[0]
    ncls = p['bo'].shape[-1]
    args = [m, p['wfc'], p['bfc'], p['wg'], p['bg'], p['bhn'], p['wo'], p['bo']]
    return pl.pallas_call(
        functools.partial(tail_kernel, H=H),
        out_shape=jax.ShapeDtypeStruct((B, ncls), jnp.float32),
        grid=(1,),
        in_specs=[_full_spec(a.shape) for a in args],
        out_specs=_full_spec((B, ncls)),
        compiler_params=_params(),
    )(*args)


# ----------------------------- model forward -----------------------------

def resnet_bigru_forward(params, x_ncl, *, hidden_size):
    """x_ncl: torch-style (B, C_in, L) input -> (B, num_classes) logits."""
    B, _, L = x_ncl.shape
    # channels-last, flattened rows: row i = b*L + l
    x = jnp.transpose(x_ncl, (0, 2, 1)).reshape(B * L, -1).astype(jnp.float32)
    h = stem(x, params['stem'], L=L)                            # (B*L, 64)
    h = block(h, params['layer1'], B=B, L=L)                    # (B*L, 64)
    h = block(h, params['layer2'], B=B, L=L)                    # (B*L, 128)
    m = block(h, params['layer3'], B=B, L=L, emit_mean=True)    # (B, 256) mean over L
    return tail(m, params['tail'], H=hidden_size)               # (B, num_classes)


# ----------------------------- parameters -----------------------------

def init_torch_params(key, input_channels, hidden_size, num_classes):
    """Random parameters in the PyTorch layouts of the reference module."""
    keys = iter(jax.random.split(key, 512))

    def rnd(shape, scale=0.05):
        return scale * jax.random.normal(next(keys), shape, jnp.float32)

    def bn(c):
        return dict(gamma=1.0 + rnd((c,), 0.1), beta=rnd((c,), 0.1),
                    mean=rnd((c,), 0.1), var=1.0 + jnp.abs(rnd((c,), 0.1)))

    def conv(cin, cout, k):
        return dict(w=rnd((cout, cin, k)), b=rnd((cout,)))

    def basic_block(cin, cout, red=16):
        p = dict(bn1=bn(cin), conv1=conv(cin, cout, 3), bn2=bn(cout),
                 conv2=conv(cout, cout, 3),
                 fc1_se=rnd((cout // red, cout)), fc2_se=rnd((cout, cout // red)),
                 fc1_dual=rnd((cout // red, cout)),
                 fc2_dual=rnd((cout // 2, cout // red)),
                 fc3_dual=rnd((cout, cout // 2)))
        if cin != cout:
            p['residual_conv'] = conv(cin, cout, 1)
        return p

    H = hidden_size

    def gru_dir():
        return dict(w_ih=rnd((3 * H, 256)), w_hh=rnd((3 * H, H)),
                    b_ih=rnd((3 * H,)), b_hh=rnd((3 * H,)))

    return dict(
        conv1=conv(input_channels, 64, 3), bn1=bn(64),
        layer1=basic_block(64, 64), layer2=basic_block(64, 128),
        layer3=basic_block(128, 256),
        fc_resnet=dict(w=rnd((256, 256)), b=rnd((256,))),
        gru_fwd=gru_dir(), gru_bwd=gru_dir(),
        fc=dict(w=rnd((num_classes, 2 * H)), b=rnd((num_classes,))),
    )


def _bn_scale_shift(bn):
    scale = bn['gamma'] / jnp.sqrt(bn['var'] + BN_EPS)
    return scale, bn['beta'] - bn['mean'] * scale


def _conv3_w(w):                               # torch (Cout, Cin, 3) -> (3*Cin, Cout)
    cout, cin, k = w.shape
    return jnp.transpose(w, (2, 1, 0)).reshape(k * cin, cout)


def _lin_w(w):                                 # torch Linear (out, in) -> (in, out) bf16
    return jnp.transpose(w).astype(jnp.bfloat16)


def prepare_params(tp, hidden_size):
    """Convert torch-layout params to kernel layouts (BN folding, packing, bf16)."""
    H = hidden_size

    # stem: fold resnet.bn1 (which follows conv1) into conv1's weight/bias.
    s, t = _bn_scale_shift(tp['bn1'])
    w = _conv3_w(tp['conv1']['w'])
    stem_p = dict(w=(w * s[None, :]).astype(jnp.bfloat16),
                  b=(tp['conv1']['b'] * s + t).reshape(1, -1))

    def block_p(bp):
        s1, t1 = _bn_scale_shift(bp['bn1'])          # applied in-kernel (pre-conv BN)
        s2, t2 = _bn_scale_shift(bp['bn2'])          # folded into conv1 (post-conv BN)
        w1 = _conv3_w(bp['conv1']['w'])
        p = dict(
            s1=s1.reshape(1, -1), t1=t1.reshape(1, -1),
            w1=(w1 * s2[None, :]).astype(jnp.bfloat16),
            b1=(bp['conv1']['b'] * s2 + t2).reshape(1, -1),
            w2=_conv3_w(bp['conv2']['w']).astype(jnp.bfloat16),
            b2=bp['conv2']['b'].reshape(1, -1),
            w1s=_lin_w(bp['fc1_se']), w2s=_lin_w(bp['fc2_se']),
            w1d=_lin_w(bp['fc1_dual']), w2d=_lin_w(bp['fc2_dual']),
            w3d=_lin_w(bp['fc3_dual']),
        )
        if 'residual_conv' in bp:
            p['wres'] = jnp.transpose(bp['residual_conv']['w'][:, :, 0]).astype(jnp.bfloat16)
            p['bres'] = bp['residual_conv']['b'].reshape(1, -1)
        return p

    # GRU packing: column blocks [r_f | r_b | z_f | z_b | n_f | n_b], each H wide.
    f, b = tp['gru_fwd'], tp['gru_bwd']

    def gate_w(d, i):
        return jnp.transpose(d['w_ih'][i * H:(i + 1) * H]).astype(jnp.bfloat16)

    def gate_b(d, i):
        bi = d['b_ih'][i * H:(i + 1) * H]
        if i < 2:                                    # r, z: b_ih + b_hh
            return bi + d['b_hh'][i * H:(i + 1) * H]
        return bi                                    # n: b_in only (b_hn kept separate)

    wg = jnp.concatenate([gate_w(f, 0), gate_w(b, 0),
                          gate_w(f, 1), gate_w(b, 1),
                          gate_w(f, 2), gate_w(b, 2)], axis=1)          # (256, 6H)
    bg = jnp.concatenate([gate_b(f, 0), gate_b(b, 0), gate_b(f, 1),
                          gate_b(b, 1), gate_b(f, 2), gate_b(b, 2)]).reshape(1, 6 * H)
    bhn = jnp.concatenate([f['b_hh'][2 * H:], b['b_hh'][2 * H:]]).reshape(1, 2 * H)
    # NOTE: weight_hh is mathematically unused here — the GRU runs on a length-1
    # sequence with h0 == 0, so W_hh @ h == 0 and only bias_hh enters the gates.

    tail_p = dict(
        wfc=_lin_w(tp['fc_resnet']['w']), bfc=tp['fc_resnet']['b'].reshape(1, -1),
        wg=wg, bg=bg, bhn=bhn,
        wo=_lin_w(tp['fc']['w']), bo=tp['fc']['b'].reshape(1, -1),
    )

    return dict(stem=stem_p, layer1=block_p(tp['layer1']),
                layer2=block_p(tp['layer2']), layer3=block_p(tp['layer3']),
                tail=tail_p)


# ----------------------------- demo -----------------------------

if __name__ == "__main__":
    B, C_IN, L = 2, 4, 16
    HIDDEN, NUM_CLASSES = 32, 5

    key = jax.random.PRNGKey(0)
    pkey, xkey = jax.random.split(key)
    torch_params = init_torch_params(pkey, C_IN, HIDDEN, NUM_CLASSES)
    params = prepare_params(torch_params, HIDDEN)
    x = jax.random.normal(xkey, (B, C_IN, L), jnp.float32)   # torch NCL input

    fwd = jax.jit(functools.partial(resnet_bigru_forward, hidden_size=HIDDEN))
    out = fwd(params, x)
    out = jax.block_until_ready(out)

    assert out.shape == (B, NUM_CLASSES), out.shape
    assert bool(jnp.all(jnp.isfinite(out)))
    print("KERNEL_OK")
</pallas_src>

<mosaic_0001>
module attributes {stable_mosaic.version = 11 : i64} {
  func.func @stem_kernel(%arg0: i32, %arg1: memref<32x4xf32, #tpu.memory_space<vmem>>, %arg2: memref<12x64xbf16, #tpu.memory_space<vmem>>, %arg3: memref<1x64xf32, #tpu.memory_space<vmem>>, %arg4: memref<32x64xf32, #tpu.memory_space<vmem>>) attributes {dimension_semantics = [#tpu.dimension_semantics<parallel>], iteration_bounds = array<i64: 1>, scalar_prefetch = 0 : i64, scratch_operands = 0 : i64, tpu.core_type = #tpu.core_type<tc>, window_params = [{pipeline_mode = #tpu.pipeline_mode<synchronous>, transform_indices = @transform_0, window_bounds = array<i64: 32, 4>}, {pipeline_mode = #tpu.pipeline_mode<synchronous>, transform_indices = @transform_1, window_bounds = array<i64: 12, 64>}, {pipeline_mode = #tpu.pipeline_mode<synchronous>, transform_indices = @transform_2, window_bounds = array<i64: 1, 64>}, {pipeline_mode = #tpu.pipeline_mode<synchronous>, transform_indices = @transform_3, window_bounds = array<i64: 32, 64>}]} {
    %c0 = arith.constant 0 : index
    %c0_0 = arith.constant 0 : index
    %0 = vector.load %arg1[%c0, %c0_0] : memref<32x4xf32, #tpu.memory_space<vmem>>, vector<32x4xf32>
    %c0_1 = arith.constant 0 : index
    %c0_2 = arith.constant 0 : index
    %1 = vector.load %arg2[%c0_1, %c0_2] : memref<12x64xbf16, #tpu.memory_space<vmem>>, vector<12x64xbf16>
    %c0_3 = arith.constant 0 : index
    %c0_4 = arith.constant 0 : index
    %2 = vector.load %arg3[%c0_3, %c0_4] : memref<1x64xf32, #tpu.memory_space<vmem>>, vector<1x64xf32>
    %3 = tpu.iota {dimensions = array<i32: 0>} : vector<32x4xi32>
    %c16_i32 = arith.constant 16 : i32
    %c0_i32 = arith.constant 0 : i32
    %4 = arith.cmpi eq, %c16_i32, %c0_i32 : i32
    %c1_i32 = arith.constant 1 : i32
    %5 = arith.select %4, %c1_i32, %c16_i32 : i32
    %6 = vector.broadcast %5 : i32 to vector<32x4xi32>
    %7 = arith.remsi %3, %6 : vector<32x4xi32>
    %c0_i32_5 = arith.constant 0 : i32
    %8 = vector.broadcast %c0_i32_5 : i32 to vector<32x4xi32>
    %9 = arith.cmpi ne, %7, %8 : vector<32x4xi32>
    %c0_i32_6 = arith.constant 0 : i32
    %10 = vector.broadcast %c0_i32_6 : i32 to vector<32x4xi32>
    %11 = arith.cmpi slt, %7, %10 : vector<32x4xi32>
    %c0_i32_7 = arith.constant 0 : i32
    %12 = arith.cmpi slt, %5, %c0_i32_7 : i32
    %13 = vector.broadcast %12 : i1 to vector<32x4xi1>
    %14 = vector.broadcast %13 : vector<32x4xi1> to vector<32x4xi1>
    %15 = arith.xori %11, %14 : vector<32x4xi1>
    %16 = arith.andi %15, %9 : vector<32x4xi1>
    %17 = vector.broadcast %5 : i32 to vector<32x4xi32>
    %18 = arith.addi %7, %17 : vector<32x4xi32>
    %19 = arith.select %16, %18, %7 : vector<32x4xi1>, vector<32x4xi32>
    %c1_i32_8 = arith.constant 1 : i32
    %20 = vector.broadcast %c1_i32_8 : i32 to vector<32x4xi32>
    %21 = arith.cmpi sge, %19, %20 : vector<32x4xi32>
    %c1_i32_9 = arith.constant 1 : i32
    %22 = tpu.dynamic_rotate %0 by %c1_i32_9 dim 0 : vector<32x4xf32>, i32 -> vector<32x4xf32>
    %cst = arith.constant 0.000000e+00 : f32
    %23 = vector.broadcast %cst : f32 to vector<32x4xf32>
    %24 = arith.select %21, %22, %23 : vector<32x4xi1>, vector<32x4xf32>
    %c15_i32 = arith.constant 15 : i32
    %25 = vector.broadcast %c15_i32 : i32 to vector<32x4xi32>
    %26 = arith.cmpi slt, %19, %25 : vector<32x4xi32>
    %c31_i32 = arith.constant 31 : i32
    %27 = tpu.dynamic_rotate %0 by %c31_i32 dim 0 : vector<32x4xf32>, i32 -> vector<32x4xf32>
    %cst_10 = arith.constant 0.000000e+00 : f32
    %28 = vector.broadcast %cst_10 : f32 to vector<32x4xf32>
    %29 = arith.select %26, %27, %28 : vector<32x4xi1>, vector<32x4xf32>
    %30 = tpu.concatenate %24, %0, %29 in 1 : vector<32x4xf32>, vector<32x4xf32>, vector<32x4xf32> -> vector<32x12xf32>
    %31 = arith.truncf %30 : vector<32x12xf32> to vector<32x12xbf16>
    %cst_11 = arith.constant dense<0.000000e+00> : vector<32x64xf32>
    %32 = tpu.matmul %31, %1, %cst_11 {dimension_numbers = #tpu.dot_dimension_numbers<[1], [0], [0], [1], [0, 0, 1, 1], [], []>} : vector<32x12xbf16>, vector<12x64xbf16>, vector<32x64xf32> -> vector<32x64xf32>
    %33 = vector.broadcast %2 : vector<1x64xf32> to vector<32x64xf32>
    %34 = arith.addf %32, %33 : vector<32x64xf32>
    %cst_12 = arith.constant 0.000000e+00 : f32
    %35 = vector.broadcast %cst_12 : f32 to vector<32x64xf32>
    %36 = arith.maximumf %34, %35 : vector<32x64xf32>
    %c0_13 = arith.constant 0 : index
    %c0_14 = arith.constant 0 : index
    %37 = vector.load %arg4[%c0_13, %c0_14] : memref<32x64xf32, #tpu.memory_space<vmem>>, vector<32x64xf32>
    tpu.vector_store %arg4[%c0_13, %c0_14], %36 {strides = array<i32>} : memref<32x64xf32, #tpu.memory_space<vmem>>, vector<32x64xf32>,
    return
  }
  func.func @transform_0(%arg0: i32) -> (i32, i32) {
    %c0_i32 = arith.constant 0 : i32
    %c0_i32_0 = arith.constant 0 : i32
    %c0_i32_1 = arith.constant 0 : i32
    return %c0_i32, %c0_i32_0 : i32, i32
  }
  func.func @transform_1(%arg0: i32) -> (i32, i32) {
    %c0_i32 = arith.constant 0 : i32
    %c0_i32_0 = arith.constant 0 : i32
    %c0_i32_1 = arith.constant 0 : i32
    return %c0_i32, %c0_i32_0 : i32, i32
  }
  func.func @transform_2(%arg0: i32) -> (i32, i32) {
    %c0_i32 = arith.constant 0 : i32
    %c0_i32_0 = arith.constant 0 : i32
    %c0_i32_1 = arith.constant 0 : i32
    return %c0_i32, %c0_i32_0 : i32, i32
  }
  func.func @transform_3(%arg0: i32) -> (i32, i32) {
    %c0_i32 = arith.constant 0 : i32
    %c0_i32_0 = arith.constant 0 : i32
    %c0_i32_1 = arith.constant 0 : i32
    return %c0_i32, %c0_i32_0 : i32, i32
  }
}

module attributes {stable_mosaic.version = 11 : i64} {
  func.func @block_kernel(%arg0: i32, %arg1: memref<32x64xf32, #tpu.memory_space<vmem>>, %arg2: memref<1x64xf32, #tpu.memory_space<vmem>>, %arg3: memref<1x64xf32, #tpu.memory_space<vmem>>, %arg4: memref<192x64xbf16, #tpu.memory_space<vmem>>, %arg5: memref<1x64xf32, #tpu.memory_space<vmem>>, %arg6: memref<192x64xbf16, #tpu.memory_space<vmem>>, %arg7: memref<1x64xf32, #tpu.memory_space<vmem>>, %arg8: memref<64x4xbf16, #tpu.memory_space<vmem>>, %arg9: memref<4x64xbf16, #tpu.memory_space<vmem>>, %arg10: memref<64x4xbf16, #tpu.memory_space<vmem>>, %arg11: memref<4x32xbf16, #tpu.memory_space<vmem>>, %arg12: memref<32x64xbf16, #tpu.memory_space<vmem>>, %arg13: memref<32x64xf32, #tpu.memory_space<vmem>>) attributes {dimension_semantics = [#tpu.dimension_semantics<parallel>], iteration_bounds = array<i64: 1>, scalar_prefetch = 0 : i64, scratch_operands = 0 : i64, tpu.core_type = #tpu.core_type<tc>, window_params = [{pipeline_mode = #tpu.pipeline_mode<synchronous>, transform_indices = @transform_0, window_bounds = array<i64: 32, 64>}, {pipeline_mode = #tpu.pipeline_mode<synchronous>, transform_indices = @transform_1, window_bounds = array<i64: 1, 64>}, {pipeline_mode = #tpu.pipeline_mode<synchronous>, transform_indices = @transform_2, window_bounds = array<i64: 1, 64>}, {pipeline_mode = #tpu.pipeline_mode<synchronous>, transform_indices = @transform_3, window_bounds = array<i64: 192, 64>}, {pipeline_mode = #tpu.pipeline_mode<synchronous>, transform_indices = @transform_4, window_bounds = array<i64: 1, 64>}, {pipeline_mode = #tpu.pipeline_mode<synchronous>, transform_indices = @transform_5, window_bounds = array<i64: 192, 64>}, {pipeline_mode = #tpu.pipeline_mode<synchronous>, transform_indices = @transform_6, window_bounds = array<i64: 1, 64>}, {pipeline_mode = #tpu.pipeline_mode<synchronous>, transform_indices = @transform_7, window_bounds = array<i64: 64, 4>}, {pipeline_mode = #tpu.pipeline_mode<synchronous>, transform_indices = @transform_8, window_bounds = array<i64: 4, 64>}, {pipeline_mode = #tpu.pipeline_mode<synchronous>, transform_indices = @transform_9, window_bounds = array<i64: 64, 4>}, {pipeline_mode = #tpu.pipeline_mode<synchronous>, transform_indices = @transform_10, window_bounds = array<i64: 4, 32>}, {pipeline_mode = #tpu.pipeline_mode<synchronous>, transform_indices = @transform_11, window_bounds = array<i64: 32, 64>}, {pipeline_mode = #tpu.pipeline_mode<synchronous>, transform_indices = @transform_12, window_bounds = array<i64: 32, 64>}]} {
    %c0 = arith.constant 0 : index
    %c0_0 = arith.constant 0 : index
    %0 = vector.load %arg1[%c0, %c0_0] : memref<32x64xf32, #tpu.memory_space<vmem>>, vector<32x64xf32>
    %c0_1 = arith.constant 0 : index
    %c0_2 = arith.constant 0 : index
    %1 = vector.load %arg2[%c0_1, %c0_2] : memref<1x64xf32, #tpu.memory_space<vmem>>, vector<1x64xf32>
    %2 = vector.broadcast %1 : vector<1x64xf32> to vector<32x64xf32>
    %3 = arith.mulf %0, %2 : vector<32x64xf32>
    %c0_3 = arith.constant 0 : index
    %c0_4 = arith.constant 0 : index
    %4 = vector.load %arg3[%c0_3, %c0_4] : memref<1x64xf32, #tpu.memory_space<vmem>>, vector<1x64xf32>
    %5 = vector.broadcast %4 : vector<1x64xf32> to vector<32x64xf32>
    %6 = arith.addf %3, %5 : vector<32x64xf32>
    %cst = arith.constant 0.000000e+00 : f32
    %7 = vector.broadcast %cst : f32 to vector<32x64xf32>
    %8 = arith.maximumf %6, %7 : vector<32x64xf32>
    %c0_5 = arith.constant 0 : index
    %c0_6 = arith.constant 0 : index
    %9 = vector.load %arg4[%c0_5, %c0_6] : memref<192x64xbf16, #tpu.memory_space<vmem>>, vector<192x64xbf16>
    %c0_7 = arith.constant 0 : index
    %c0_8 = arith.constant 0 : index
    %10 = vector.load %arg5[%c0_7, %c0_8] : memref<1x64xf32, #tpu.memory_space<vmem>>, vector<1x64xf32>
    %11 = tpu.iota {dimensions = array<i32: 0>} : vector<32x64xi32>
    %c16_i32 = arith.constant 16 : i32
    %c0_i32 = arith.constant 0 : i32
    %12 = arith.cmpi eq, %c16_i32, %c0_i32 : i32
    %c1_i32 = arith.constant 1 : i32
    %13 = arith.select %12, %c1_i32, %c16_i32 : i32
    %14 = vector.broadcast %13 : i32 to vector<32x64xi32>
    %15 = arith.remsi %11, %14 : vector<32x64xi32>
    %c0_i32_9 = arith.constant 0 : i32
    %16 = vector.broadcast %c0_i32_9 : i32 to vector<32x64xi32>
    %17 = arith.cmpi ne, %15, %16 : vector<32x64xi32>
    %c0_i32_10 = arith.constant 0 : i32
    %18 = vector.broadcast %c0_i32_10 : i32 to vector<32x64xi32>
    %19 = arith.cmpi slt, %15, %18 : vector<32x64xi32>
    %c0_i32_11 = arith.constant 0 : i32
    %20 = arith.cmpi slt, %13, %c0_i32_11 : i32
    %21 = vector.broadcast %20 : i1 to vector<32x64xi1>
    %22 = vector.broadcast %21 : vector<32x64xi1> to vector<32x64xi1>
    %23 = arith.xori %19, %22 : vector<32x64xi1>
    %24 = arith.andi %23, %17 : vector<32x64xi1>
    %25 = vector.broadcast %13 : i32 to vector<32x64xi32>
    %26 = arith.addi %15, %25 : vector<32x64xi32>
    %27 = arith.select %24, %26, %15 : vector<32x64xi1>, vector<32x64xi32>
    %c1_i32_12 = arith.constant 1 : i32
    %28 = vector.broadcast %c1_i32_12 : i32 to vector<32x64xi32>
    %29 = arith.cmpi sge, %27, %28 : vector<32x64xi32>
    %c1_i32_13 = arith.constant 1 : i32
    %30 = tpu.dynamic_rotate %8 by %c1_i32_13 dim 0 : vector<32x64xf32>, i32 -> vector<32x64xf32>
    %cst_14 = arith.constant 0.000000e+00 : f32
    %31 = vector.broadcast %cst_14 : f32 to vector<32x64xf32>
    %32 = arith.select %29, %30, %31 : vector<32x64xi1>, vector<32x64xf32>
    %c15_i32 = arith.constant 15 : i32
    %33 = vector.broadcast %c15_i32 : i32 to vector<32x64xi32>
    %34 = arith.cmpi slt, %27, %33 : vector<32x64xi32>
    %c31_i32 = arith.constant 31 : i32
    %35 = tpu.dynamic_rotate %8 by %c31_i32 dim 0 : vector<32x64xf32>, i32 -> vector<32x64xf32>
    %cst_15 = arith.constant 0.000000e+00 : f32
    %36 = vector.broadcast %cst_15 : f32 to vector<32x64xf32>
    %37 = arith.select %34, %35, %36 : vector<32x64xi1>, vector<32x64xf32>
    %38 = tpu.concatenate %32, %8, %37 in 1 : vector<32x64xf32>, vector<32x64xf32>, vector<32x64xf32> -> vector<32x192xf32>
    %39 = arith.truncf %38 : vector<32x192xf32> to vector<32x192xbf16>
    %cst_16 = arith.constant dense<0.000000e+00> : vector<32x64xf32>
    %40 = tpu.matmul %39, %9, %cst_16 {dimension_numbers = #tpu.dot_dimension_numbers<[1], [0], [0], [1], [0, 0, 1, 1], [], []>} : vector<32x192xbf16>, vector<192x64xbf16>, vector<32x64xf32> -> vector<32x64xf32>
    %41 = vector.broadcast %10 : vector<1x64xf32> to vector<32x64xf32>
    %42 = arith.addf %40, %41 : vector<32x64xf32>
    %cst_17 = arith.constant 0.000000e+00 : f32
    %43 = vector.broadcast %cst_17 : f32 to vector<32x64xf32>
    %44 = arith.maximumf %42, %43 : vector<32x64xf32>
    %c0_18 = arith.constant 0 : index
    %c0_19 = arith.constant 0 : index
    %45 = vector.load %arg6[%c0_18, %c0_19] : memref<192x64xbf16, #tpu.memory_space<vmem>>, vector<192x64xbf16>
    %c0_20 = arith.constant 0 : index
    %c0_21 = arith.constant 0 : index
    %46 = vector.load %arg7[%c0_20, %c0_21] : memref<1x64xf32, #tpu.memory_space<vmem>>, vector<1x64xf32>
    %47 = tpu.iota {dimensions = array<i32: 0>} : vector<32x64xi32>
    %c16_i32_22 = arith.constant 16 : i32
    %c0_i32_23 = arith.constant 0 : i32
    %48 = arith.cmpi eq, %c16_i32_22, %c0_i32_23 : i32
    %c1_i32_24 = arith.constant 1 : i32
    %49 = arith.select %48, %c1_i32_24, %c16_i32_22 : i32
    %50 = vector.broadcast %49 : i32 to vector<32x64xi32>
    %51 = arith.remsi %47, %50 : vector<32x64xi32>
    %c0_i32_25 = arith.constant 0 : i32
    %52 = vector.broadcast %c0_i32_25 : i32 to vector<32x64xi32>
    %53 = arith.cmpi ne, %51, %52 : vector<32x64xi32>
    %c0_i32_26 = arith.constant 0 : i32
    %54 = vector.broadcast %c0_i32_26 : i32 to vector<32x64xi32>
    %55 = arith.cmpi slt, %51, %54 : vector<32x64xi32>
    %c0_i32_27 = arith.constant 0 : i32
    %56 = arith.cmpi slt, %49, %c0_i32_27 : i32
    %57 = vector.broadcast %56 : i1 to vector<32x64xi1>
    %58 = vector.broadcast %57 : vector<32x64xi1> to vector<32x64xi1>
    %59 = arith.xori %55, %58 : vector<32x64xi1>
    %60 = arith.andi %59, %53 : vector<32x64xi1>
    %61 = vector.broadcast %49 : i32 to vector<32x64xi32>
    %62 = arith.addi %51, %61 : vector<32x64xi32>
    %63 = arith.select %60, %62, %51 : vector<32x64xi1>, vector<32x64xi32>
    %c1_i32_28 = arith.constant 1 : i32
    %64 = vector.broadcast %c1_i32_28 : i32 to vector<32x64xi32>
    %65 = arith.cmpi sge, %63, %64 : vector<32x64xi32>
    %c1_i32_29 = arith.constant 1 : i32
    %66 = tpu.dynamic_rotate %44 by %c1_i32_29 dim 0 : vector<32x64xf32>, i32 -> vector<32x64xf32>
    %cst_30 = arith.constant 0.000000e+00 : f32
    %67 = vector.broadcast %cst_30 : f32 to vector<32x64xf32>
    %68 = arith.select %65, %66, %67 : vector<32x64xi1>, vector<32x64xf32>
    %c15_i32_31 = arith.constant 15 : i32
    %69 = vector.broadcast %c15_i32_31 : i32 to vector<32x64xi32>
    %70 = arith.cmpi slt, %63, %69 : vector<32x64xi32>
    %c31_i32_32 = arith.constant 31 : i32
    %71 = tpu.dynamic_rotate %44 by %c31_i32_32 dim 0 : vector<32x64xf32>, i32 -> vector<32x64xf32>
    %cst_33 = arith.constant 0.000000e+00 : f32
    %72 = vector.broadcast %cst_33 : f32 to vector<32x64xf32>
    %73 = arith.select %70, %71, %72 : vector<32x64xi1>, vector<32x64xf32>
    %74 = tpu.concatenate %68, %44, %73 in 1 : vector<32x64xf32>, vector<32x64xf32>, vector<32x64xf32> -> vector<32x192xf32>
    %75 = arith.truncf %74 : vector<32x192xf32> to vector<32x192xbf16>
    %cst_34 = arith.constant dense<0.000000e+00> : vector<32x64xf32>
    %76 = tpu.matmul %75, %45, %cst_34 {dimension_numbers = #tpu.dot_dimension_numbers<[1], [0], [0], [1], [0, 0, 1, 1], [], []>} : vector<32x192xbf16>, vector<192x64xbf16>, vector<32x64xf32> -> vector<32x64xf32>
    %77 = vector.broadcast %46 : vector<1x64xf32> to vector<32x64xf32>
    %78 = arith.addf %76, %77 : vector<32x64xf32>
    %79 = vector.shape_cast %78 : vector<32x64xf32> to vector<2x16x64xf32>
    %cst_35 = arith.constant dense<0.000000e+00> : vector<2x64xf32>
    %80 = vector.multi_reduction <add>, %79, %cst_35 [1] : vector<2x16x64xf32> to vector<2x64xf32>
    %cst_36 = arith.constant 1.600000e+01 : f32
    %81 = vector.broadcast %cst_36 : f32 to vector<2x64xf32>
    %82 = arith.divf %80, %81 : vector<2x64xf32>
    %c0_37 = arith.constant 0 : index
    %c0_38 = arith.constant 0 : index
    %83 = vector.load %arg8[%c0_37, %c0_38] : memref<64x4xbf16, #tpu.memory_space<vmem>>, vector<64x4xbf16>
    %84 = arith.truncf %82 : vector<2x64xf32> to vector<2x64xbf16>
    %cst_39 = arith.constant dense<0.000000e+00> : vector<2x4xf32>
    %85 = tpu.matmul %84, %83, %cst_39 {dimension_numbers = #tpu.dot_dimension_numbers<[1], [0], [0], [1], [0, 0, 1, 1], [], []>} : vector<2x64xbf16>, vector<64x4xbf16>, vector<2x4xf32> -> vector<2x4xf32>
    %cst_40 = arith.constant 0.000000e+00 : f32
    %86 = vector.broadcast %cst_40 : f32 to vector<2x4xf32>
    %87 = arith.maximumf %85, %86 : vector<2x4xf32>
    %c0_41 = arith.constant 0 : index
    %c0_42 = arith.constant 0 : index
    %88 = vector.load %arg9[%c0_41, %c0_42] : memref<4x64xbf16, #tpu.memory_space<vmem>>, vector<4x64xbf16>
    %89 = arith.truncf %87 : vector<2x4xf32> to vector<2x4xbf16>
    %cst_43 = arith.constant dense<0.000000e+00> : vector<2x64xf32>
    %90 = tpu.matmul %89, %88, %cst_43 {dimension_numbers = #tpu.dot_dimension_numbers<[1], [0], [0], [1], [0, 0, 1, 1], [], []>} : vector<2x4xbf16>, vector<4x64xbf16>, vector<2x64xf32> -> vector<2x64xf32>
    %91 = arith.negf %90 : vector<2x64xf32>
    %92 = math.exp %91 : vector<2x64xf32>
    %cst_44 = arith.constant 1.000000e+00 : f32
    %93 = vector.broadcast %cst_44 : f32 to vector<2x64xf32>
    %94 = arith.addf %93, %92 : vector<2x64xf32>
    %95 = arith.divf %93, %94 : vector<2x64xf32>
    %c0_45 = arith.constant 0 : index
    %c0_46 = arith.constant 0 : index
    %96 = vector.load %arg10[%c0_45, %c0_46] : memref<64x4xbf16, #tpu.memory_space<vmem>>, vector<64x4xbf16>
    %97 = arith.truncf %82 : vector<2x64xf32> to vector<2x64xbf16>
    %cst_47 = arith.constant dense<0.000000e+00> : vector<2x4xf32>
    %98 = tpu.matmul %97, %96, %cst_47 {dimension_numbers = #tpu.dot_dimension_numbers<[1], [0], [0], [1], [0, 0, 1, 1], [], []>} : vector<2x64xbf16>, vector<64x4xbf16>, vector<2x4xf32> -> vector<2x4xf32>
    %cst_48 = arith.constant 0.000000e+00 : f32
    %99 = vector.broadcast %cst_48 : f32 to vector<2x4xf32>
    %100 = arith.maximumf %98, %99 : vector<2x4xf32>
    %c0_49 = arith.constant 0 : index
    %c0_50 = arith.constant 0 : index
    %101 = vector.load %arg11[%c0_49, %c0_50] : memref<4x32xbf16, #tpu.memory_space<vmem>>, vector<4x32xbf16>
    %102 = arith.truncf %100 : vector<2x4xf32> to vector<2x4xbf16>
    %cst_51 = arith.constant dense<0.000000e+00> : vector<2x32xf32>
    %103 = tpu.matmul %102, %101, %cst_51 {dimension_numbers = #tpu.dot_dimension_numbers<[1], [0], [0], [1], [0, 0, 1, 1], [], []>} : vector<2x4xbf16>, vector<4x32xbf16>, vector<2x32xf32> -> vector<2x32xf32>
    %cst_52 = arith.constant 0.000000e+00 : f32
    %104 = vector.broadcast %cst_52 : f32 to vector<2x32xf32>
    %105 = arith.maximumf %103, %104 : vector<2x32xf32>
    %c0_53 = arith.constant 0 : index
    %c0_54 = arith.constant 0 : index
    %106 = vector.load %arg12[%c0_53, %c0_54] : memref<32x64xbf16, #tpu.memory_space<vmem>>, vector<32x64xbf16>
    %107 = arith.truncf %105 : vector<2x32xf32> to vector<2x32xbf16>
    %cst_55 = arith.constant dense<0.000000e+00> : vector<2x64xf32>
    %108 = tpu.matmul %107, %106, %cst_55 {dimension_numbers = #tpu.dot_dimension_numbers<[1], [0], [0], [1], [0, 0, 1, 1], [], []>} : vector<2x32xbf16>, vector<32x64xbf16>, vector<2x64xf32> -> vector<2x64xf32>
    %109 = arith.negf %108 : vector<2x64xf32>
    %110 = math.exp %109 : vector<2x64xf32>
    %cst_56 = arith.constant 1.000000e+00 : f32
    %111 = vector.broadcast %cst_56 : f32 to vector<2x64xf32>
    %112 = arith.addf %111, %110 : vector<2x64xf32>
    %113 = arith.divf %111, %112 : vector<2x64xf32>
    %114 = arith.addf %95, %113 : vector<2x64xf32>
    %115 = vector.shape_cast %114 : vector<2x64xf32> to vector<2x1x64xf32>
    %116 = vector.broadcast %115 : vector<2x1x64xf32> to vector<2x16x64xf32>
    %117 = arith.mulf %79, %116 : vector<2x16x64xf32>
    %118 = vector.shape_cast %0 : vector<32x64xf32> to vector<2x16x64xf32>
    %119 = arith.addf %117, %118 : vector<2x16x64xf32>
    %120 = vector.shape_cast %119 : vector<2x16x64xf32> to vector<32x64xf32>
    %c0_57 = arith.constant 0 : index
    %c0_58 = arith.constant 0 : index
    %121 = vector.load %arg13[%c0_57, %c0_58] : memref<32x64xf32, #tpu.memory_space<vmem>>, vector<32x64xf32>
    tpu.vector_store %arg13[%c0_57, %c0_58], %120 {strides = array<i32>} : memref<32x64xf32, #tpu.memory_space<vmem>>, vector<32x64xf32>,
    return
  }
  func.func @transform_0(%arg0: i32) -> (i32, i32) {
    %c0_i32 = arith.constant 0 : i32
    %c0_i32_0 = arith.constant 0 : i32
    %c0_i32_1 = arith.constant 0 : i32
    return %c0_i32, %c0_i32_0 : i32, i32
  }
  func.func @transform_1(%arg0: i32) -> (i32, i32) {
    %c0_i32 = arith.constant 0 : i32
    %c0_i32_0 = arith.constant 0 : i32
    %c0_i32_1 = arith.constant 0 : i32
    return %c0_i32, %c0_i32_0 : i32, i32
  }
  func.func @transform_2(%arg0: i32) -> (i32, i32) {
    %c0_i32 = arith.constant 0 : i32
    %c0_i32_0 = arith.constant 0 : i32
    %c0_i32_1 = arith.constant 0 : i32
    return %c0_i32, %c0_i32_0 : i32, i32
  }
  func.func @transform_3(%arg0: i32) -> (i32, i32) {
    %c0_i32 = arith.constant 0 : i32
    %c0_i32_0 = arith.constant 0 : i32
    %c0_i32_1 = arith.constant 0 : i32
    return %c0_i32, %c0_i32_0 : i32, i32
  }
  func.func @transform_4(%arg0: i32) -> (i32, i32) {
    %c0_i32 = arith.constant 0 : i32
    %c0_i32_0 = arith.constant 0 : i32
    %c0_i32_1 = arith.constant 0 : i32
    return %c0_i32, %c0_i32_0 : i32, i32
  }
  func.func @transform_5(%arg0: i32) -> (i32, i32) {
    %c0_i32 = arith.constant 0 : i32
    %c0_i32_0 = arith.constant 0 : i32
    %c0_i32_1 = arith.constant 0 : i32
    return %c0_i32, %c0_i32_0 : i32, i32
  }
  func.func @transform_6(%arg0: i32) -> (i32, i32) {
    %c0_i32 = arith.constant 0 : i32
    %c0_i32_0 = arith.constant 0 : i32
    %c0_i32_1 = arith.constant 0 : i32
    return %c0_i32, %c0_i32_0 : i32, i32
  }
  func.func @transform_7(%arg0: i32) -> (i32, i32) {
    %c0_i32 = arith.constant 0 : i32
    %c0_i32_0 = arith.constant 0 : i32
    %c0_i32_1 = arith.constant 0 : i32
    return %c0_i32, %c0_i32_0 : i32, i32
  }
  func.func @transform_8(%arg0: i32) -> (i32, i32) {
    %c0_i32 = arith.constant 0 : i32
    %c0_i32_0 = arith.constant 0 : i32
    %c0_i32_1 = arith.constant 0 : i32
    return %c0_i32, %c0_i32_0 : i32, i32
  }
  func.func @transform_9(%arg0: i32) -> (i32, i32) {
    %c0_i32 = arith.constant 0 : i32
    %c0_i32_0 = arith.constant 0 : i32
    %c0_i32_1 = arith.constant 0 : i32
    return %c0_i32, %c0_i32_0 : i32, i32
  }
  func.func @transform_10(%arg0: i32) -> (i32, i32) {
    %c0_i32 = arith.constant 0 : i32
    %c0_i32_0 = arith.constant 0 : i32
    %c0_i32_1 = arith.constant 0 : i32
    return %c0_i32, %c0_i32_0 : i32, i32
  }
  func.func @transform_11(%arg0: i32) -> (i32, i32) {
    %c0_i32 = arith.constant 0 : i32
    %c0_i32_0 = arith.constant 0 : i32
    %c0_i32_1 = arith.constant 0 : i32
    return %c0_i32, %c0_i32_0 : i32, i32
  }
  func.func @transform_12(%arg0: i32) -> (i32, i32) {
    %c0_i32 = arith.constant 0 : i32
    %c0_i32_0 = arith.constant 0 : i32
    %c0_i32_1 = arith.constant 0 : i32
    return %c0_i32, %c0_i32_0 : i32, i32
  }
}

module attributes {stable_mosaic.version = 11 : i64} {
  func.func @block_kernel(%arg0: i32, %arg1: memref<32x64xf32, #tpu.memory_space<vmem>>, %arg2: memref<1x64xf32, #tpu.memory_space<vmem>>, %arg3: memref<1x64xf32, #tpu.memory_space<vmem>>, %arg4: memref<192x128xbf16, #tpu.memory_space<vmem>>, %arg5: memref<1x128xf32, #tpu.memory_space<vmem>>, %arg6: memref<384x128xbf16, #tpu.memory_space<vmem>>, %arg7: memref<1x128xf32, #tpu.memory_space<vmem>>, %arg8: memref<128x8xbf16, #tpu.memory_space<vmem>>, %arg9: memref<8x128xbf16, #tpu.memory_space<vmem>>, %arg10: memref<128x8xbf16, #tpu.memory_space<vmem>>, %arg11: memref<8x64xbf16, #tpu.memory_space<vmem>>, %arg12: memref<64x128xbf16, #tpu.memory_space<vmem>>, %arg13: memref<64x128xbf16, #tpu.memory_space<vmem>>, %arg14: memref<1x128xf32, #tpu.memory_space<vmem>>, %arg15: memref<32x128xf32, #tpu.memory_space<vmem>>) attributes {dimension_semantics = [#tpu.dimension_semantics<parallel>], iteration_bounds = array<i64: 1>, scalar_prefetch = 0 : i64, scratch_operands = 0 : i64, tpu.core_type = #tpu.core_type<tc>, window_params = [{pipeline_mode = #tpu.pipeline_mode<synchronous>, transform_indices = @transform_0, window_bounds = array<i64: 32, 64>}, {pipeline_mode = #tpu.pipeline_mode<synchronous>, transform_indices = @transform_1, window_bounds = array<i64: 1, 64>}, {pipeline_mode = #tpu.pipeline_mode<synchronous>, transform_indices = @transform_2, window_bounds = array<i64: 1, 64>}, {pipeline_mode = #tpu.pipeline_mode<synchronous>, transform_indices = @transform_3, window_bounds = array<i64: 192, 128>}, {pipeline_mode = #tpu.pipeline_mode<synchronous>, transform_indices = @transform_4, window_bounds = array<i64: 1, 128>}, {pipeline_mode = #tpu.pipeline_mode<synchronous>, transform_indices = @transform_5, window_bounds = array<i64: 384, 128>}, {pipeline_mode = #tpu.pipeline_mode<synchronous>, transform_indices = @transform_6, window_bounds = array<i64: 1, 128>}, {pipeline_mode = #tpu.pipeline_mode<synchronous>, transform_indices = @transform_7, window_bounds = array<i64: 128, 8>}, {pipeline_mode = #tpu.pipeline_mode<synchronous>, transform_indices = @transform_8, window_bounds = array<i64: 8, 128>}, {pipeline_mode = #tpu.pipeline_mode<synchronous>, transform_indices = @transform_9, window_bounds = array<i64: 128, 8>}, {pipeline_mode = #tpu.pipeline_mode<synchronous>, transform_indices = @transform_10, window_bounds = array<i64: 8, 64>}, {pipeline_mode = #tpu.pipeline_mode<synchronous>, transform_indices = @transform_11, window_bounds = array<i64: 64, 128>}, {pipeline_mode = #tpu.pipeline_mode<synchronous>, transform_indices = @transform_12, window_bounds = array<i64: 64, 128>}, {pipeline_mode = #tpu.pipeline_mode<synchronous>, transform_indices = @transform_13, window_bounds = array<i64: 1, 128>}, {pipeline_mode = #tpu.pipeline_mode<synchronous>, transform_indices = @transform_14, window_bounds = array<i64: 32, 128>}]} {
    %c0 = arith.constant 0 : index
    %c0_0 = arith.constant 0 : index
    %0 = vector.load %arg1[%c0, %c0_0] : memref<32x64xf32, #tpu.memory_space<vmem>>, vector<32x64xf32>
    %c0_1 = arith.constant 0 : index
    %c0_2 = arith.constant 0 : index
    %1 = vector.load %arg2[%c0_1, %c0_2] : memref<1x64xf32, #tpu.memory_space<vmem>>, vector<1x64xf32>
    %2 = vector.broadcast %1 : vector<1x64xf32> to vector<32x64xf32>
    %3 = arith.mulf %0, %2 : vector<32x64xf32>
    %c0_3 = arith.constant 0 : index
    %c0_4 = arith.constant 0 : index
    %4 = vector.load %arg3[%c0_3, %c0_4] : memref<1x64xf32, #tpu.memory_space<vmem>>, vector<1x64xf32>
    %5 = vector.broadcast %4 : vector<1x64xf32> to vector<32x64xf32>
    %6 = arith.addf %3, %5 : vector<32x64xf32>
    %cst = arith.constant 0.000000e+00 : f32
    %7 = vector.broadcast %cst : f32 to vector<32x64xf32>
    %8 = arith.maximumf %6, %7 : vector<32x64xf32>
    %c0_5 = arith.constant 0 : index
    %c0_6 = arith.constant 0 : index
    %9 = vector.load %arg4[%c0_5, %c0_6] : memref<192x128xbf16, #tpu.memory_space<vmem>>, vector<192x128xbf16>
    %c0_7 = arith.constant 0 : index
    %c0_8 = arith.constant 0 : index
    %10 = vector.load %arg5[%c0_7, %c0_8] : memref<1x128xf32, #tpu.memory_space<vmem>>, vector<1x128xf32>
    %11 = tpu.iota {dimensions = array<i32: 0>} : vector<32x64xi32>
    %c16_i32 = arith.constant 16 : i32
    %c0_i32 = arith.constant 0 : i32
    %12 = arith.cmpi eq, %c16_i32, %c0_i32 : i32
    %c1_i32 = arith.constant 1 : i32
    %13 = arith.select %12, %c1_i32, %c16_i32 : i32
    %14 = vector.broadcast %13 : i32 to vector<32x64xi32>
    %15 = arith.remsi %11, %14 : vector<32x64xi32>
    %c0_i32_9 = arith.constant 0 : i32
    %16 = vector.broadcast %c0_i32_9 : i32 to vector<32x64xi32>
    %17 = arith.cmpi ne, %15, %16 : vector<32x64xi32>
    %c0_i32_10 = arith.constant 0 : i32
    %18 = vector.broadcast %c0_i32_10 : i32 to vector<32x64xi32>
    %19 = arith.cmpi slt, %15, %18 : vector<32x64xi32>
    %c0_i32_11 = arith.constant 0 : i32
    %20 = arith.cmpi slt, %13, %c0_i32_11 : i32
    %21 = vector.broadcast %20 : i1 to vector<32x64xi1>
    %22 = vector.broadcast %21 : vector<32x64xi1> to vector<32x64xi1>
    %23 = arith.xori %19, %22 : vector<32x64xi1>
    %24 = arith.andi %23, %17 : vector<32x64xi1>
    %25 = vector.broadcast %13 : i32 to vector<32x64xi32>
    %26 = arith.addi %15, %25 : vector<32x64xi32>
    %27 = arith.select %24, %26, %15 : vector<32x64xi1>, vector<32x64xi32>
    %c1_i32_12 = arith.constant 1 : i32
    %28 = vector.broadcast %c1_i32_12 : i32 to vector<32x64xi32>
    %29 = arith.cmpi sge, %27, %28 : vector<32x64xi32>
    %c1_i32_13 = arith.constant 1 : i32
    %30 = tpu.dynamic_rotate %8 by %c1_i32_13 dim 0 : vector<32x64xf32>, i32 -> vector<32x64xf32>
    %cst_14 = arith.constant 0.000000e+00 : f32
    %31 = vector.broadcast %cst_14 : f32 to vector<32x64xf32>
    %32 = arith.select %29, %30, %31 : vector<32x64xi1>, vector<32x64xf32>
    %c15_i32 = arith.constant 15 : i32
    %33 = vector.broadcast %c15_i32 : i32 to vector<32x64xi32>
    %34 = arith.cmpi slt, %27, %33 : vector<32x64xi32>
    %c31_i32 = arith.constant 31 : i32
    %35 = tpu.dynamic_rotate %8 by %c31_i32 dim 0 : vector<32x64xf32>, i32 -> vector<32x64xf32>
    %cst_15 = arith.constant 0.000000e+00 : f32
    %36 = vector.broadcast %cst_15 : f32 to vector<32x64xf32>
    %37 = arith.select %34, %35, %36 : vector<32x64xi1>, vector<32x64xf32>
    %38 = tpu.concatenate %32, %8, %37 in 1 : vector<32x64xf32>, vector<32x64xf32>, vector<32x64xf32> -> vector<32x192xf32>
    %39 = arith.truncf %38 : vector<32x192xf32> to vector<32x192xbf16>
    %cst_16 = arith.constant dense<0.000000e+00> : vector<32x128xf32>
    %40 = tpu.matmul %39, %9, %cst_16 {dimension_numbers = #tpu.dot_dimension_numbers<[1], [0], [0], [1], [0, 0, 1, 1], [], []>} : vector<32x192xbf16>, vector<192x128xbf16>, vector<32x128xf32> -> vector<32x128xf32>
    %41 = vector.broadcast %10 : vector<1x128xf32> to vector<32x128xf32>
    %42 = arith.addf %40, %41 : vector<32x128xf32>
    %cst_17 = arith.constant 0.000000e+00 : f32
    %43 = vector.broadcast %cst_17 : f32 to vector<32x128xf32>
    %44 = arith.maximumf %42, %43 : vector<32x128xf32>
    %c0_18 = arith.constant 0 : index
    %c0_19 = arith.constant 0 : index
    %45 = vector.load %arg6[%c0_18, %c0_19] : memref<384x128xbf16, #tpu.memory_space<vmem>>, vector<384x128xbf16>
    %c0_20 = arith.constant 0 : index
    %c0_21 = arith.constant 0 : index
    %46 = vector.load %arg7[%c0_20, %c0_21] : memref<1x128xf32, #tpu.memory_space<vmem>>, vector<1x128xf32>
    %47 = tpu.iota {dimensions = array<i32: 0>} : vector<32x128xi32>
    %c16_i32_22 = arith.constant 16 : i32
    %c0_i32_23 = arith.constant 0 : i32
    %48 = arith.cmpi eq, %c16_i32_22, %c0_i32_23 : i32
    %c1_i32_24 = arith.constant 1 : i32
    %49 = arith.select %48, %c1_i32_24, %c16_i32_22 : i32
    %50 = vector.broadcast %49 : i32 to vector<32x128xi32>
    %51 = arith.remsi %47, %50 : vector<32x128xi32>
    %c0_i32_25 = arith.constant 0 : i32
    %52 = vector.broadcast %c0_i32_25 : i32 to vector<32x128xi32>
    %53 = arith.cmpi ne, %51, %52 : vector<32x128xi32>
    %c0_i32_26 = arith.constant 0 : i32
    %54 = vector.broadcast %c0_i32_26 : i32 to vector<32x128xi32>
    %55 = arith.cmpi slt, %51, %54 : vector<32x128xi32>
    %c0_i32_27 = arith.constant 0 : i32
    %56 = arith.cmpi slt, %49, %c0_i32_27 : i32
    %57 = vector.broadcast %56 : i1 to vector<32x128xi1>
    %58 = vector.broadcast %57 : vector<32x128xi1> to vector<32x128xi1>
    %59 = arith.xori %55, %58 : vector<32x128xi1>
    %60 = arith.andi %59, %53 : vector<32x128xi1>
    %61 = vector.broadcast %49 : i32 to vector<32x128xi32>
    %62 = arith.addi %51, %61 : vector<32x128xi32>
    %63 = arith.select %60, %62, %51 : vector<32x128xi1>, vector<32x128xi32>
    %c1_i32_28 = arith.constant 1 : i32
    %64 = vector.broadcast %c1_i32_28 : i32 to vector<32x128xi32>
    %65 = arith.cmpi sge, %63, %64 : vector<32x128xi32>
    %c1_i32_29 = arith.constant 1 : i32
    %66 = tpu.dynamic_rotate %44 by %c1_i32_29 dim 0 : vector<32x128xf32>, i32 -> vector<32x128xf32>
    %cst_30 = arith.constant 0.000000e+00 : f32
    %67 = vector.broadcast %cst_30 : f32 to vector<32x128xf32>
    %68 = arith.select %65, %66, %67 : vector<32x128xi1>, vector<32x128xf32>
    %c15_i32_31 = arith.constant 15 : i32
    %69 = vector.broadcast %c15_i32_31 : i32 to vector<32x128xi32>
    %70 = arith.cmpi slt, %63, %69 : vector<32x128xi32>
    %c31_i32_32 = arith.constant 31 : i32
    %71 = tpu.dynamic_rotate %44 by %c31_i32_32 dim 0 : vector<32x128xf32>, i32 -> vector<32x128xf32>
    %cst_33 = arith.constant 0.000000e+00 : f32
    %72 = vector.broadcast %cst_33 : f32 to vector<32x128xf32>
    %73 = arith.select %70, %71, %72 : vector<32x128xi1>, vector<32x128xf32>
    %74 = tpu.concatenate %68, %44, %73 in 1 : vector<32x128xf32>, vector<32x128xf32>, vector<32x128xf32> -> vector<32x384xf32>
    %75 = arith.truncf %74 : vector<32x384xf32> to vector<32x384xbf16>
    %cst_34 = arith.constant dense<0.000000e+00> : vector<32x128xf32>
    %76 = tpu.matmul %75, %45, %cst_34 {dimension_numbers = #tpu.dot_dimension_numbers<[1], [0], [0], [1], [0, 0, 1, 1], [], []>} : vector<32x384xbf16>, vector<384x128xbf16>, vector<32x128xf32> -> vector<32x128xf32>
    %77 = vector.broadcast %46 : vector<1x128xf32> to vector<32x128xf32>
    %78 = arith.addf %76, %77 : vector<32x128xf32>
    %79 = vector.shape_cast %78 : vector<32x128xf32> to vector<2x16x128xf32>
    %cst_35 = arith.constant dense<0.000000e+00> : vector<2x128xf32>
    %80 = vector.multi_reduction <add>, %79, %cst_35 [1] : vector<2x16x128xf32> to vector<2x128xf32>
    %cst_36 = arith.constant 1.600000e+01 : f32
    %81 = vector.broadcast %cst_36 : f32 to vector<2x128xf32>
    %82 = arith.divf %80, %81 : vector<2x128xf32>
    %c0_37 = arith.constant 0 : index
    %c0_38 = arith.constant 0 : index
    %83 = vector.load %arg8[%c0_37, %c0_38] : memref<128x8xbf16, #tpu.memory_space<vmem>>, vector<128x8xbf16>
    %84 = arith.truncf %82 : vector<2x128xf32> to vector<2x128xbf16>
    %cst_39 = arith.constant dense<0.000000e+00> : vector<2x8xf32>
    %85 = tpu.matmul %84, %83, %cst_39 {dimension_numbers = #tpu.dot_dimension_numbers<[1], [0], [0], [1], [0, 0, 1, 1], [], []>} : vector<2x128xbf16>, vector<128x8xbf16>, vector<2x8xf32> -> vector<2x8xf32>
    %cst_40 = arith.constant 0.000000e+00 : f32
    %86 = vector.broadcast %cst_40 : f32 to vector<2x8xf32>
    %87 = arith.maximumf %85, %86 : vector<2x8xf32>
    %c0_41 = arith.constant 0 : index
    %c0_42 = arith.constant 0 : index
    %88 = vector.load %arg9[%c0_41, %c0_42] : memref<8x128xbf16, #tpu.memory_space<vmem>>, vector<8x128xbf16>
    %89 = arith.truncf %87 : vector<2x8xf32> to vector<2x8xbf16>
    %cst_43 = arith.constant dense<0.000000e+00> : vector<2x128xf32>
    %90 = tpu.matmul %89, %88, %cst_43 {dimension_numbers = #tpu.dot_dimension_numbers<[1], [0], [0], [1], [0, 0, 1, 1], [], []>} : vector<2x8xbf16>, vector<8x128xbf16>, vector<2x128xf32> -> vector<2x128xf32>
    %91 = arith.negf %90 : vector<2x128xf32>
    %92 = math.exp %91 : vector<2x128xf32>
    %cst_44 = arith.constant 1.000000e+00 : f32
    %93 = vector.broadcast %cst_44 : f32 to vector<2x128xf32>
    %94 = arith.addf %93, %92 : vector<2x128xf32>
    %95 = arith.divf %93, %94 : vector<2x128xf32>
    %c0_45 = arith.constant 0 : index
    %c0_46 = arith.constant 0 : index
    %96 = vector.load %arg10[%c0_45, %c0_46] : memref<128x8xbf16, #tpu.memory_space<vmem>>, vector<128x8xbf16>
    %97 = arith.truncf %82 : vector<2x128xf32> to vector<2x128xbf16>
    %cst_47 = arith.constant dense<0.000000e+00> : vector<2x8xf32>
    %98 = tpu.matmul %97, %96, %cst_47 {dimension_numbers = #tpu.dot_dimension_numbers<[1], [0], [0], [1], [0, 0, 1, 1], [], []>} : vector<2x128xbf16>, vector<128x8xbf16>, vector<2x8xf32> -> vector<2x8xf32>
    %cst_48 = arith.constant 0.000000e+00 : f32
    %99 = vector.broadcast %cst_48 : f32 to vector<2x8xf32>
    %100 = arith.maximumf %98, %99 : vector<2x8xf32>
    %c0_49 = arith.constant 0 : index
    %c0_50 = arith.constant 0 : index
    %101 = vector.load %arg11[%c0_49, %c0_50] : memref<8x64xbf16, #tpu.memory_space<vmem>>, vector<8x64xbf16>
    %102 = arith.truncf %100 : vector<2x8xf32> to vector<2x8xbf16>
    %cst_51 = arith.constant dense<0.000000e+00> : vector<2x64xf32>
    %103 = tpu.matmul %102, %101, %cst_51 {dimension_numbers = #tpu.dot_dimension_numbers<[1], [0], [0], [1], [0, 0, 1, 1], [], []>} : vector<2x8xbf16>, vector<8x64xbf16>, vector<2x64xf32> -> vector<2x64xf32>
    %cst_52 = arith.constant 0.000000e+00 : f32
    %104 = vector.broadcast %cst_52 : f32 to vector<2x64xf32>
    %105 = arith.maximumf %103, %104 : vector<2x64xf32>
    %c0_53 = arith.constant 0 : index
    %c0_54 = arith.constant 0 : index
    %106 = vector.load %arg12[%c0_53, %c0_54] : memref<64x128xbf16, #tpu.memory_space<vmem>>, vector<64x128xbf16>
    %107 = arith.truncf %105 : vector<2x64xf32> to vector<2x64xbf16>
    %cst_55 = arith.constant dense<0.000000e+00> : vector<2x128xf32>
    %108 = tpu.matmul %107, %106, %cst_55 {dimension_numbers = #tpu.dot_dimension_numbers<[1], [0], [0], [1], [0, 0, 1, 1], [], []>} : vector<2x64xbf16>, vector<64x128xbf16>, vector<2x128xf32> -> vector<2x128xf32>
    %109 = arith.negf %108 : vector<2x128xf32>
    %110 = math.exp %109 : vector<2x128xf32>
    %cst_56 = arith.constant 1.000000e+00 : f32
    %111 = vector.broadcast %cst_56 : f32 to vector<2x128xf32>
    %112 = arith.addf %111, %110 : vector<2x128xf32>
    %113 = arith.divf %111, %112 : vector<2x128xf32>
    %114 = arith.addf %95, %113 : vector<2x128xf32>
    %c0_57 = arith.constant 0 : index
    %c0_58 = arith.constant 0 : index
    %115 = vector.load %arg13[%c0_57, %c0_58] : memref<64x128xbf16, #tpu.memory_space<vmem>>, vector<64x128xbf16>
    %116 = arith.truncf %0 : vector<32x64xf32> to vector<32x64xbf16>
    %cst_59 = arith.constant dense<0.000000e+00> : vector<32x128xf32>
    %117 = tpu.matmul %116, %115, %cst_59 {dimension_numbers = #tpu.dot_dimension_numbers<[1], [0], [0], [1], [0, 0, 1, 1], [], []>} : vector<32x64xbf16>, vector<64x128xbf16>, vector<32x128xf32> -> vector<32x128xf32>
    %c0_60 = arith.constant 0 : index
    %c0_61 = arith.constant 0 : index
    %118 = vector.load %arg14[%c0_60, %c0_61] : memref<1x128xf32, #tpu.memory_space<vmem>>, vector<1x128xf32>
    %119 = vector.broadcast %118 : vector<1x128xf32> to vector<32x128xf32>
    %120 = arith.addf %117, %119 : vector<32x128xf32>
    %121 = vector.shape_cast %114 : vector<2x128xf32> to vector<2x1x128xf32>
    %122 = vector.broadcast %121 : vector<2x1x128xf32> to vector<2x16x128xf32>
    %123 = arith.mulf %79, %122 : vector<2x16x128xf32>
    %124 = vector.shape_cast %120 : vector<32x128xf32> to vector<2x16x128xf32>
    %125 = arith.addf %123, %124 : vector<2x16x128xf32>
    %126 = vector.shape_cast %125 : vector<2x16x128xf32> to vector<32x128xf32>
    %c0_62 = arith.constant 0 : index
    %c0_63 = arith.constant 0 : index
    %127 = vector.load %arg15[%c0_62, %c0_63] : memref<32x128xf32, #tpu.memory_space<vmem>>, vector<32x128xf32>
    tpu.vector_store %arg15[%c0_62, %c0_63], %126 {strides = array<i32>} : memref<32x128xf32, #tpu.memory_space<vmem>>, vector<32x128xf32>,
    return
  }
  func.func @transform_0(%arg0: i32) -> (i32, i32) {
    %c0_i32 = arith.constant 0 : i32
    %c0_i32_0 = arith.constant 0 : i32
    %c0_i32_1 = arith.constant 0 : i32
    return %c0_i32, %c0_i32_0 : i32, i32
  }
  func.func @transform_1(%arg0: i32) -> (i32, i32) {
    %c0_i32 = arith.constant 0 : i32
    %c0_i32_0 = arith.constant 0 : i32
    %c0_i32_1 = arith.constant 0 : i32
    return %c0_i32, %c0_i32_0 : i32, i32
  }
  func.func @transform_2(%arg0: i32) -> (i32, i32) {
    %c0_i32 = arith.constant 0 : i32
    %c0_i32_0 = arith.constant 0 : i32
    %c0_i32_1 = arith.constant 0 : i32
    return %c0_i32, %c0_i32_0 : i32, i32
  }
  func.func @transform_3(%arg0: i32) -> (i32, i32) {
    %c0_i32 = arith.constant 0 : i32
    %c0_i32_0 = arith.constant 0 : i32
    %c0_i32_1 = arith.constant 0 : i32
    return %c0_i32, %c0_i32_0 : i32, i32
  }
  func.func @transform_4(%arg0: i32) -> (i32, i32) {
    %c0_i32 = arith.constant 0 : i32
    %c0_i32_0 = arith.constant 0 : i32
    %c0_i32_1 = arith.constant 0 : i32
    return %c0_i32, %c0_i32_0 : i32, i32
  }
  func.func @transform_5(%arg0: i32) -> (i32, i32) {
    %c0_i32 = arith.constant 0 : i32
    %c0_i32_0 = arith.constant 0 : i32
    %c0_i32_1 = arith.constant 0 : i32
    return %c0_i32, %c0_i32_0 : i32, i32
  }
  func.func @transform_6(%arg0: i32) -> (i32, i32) {
    %c0_i32 = arith.constant 0 : i32
    %c0_i32_0 = arith.constant 0 : i32
    %c0_i32_1 = arith.constant 0 : i32
    return %c0_i32, %c0_i32_0 : i32, i32
  }
  func.func @transform_7(%arg0: i32) -> (i32, i32) {
    %c0_i32 = arith.constant 0 : i32
    %c0_i32_0 = arith.constant 0 : i32
    %c0_i32_1 = arith.constant 0 : i32
    return %c0_i32, %c0_i32_0 : i32, i32
  }
  func.func @transform_8(%arg0: i32) -> (i32, i32) {
    %c0_i32 = arith.constant 0 : i32
    %c0_i32_0 = arith.constant 0 : i32
    %c0_i32_1 = arith.constant 0 : i32
    return %c0_i32, %c0_i32_0 : i32, i32
  }
  func.func @transform_9(%arg0: i32) -> (i32, i32) {
    %c0_i32 = arith.constant 0 : i32
    %c0_i32_0 = arith.constant 0 : i32
    %c0_i32_1 = arith.constant 0 : i32
    return %c0_i32, %c0_i32_0 : i32, i32
  }
  func.func @transform_10(%arg0: i32) -> (i32, i32) {
    %c0_i32 = arith.constant 0 : i32
    %c0_i32_0 = arith.constant 0 : i32
    %c0_i32_1 = arith.constant 0 : i32
    return %c0_i32, %c0_i32_0 : i32, i32
  }
  func.func @transform_11(%arg0: i32) -> (i32, i32) {
    %c0_i32 = arith.constant 0 : i32
    %c0_i32_0 = arith.constant 0 : i32
    %c0_i32_1 = arith.constant 0 : i32
    return %c0_i32, %c0_i32_0 : i32, i32
  }
  func.func @transform_12(%arg0: i32) -> (i32, i32) {
    %c0_i32 = arith.constant 0 : i32
    %c0_i32_0 = arith.constant 0 : i32
    %c0_i32_1 = arith.constant 0 : i32
    return %c0_i32, %c0_i32_0 : i32, i32
  }
  func.func @transform_13(%arg0: i32) -> (i32, i32) {
    %c0_i32 = arith.constant 0 : i32
    %c0_i32_0 = arith.constant 0 : i32
    %c0_i32_1 = arith.constant 0 : i32
    return %c0_i32, %c0_i32_0 : i32, i32
  }
  func.func @transform_14(%arg0: i32) -> (i32, i32) {
    %c0_i32 = arith.constant 0 : i32
    %c0_i32_0 = arith.constant 0 : i32
    %c0_i32_1 = arith.constant 0 : i32
    return %c0_i32, %c0_i32_0 : i32, i32
  }
}

module attributes {stable_mosaic.version = 11 : i64} {
  func.func @block_kernel(%arg0: i32, %arg1: memref<32x128xf32, #tpu.memory_space<vmem>>, %arg2: memref<1x128xf32, #tpu.memory_space<vmem>>, %arg3: memref<1x128xf32, #tpu.memory_space<vmem>>, %arg4: memref<384x256xbf16, #tpu.memory_space<vmem>>, %arg5: memref<1x256xf32, #tpu.memory_space<vmem>>, %arg6: memref<768x256xbf16, #tpu.memory_space<vmem>>, %arg7: memref<1x256xf32, #tpu.memory_space<vmem>>, %arg8: memref<256x16xbf16, #tpu.memory_space<vmem>>, %arg9: memref<16x256xbf16, #tpu.memory_space<vmem>>, %arg10: memref<256x16xbf16, #tpu.memory_space<vmem>>, %arg11: memref<16x128xbf16, #tpu.memory_space<vmem>>, %arg12: memref<128x256xbf16, #tpu.memory_space<vmem>>, %arg13: memref<128x256xbf16, #tpu.memory_space<vmem>>, %arg14: memref<1x256xf32, #tpu.memory_space<vmem>>, %arg15: memref<2x256xf32, #tpu.memory_space<vmem>>) attributes {dimension_semantics = [#tpu.dimension_semantics<parallel>], iteration_bounds = array<i64: 1>, scalar_prefetch = 0 : i64, scratch_operands = 0 : i64, tpu.core_type = #tpu.core_type<tc>, window_params = [{pipeline_mode = #tpu.pipeline_mode<synchronous>, transform_indices = @transform_0, window_bounds = array<i64: 32, 128>}, {pipeline_mode = #tpu.pipeline_mode<synchronous>, transform_indices = @transform_1, window_bounds = array<i64: 1, 128>}, {pipeline_mode = #tpu.pipeline_mode<synchronous>, transform_indices = @transform_2, window_bounds = array<i64: 1, 128>}, {pipeline_mode = #tpu.pipeline_mode<synchronous>, transform_indices = @transform_3, window_bounds = array<i64: 384, 256>}, {pipeline_mode = #tpu.pipeline_mode<synchronous>, transform_indices = @transform_4, window_bounds = array<i64: 1, 256>}, {pipeline_mode = #tpu.pipeline_mode<synchronous>, transform_indices = @transform_5, window_bounds = array<i64: 768, 256>}, {pipeline_mode = #tpu.pipeline_mode<synchronous>, transform_indices = @transform_6, window_bounds = array<i64: 1, 256>}, {pipeline_mode = #tpu.pipeline_mode<synchronous>, transform_indices = @transform_7, window_bounds = array<i64: 256, 16>}, {pipeline_mode = #tpu.pipeline_mode<synchronous>, transform_indices = @transform_8, window_bounds = array<i64: 16, 256>}, {pipeline_mode = #tpu.pipeline_mode<synchronous>, transform_indices = @transform_9, window_bounds = array<i64: 256, 16>}, {pipeline_mode = #tpu.pipeline_mode<synchronous>, transform_indices = @transform_10, window_bounds = array<i64: 16, 128>}, {pipeline_mode = #tpu.pipeline_mode<synchronous>, transform_indices = @transform_11, window_bounds = array<i64: 128, 256>}, {pipeline_mode = #tpu.pipeline_mode<synchronous>, transform_indices = @transform_12, window_bounds = array<i64: 128, 256>}, {pipeline_mode = #tpu.pipeline_mode<synchronous>, transform_indices = @transform_13, window_bounds = array<i64: 1, 256>}, {pipeline_mode = #tpu.pipeline_mode<synchronous>, transform_indices = @transform_14, window_bounds = array<i64: 2, 256>}]} {
    %c0 = arith.constant 0 : index
    %c0_0 = arith.constant 0 : index
    %0 = vector.load %arg1[%c0, %c0_0] : memref<32x128xf32, #tpu.memory_space<vmem>>, vector<32x128xf32>
    %c0_1 = arith.constant 0 : index
    %c0_2 = arith.constant 0 : index
    %1 = vector.load %arg2[%c0_1, %c0_2] : memref<1x128xf32, #tpu.memory_space<vmem>>, vector<1x128xf32>
    %2 = vector.broadcast %1 : vector<1x128xf32> to vector<32x128xf32>
    %3 = arith.mulf %0, %2 : vector<32x128xf32>
    %c0_3 = arith.constant 0 : index
    %c0_4 = arith.constant 0 : index
    %4 = vector.load %arg3[%c0_3, %c0_4] : memref<1x128xf32, #tpu.memory_space<vmem>>, vector<1x128xf32>
    %5 = vector.broadcast %4 : vector<1x128xf32> to vector<32x128xf32>
    %6 = arith.addf %3, %5 : vector<32x128xf32>
    %cst = arith.constant 0.000000e+00 : f32
    %7 = vector.broadcast %cst : f32 to vector<32x128xf32>
    %8 = arith.maximumf %6, %7 : vector<32x128xf32>
    %c0_5 = arith.constant 0 : index
    %c0_6 = arith.constant 0 : index
    %9 = vector.load %arg4[%c0_5, %c0_6] : memref<384x256xbf16, #tpu.memory_space<vmem>>, vector<384x256xbf16>
    %c0_7 = arith.constant 0 : index
    %c0_8 = arith.constant 0 : index
    %10 = vector.load %arg5[%c0_7, %c0_8] : memref<1x256xf32, #tpu.memory_space<vmem>>, vector<1x256xf32>
    %11 = tpu.iota {dimensions = array<i32: 0>} : vector<32x128xi32>
    %c16_i32 = arith.constant 16 : i32
    %c0_i32 = arith.constant 0 : i32
    %12 = arith.cmpi eq, %c16_i32, %c0_i32 : i32
    %c1_i32 = arith.constant 1 : i32
    %13 = arith.select %12, %c1_i32, %c16_i32 : i32
    %14 = vector.broadcast %13 : i32 to vector<32x128xi32>
    %15 = arith.remsi %11, %14 : vector<32x128xi32>
    %c0_i32_9 = arith.constant 0 : i32
    %16 = vector.broadcast %c0_i32_9 : i32 to vector<32x128xi32>
    %17 = arith.cmpi ne, %15, %16 : vector<32x128xi32>
    %c0_i32_10 = arith.constant 0 : i32
    %18 = vector.broadcast %c0_i32_10 : i32 to vector<32x128xi32>
    %19 = arith.cmpi slt, %15, %18 : vector<32x128xi32>
    %c0_i32_11 = arith.constant 0 : i32
    %20 = arith.cmpi slt, %13, %c0_i32_11 : i32
    %21 = vector.broadcast %20 : i1 to vector<32x128xi1>
    %22 = vector.broadcast %21 : vector<32x128xi1> to vector<32x128xi1>
    %23 = arith.xori %19, %22 : vector<32x128xi1>
    %24 = arith.andi %23, %17 : vector<32x128xi1>
    %25 = vector.broadcast %13 : i32 to vector<32x128xi32>
    %26 = arith.addi %15, %25 : vector<32x128xi32>
    %27 = arith.select %24, %26, %15 : vector<32x128xi1>, vector<32x128xi32>
    %c1_i32_12 = arith.constant 1 : i32
    %28 = vector.broadcast %c1_i32_12 : i32 to vector<32x128xi32>
    %29 = arith.cmpi sge, %27, %28 : vector<32x128xi32>
    %c1_i32_13 = arith.constant 1 : i32
    %30 = tpu.dynamic_rotate %8 by %c1_i32_13 dim 0 : vector<32x128xf32>, i32 -> vector<32x128xf32>
    %cst_14 = arith.constant 0.000000e+00 : f32
    %31 = vector.broadcast %cst_14 : f32 to vector<32x128xf32>
    %32 = arith.select %29, %30, %31 : vector<32x128xi1>, vector<32x128xf32>
    %c15_i32 = arith.constant 15 : i32
    %33 = vector.broadcast %c15_i32 : i32 to vector<32x128xi32>
    %34 = arith.cmpi slt, %27, %33 : vector<32x128xi32>
    %c31_i32 = arith.constant 31 : i32
    %35 = tpu.dynamic_rotate %8 by %c31_i32 dim 0 : vector<32x128xf32>, i32 -> vector<32x128xf32>
    %cst_15 = arith.constant 0.000000e+00 : f32
    %36 = vector.broadcast %cst_15 : f32 to vector<32x128xf32>
    %37 = arith.select %34, %35, %36 : vector<32x128xi1>, vector<32x128xf32>
    %38 = tpu.concatenate %32, %8, %37 in 1 : vector<32x128xf32>, vector<32x128xf32>, vector<32x128xf32> -> vector<32x384xf32>
    %39 = arith.truncf %38 : vector<32x384xf32> to vector<32x384xbf16>
    %cst_16 = arith.constant dense<0.000000e+00> : vector<32x256xf32>
    %40 = tpu.matmul %39, %9, %cst_16 {dimension_numbers = #tpu.dot_dimension_numbers<[1], [0], [0], [1], [0, 0, 1, 1], [], []>} : vector<32x384xbf16>, vector<384x256xbf16>, vector<32x256xf32> -> vector<32x256xf32>
    %41 = vector.broadcast %10 : vector<1x256xf32> to vector<32x256xf32>
    %42 = arith.addf %40, %41 : vector<32x256xf32>
    %cst_17 = arith.constant 0.000000e+00 : f32
    %43 = vector.broadcast %cst_17 : f32 to vector<32x256xf32>
    %44 = arith.maximumf %42, %43 : vector<32x256xf32>
    %c0_18 = arith.constant 0 : index
    %c0_19 = arith.constant 0 : index
    %45 = vector.load %arg6[%c0_18, %c0_19] : memref<768x256xbf16, #tpu.memory_space<vmem>>, vector<768x256xbf16>
    %c0_20 = arith.constant 0 : index
    %c0_21 = arith.constant 0 : index
    %46 = vector.load %arg7[%c0_20, %c0_21] : memref<1x256xf32, #tpu.memory_space<vmem>>, vector<1x256xf32>
    %47 = tpu.iota {dimensions = array<i32: 0>} : vector<32x256xi32>
    %c16_i32_22 = arith.constant 16 : i32
    %c0_i32_23 = arith.constant 0 : i32
    %48 = arith.cmpi eq, %c16_i32_22, %c0_i32_23 : i32
    %c1_i32_24 = arith.constant 1 : i32
    %49 = arith.select %48, %c1_i32_24, %c16_i32_22 : i32
    %50 = vector.broadcast %49 : i32 to vector<32x256xi32>
    %51 = arith.remsi %47, %50 : vector<32x256xi32>
    %c0_i32_25 = arith.constant 0 : i32
    %52 = vector.broadcast %c0_i32_25 : i32 to vector<32x256xi32>
    %53 = arith.cmpi ne, %51, %52 : vector<32x256xi32>
    %c0_i32_26 = arith.constant 0 : i32
    %54 = vector.broadcast %c0_i32_26 : i32 to vector<32x256xi32>
    %55 = arith.cmpi slt, %51, %54 : vector<32x256xi32>
    %c0_i32_27 = arith.constant 0 : i32
    %56 = arith.cmpi slt, %49, %c0_i32_27 : i32
    %57 = vector.broadcast %56 : i1 to vector<32x256xi1>
    %58 = vector.broadcast %57 : vector<32x256xi1> to vector<32x256xi1>
    %59 = arith.xori %55, %58 : vector<32x256xi1>
    %60 = arith.andi %59, %53 : vector<32x256xi1>
    %61 = vector.broadcast %49 : i32 to vector<32x256xi32>
    %62 = arith.addi %51, %61 : vector<32x256xi32>
    %63 = arith.select %60, %62, %51 : vector<32x256xi1>, vector<32x256xi32>
    %c1_i32_28 = arith.constant 1 : i32
    %64 = vector.broadcast %c1_i32_28 : i32 to vector<32x256xi32>
    %65 = arith.cmpi sge, %63, %64 : vector<32x256xi32>
    %c1_i32_29 = arith.constant 1 : i32
    %66 = tpu.dynamic_rotate %44 by %c1_i32_29 dim 0 : vector<32x256xf32>, i32 -> vector<32x256xf32>
    %cst_30 = arith.constant 0.000000e+00 : f32
    %67 = vector.broadcast %cst_30 : f32 to vector<32x256xf32>
    %68 = arith.select %65, %66, %67 : vector<32x256xi1>, vector<32x256xf32>
    %c15_i32_31 = arith.constant 15 : i32
    %69 = vector.broadcast %c15_i32_31 : i32 to vector<32x256xi32>
    %70 = arith.cmpi slt, %63, %69 : vector<32x256xi32>
    %c31_i32_32 = arith.constant 31 : i32
    %71 = tpu.dynamic_rotate %44 by %c31_i32_32 dim 0 : vector<32x256xf32>, i32 -> vector<32x256xf32>
    %cst_33 = arith.constant 0.000000e+00 : f32
    %72 = vector.broadcast %cst_33 : f32 to vector<32x256xf32>
    %73 = arith.select %70, %71, %72 : vector<32x256xi1>, vector<32x256xf32>
    %74 = tpu.concatenate %68, %44, %73 in 1 : vector<32x256xf32>, vector<32x256xf32>, vector<32x256xf32> -> vector<32x768xf32>
    %75 = arith.truncf %74 : vector<32x768xf32> to vector<32x768xbf16>
    %cst_34 = arith.constant dense<0.000000e+00> : vector<32x256xf32>
    %76 = tpu.matmul %75, %45, %cst_34 {dimension_numbers = #tpu.dot_dimension_numbers<[1], [0], [0], [1], [0, 0, 1, 1], [], []>} : vector<32x768xbf16>, vector<768x256xbf16>, vector<32x256xf32> -> vector<32x256xf32>
    %77 = vector.broadcast %46 : vector<1x256xf32> to vector<32x256xf32>
    %78 = arith.addf %76, %77 : vector<32x256xf32>
    %79 = vector.shape_cast %78 : vector<32x256xf32> to vector<2x16x256xf32>
    %cst_35 = arith.constant dense<0.000000e+00> : vector<2x256xf32>
    %80 = vector.multi_reduction <add>, %79, %cst_35 [1] : vector<2x16x256xf32> to vector<2x256xf32>
    %cst_36 = arith.constant 1.600000e+01 : f32
    %81 = vector.broadcast %cst_36 : f32 to vector<2x256xf32>
    %82 = arith.divf %80, %81 : vector<2x256xf32>
    %c0_37 = arith.constant 0 : index
    %c0_38 = arith.constant 0 : index
    %83 = vector.load %arg8[%c0_37, %c0_38] : memref<256x16xbf16, #tpu.memory_space<vmem>>, vector<256x16xbf16>
    %84 = arith.truncf %82 : vector<2x256xf32> to vector<2x256xbf16>
    %cst_39 = arith.constant dense<0.000000e+00> : vector<2x16xf32>
    %85 = tpu.matmul %84, %83, %cst_39 {dimension_numbers = #tpu.dot_dimension_numbers<[1], [0], [0], [1], [0, 0, 1, 1], [], []>} : vector<2x256xbf16>, vector<256x16xbf16>, vector<2x16xf32> -> vector<2x16xf32>
    %cst_40 = arith.constant 0.000000e+00 : f32
    %86 = vector.broadcast %cst_40 : f32 to vector<2x16xf32>
    %87 = arith.maximumf %85, %86 : vector<2x16xf32>
    %c0_41 = arith.constant 0 : index
    %c0_42 = arith.constant 0 : index
    %88 = vector.load %arg9[%c0_41, %c0_42] : memref<16x256xbf16, #tpu.memory_space<vmem>>, vector<16x256xbf16>
    %89 = arith.truncf %87 : vector<2x16xf32> to vector<2x16xbf16>
    %cst_43 = arith.constant dense<0.000000e+00> : vector<2x256xf32>
    %90 = tpu.matmul %89, %88, %cst_43 {dimension_numbers = #tpu.dot_dimension_numbers<[1], [0], [0], [1], [0, 0, 1, 1], [], []>} : vector<2x16xbf16>, vector<16x256xbf16>, vector<2x256xf32> -> vector<2x256xf32>
    %91 = arith.negf %90 : vector<2x256xf32>
    %92 = math.exp %91 : vector<2x256xf32>
    %cst_44 = arith.constant 1.000000e+00 : f32
    %93 = vector.broadcast %cst_44 : f32 to vector<2x256xf32>
    %94 = arith.addf %93, %92 : vector<2x256xf32>
    %95 = arith.divf %93, %94 : vector<2x256xf32>
    %c0_45 = arith.constant 0 : index
    %c0_46 = arith.constant 0 : index
    %96 = vector.load %arg10[%c0_45, %c0_46] : memref<256x16xbf16, #tpu.memory_space<vmem>>, vector<256x16xbf16>
    %97 = arith.truncf %82 : vector<2x256xf32> to vector<2x256xbf16>
    %cst_47 = arith.constant dense<0.000000e+00> : vector<2x16xf32>
    %98 = tpu.matmul %97, %96, %cst_47 {dimension_numbers = #tpu.dot_dimension_numbers<[1], [0], [0], [1], [0, 0, 1, 1], [], []>} : vector<2x256xbf16>, vector<256x16xbf16>, vector<2x16xf32> -> vector<2x16xf32>
    %cst_48 = arith.constant 0.000000e+00 : f32
    %99 = vector.broadcast %cst_48 : f32 to vector<2x16xf32>
    %100 = arith.maximumf %98, %99 : vector<2x16xf32>
    %c0_49 = arith.constant 0 : index
    %c0_50 = arith.constant 0 : index
    %101 = vector.load %arg11[%c0_49, %c0_50] : memref<16x128xbf16, #tpu.memory_space<vmem>>, vector<16x128xbf16>
    %102 = arith.truncf %100 : vector<2x16xf32> to vector<2x16xbf16>
    %cst_51 = arith.constant dense<0.000000e+00> : vector<2x128xf32>
    %103 = tpu.matmul %102, %101, %cst_51 {dimension_numbers = #tpu.dot_dimension_numbers<[1], [0], [0], [1], [0, 0, 1, 1], [], []>} : vector<2x16xbf16>, vector<16x128xbf16>, vector<2x128xf32> -> vector<2x128xf32>
    %cst_52 = arith.constant 0.000000e+00 : f32
    %104 = vector.broadcast %cst_52 : f32 to vector<2x128xf32>
    %105 = arith.maximumf %103, %104 : vector<2x128xf32>
    %c0_53 = arith.constant 0 : index
    %c0_54 = arith.constant 0 : index
    %106 = vector.load %arg12[%c0_53, %c0_54] : memref<128x256xbf16, #tpu.memory_space<vmem>>, vector<128x256xbf16>
    %107 = arith.truncf %105 : vector<2x128xf32> to vector<2x128xbf16>
    %cst_55 = arith.constant dense<0.000000e+00> : vector<2x256xf32>
    %108 = tpu.matmul %107, %106, %cst_55 {dimension_numbers = #tpu.dot_dimension_numbers<[1], [0], [0], [1], [0, 0, 1, 1], [], []>} : vector<2x128xbf16>, vector<128x256xbf16>, vector<2x256xf32> -> vector<2x256xf32>
    %109 = arith.negf %108 : vector<2x256xf32>
    %110 = math.exp %109 : vector<2x256xf32>
    %cst_56 = arith.constant 1.000000e+00 : f32
    %111 = vector.broadcast %cst_56 : f32 to vector<2x256xf32>
    %112 = arith.addf %111, %110 : vector<2x256xf32>
    %113 = arith.divf %111, %112 : vector<2x256xf32>
    %114 = arith.addf %95, %113 : vector<2x256xf32>
    %c0_57 = arith.constant 0 : index
    %c0_58 = arith.constant 0 : index
    %115 = vector.load %arg13[%c0_57, %c0_58] : memref<128x256xbf16, #tpu.memory_space<vmem>>, vector<128x256xbf16>
    %116 = arith.truncf %0 : vector<32x128xf32> to vector<32x128xbf16>
    %cst_59 = arith.constant dense<0.000000e+00> : vector<32x256xf32>
    %117 = tpu.matmul %116, %115, %cst_59 {dimension_numbers = #tpu.dot_dimension_numbers<[1], [0], [0], [1], [0, 0, 1, 1], [], []>} : vector<32x128xbf16>, vector<128x256xbf16>, vector<32x256xf32> -> vector<32x256xf32>
    %c0_60 = arith.constant 0 : index
    %c0_61 = arith.constant 0 : index
    %118 = vector.load %arg14[%c0_60, %c0_61] : memref<1x256xf32, #tpu.memory_space<vmem>>, vector<1x256xf32>
    %119 = vector.broadcast %118 : vector<1x256xf32> to vector<32x256xf32>
    %120 = arith.addf %117, %119 : vector<32x256xf32>
    %121 = vector.shape_cast %114 : vector<2x256xf32> to vector<2x1x256xf32>
    %122 = vector.broadcast %121 : vector<2x1x256xf32> to vector<2x16x256xf32>
    %123 = arith.mulf %79, %122 : vector<2x16x256xf32>
    %124 = vector.shape_cast %120 : vector<32x256xf32> to vector<2x16x256xf32>
    %125 = arith.addf %123, %124 : vector<2x16x256xf32>
    %cst_62 = arith.constant dense<0.000000e+00> : vector<2x256xf32>
    %126 = vector.multi_reduction <add>, %125, %cst_62 [1] : vector<2x16x256xf32> to vector<2x256xf32>
    %cst_63 = arith.constant 1.600000e+01 : f32
    %127 = vector.broadcast %cst_63 : f32 to vector<2x256xf32>
    %128 = arith.divf %126, %127 : vector<2x256xf32>
    %c0_64 = arith.constant 0 : index
    %c0_65 = arith.constant 0 : index
    %129 = vector.load %arg15[%c0_64, %c0_65] : memref<2x256xf32, #tpu.memory_space<vmem>>, vector<2x256xf32>
    tpu.vector_store %arg15[%c0_64, %c0_65], %128 {strides = array<i32>} : memref<2x256xf32, #tpu.memory_space<vmem>>, vector<2x256xf32>,
    return
  }
  func.func @transform_0(%arg0: i32) -> (i32, i32) {
    %c0_i32 = arith.constant 0 : i32
    %c0_i32_0 = arith.constant 0 : i32
    %c0_i32_1 = arith.constant 0 : i32
    return %c0_i32, %c0_i32_0 : i32, i32
  }
  func.func @transform_1(%arg0: i32) -> (i32, i32) {
    %c0_i32 = arith.constant 0 : i32
    %c0_i32_0 = arith.constant 0 : i32
    %c0_i32_1 = arith.constant 0 : i32
    return %c0_i32, %c0_i32_0 : i32, i32
  }
  func.func @transform_2(%arg0: i32) -> (i32, i32) {
    %c0_i32 = arith.constant 0 : i32
    %c0_i32_0 = arith.constant 0 : i32
    %c0_i32_1 = arith.constant 0 : i32
    return %c0_i32, %c0_i32_0 : i32, i32
  }
  func.func @transform_3(%arg0: i32) -> (i32, i32) {
    %c0_i32 = arith.constant 0 : i32
    %c0_i32_0 = arith.constant 0 : i32
    %c0_i32_1 = arith.constant 0 : i32
    return %c0_i32, %c0_i32_0 : i32, i32
  }
  func.func @transform_4(%arg0: i32) -> (i32, i32) {
    %c0_i32 = arith.constant 0 : i32
    %c0_i32_0 = arith.constant 0 : i32
    %c0_i32_1 = arith.constant 0 : i32
    return %c0_i32, %c0_i32_0 : i32, i32
  }
  func.func @transform_5(%arg0: i32) -> (i32, i32) {
    %c0_i32 = arith.constant 0 : i32
    %c0_i32_0 = arith.constant 0 : i32
    %c0_i32_1 = arith.constant 0 : i32
    return %c0_i32, %c0_i32_0 : i32, i32
  }
  func.func @transform_6(%arg0: i32) -> (i32, i32) {
    %c0_i32 = arith.constant 0 : i32
    %c0_i32_0 = arith.constant 0 : i32
    %c0_i32_1 = arith.constant 0 : i32
    return %c0_i32, %c0_i32_0 : i32, i32
  }
  func.func @transform_7(%arg0: i32) -> (i32, i32) {
    %c0_i32 = arith.constant 0 : i32
    %c0_i32_0 = arith.constant 0 : i32
    %c0_i32_1 = arith.constant 0 : i32
    return %c0_i32, %c0_i32_0 : i32, i32
  }
  func.func @transform_8(%arg0: i32) -> (i32, i32) {
    %c0_i32 = arith.constant 0 : i32
    %c0_i32_0 = arith.constant 0 : i32
    %c0_i32_1 = arith.constant 0 : i32
    return %c0_i32, %c0_i32_0 : i32, i32
  }
  func.func @transform_9(%arg0: i32) -> (i32, i32) {
    %c0_i32 = arith.constant 0 : i32
    %c0_i32_0 = arith.constant 0 : i32
    %c0_i32_1 = arith.constant 0 : i32
    return %c0_i32, %c0_i32_0 : i32, i32
  }
  func.func @transform_10(%arg0: i32) -> (i32, i32) {
    %c0_i32 = arith.constant 0 : i32
    %c0_i32_0 = arith.constant 0 : i32
    %c0_i32_1 = arith.constant 0 : i32
    return %c0_i32, %c0_i32_0 : i32, i32
  }
  func.func @transform_11(%arg0: i32) -> (i32, i32) {
    %c0_i32 = arith.constant 0 : i32
    %c0_i32_0 = arith.constant 0 : i32
    %c0_i32_1 = arith.constant 0 : i32
    return %c0_i32, %c0_i32_0 : i32, i32
  }
  func.func @transform_12(%arg0: i32) -> (i32, i32) {
    %c0_i32 = arith.constant 0 : i32
    %c0_i32_0 = arith.constant 0 : i32
    %c0_i32_1 = arith.constant 0 : i32
    return %c0_i32, %c0_i32_0 : i32, i32
  }
  func.func @transform_13(%arg0: i32) -> (i32, i32) {
    %c0_i32 = arith.constant 0 : i32
    %c0_i32_0 = arith.constant 0 : i32
    %c0_i32_1 = arith.constant 0 : i32
    return %c0_i32, %c0_i32_0 : i32, i32
  }
  func.func @transform_14(%arg0: i32) -> (i32, i32) {
    %c0_i32 = arith.constant 0 : i32
    %c0_i32_0 = arith.constant 0 : i32
    %c0_i32_1 = arith.constant 0 : i32
    return %c0_i32, %c0_i32_0 : i32, i32
  }
}

module attributes {stable_mosaic.version = 11 : i64} {
  func.func @tail_kernel(%arg0: i32, %arg1: memref<2x256xf32, #tpu.memory_space<vmem>>, %arg2: memref<256x256xbf16, #tpu.memory_space<vmem>>, %arg3: memref<1x256xf32, #tpu.memory_space<vmem>>, %arg4: memref<256x192xbf16, #tpu.memory_space<vmem>>, %arg5: memref<1x192xf32, #tpu.memory_space<vmem>>, %arg6: memref<1x64xf32, #tpu.memory_space<vmem>>, %arg7: memref<64x5xbf16, #tpu.memory_space<vmem>>, %arg8: memref<1x5xf32, #tpu.memory_space<vmem>>, %arg9: memref<2x5xf32, #tpu.memory_space<vmem>>) attributes {dimension_semantics = [#tpu.dimension_semantics<parallel>], iteration_bounds = array<i64: 1>, scalar_prefetch = 0 : i64, scratch_operands = 0 : i64, tpu.core_type = #tpu.core_type<tc>, window_params = [{pipeline_mode = #tpu.pipeline_mode<synchronous>, transform_indices = @transform_0, window_bounds = array<i64: 2, 256>}, {pipeline_mode = #tpu.pipeline_mode<synchronous>, transform_indices = @transform_1, window_bounds = array<i64: 256, 256>}, {pipeline_mode = #tpu.pipeline_mode<synchronous>, transform_indices = @transform_2, window_bounds = array<i64: 1, 256>}, {pipeline_mode = #tpu.pipeline_mode<synchronous>, transform_indices = @transform_3, window_bounds = array<i64: 256, 192>}, {pipeline_mode = #tpu.pipeline_mode<synchronous>, transform_indices = @transform_4, window_bounds = array<i64: 1, 192>}, {pipeline_mode = #tpu.pipeline_mode<synchronous>, transform_indices = @transform_5, window_bounds = array<i64: 1, 64>}, {pipeline_mode = #tpu.pipeline_mode<synchronous>, transform_indices = @transform_6, window_bounds = array<i64: 64, 5>}, {pipeline_mode = #tpu.pipeline_mode<synchronous>, transform_indices = @transform_7, window_bounds = array<i64: 1, 5>}, {pipeline_mode = #tpu.pipeline_mode<synchronous>, transform_indices = @transform_8, window_bounds = array<i64: 2, 5>}]} {
    %c0 = arith.constant 0 : index
    %c0_0 = arith.constant 0 : index
    %0 = vector.load %arg1[%c0, %c0_0] : memref<2x256xf32, #tpu.memory_space<vmem>>, vector<2x256xf32>
    %c0_1 = arith.constant 0 : index
    %c0_2 = arith.constant 0 : index
    %1 = vector.load %arg2[%c0_1, %c0_2] : memref<256x256xbf16, #tpu.memory_space<vmem>>, vector<256x256xbf16>
    %2 = arith.truncf %0 : vector<2x256xf32> to vector<2x256xbf16>
    %cst = arith.constant dense<0.000000e+00> : vector<2x256xf32>
    %3 = tpu.matmul %2, %1, %cst {dimension_numbers = #tpu.dot_dimension_numbers<[1], [0], [0], [1], [0, 0, 1, 1], [], []>} : vector<2x256xbf16>, vector<256x256xbf16>, vector<2x256xf32> -> vector<2x256xf32>
    %c0_3 = arith.constant 0 : index
    %c0_4 = arith.constant 0 : index
    %4 = vector.load %arg3[%c0_3, %c0_4] : memref<1x256xf32, #tpu.memory_space<vmem>>, vector<1x256xf32>
    %5 = vector.broadcast %4 : vector<1x256xf32> to vector<2x256xf32>
    %6 = arith.addf %3, %5 : vector<2x256xf32>
    %c0_5 = arith.constant 0 : index
    %c0_6 = arith.constant 0 : index
    %7 = vector.load %arg4[%c0_5, %c0_6] : memref<256x192xbf16, #tpu.memory_space<vmem>>, vector<256x192xbf16>
    %8 = arith.truncf %6 : vector<2x256xf32> to vector<2x256xbf16>
    %cst_7 = arith.constant dense<0.000000e+00> : vector<2x192xf32>
    %9 = tpu.matmul %8, %7, %cst_7 {dimension_numbers = #tpu.dot_dimension_numbers<[1], [0], [0], [1], [0, 0, 1, 1], [], []>} : vector<2x256xbf16>, vector<256x192xbf16>, vector<2x192xf32> -> vector<2x192xf32>
    %c0_8 = arith.constant 0 : index
    %c0_9 = arith.constant 0 : index
    %10 = vector.load %arg5[%c0_8, %c0_9] : memref<1x192xf32, #tpu.memory_space<vmem>>, vector<1x192xf32>
    %11 = vector.broadcast %10 : vector<1x192xf32> to vector<2x192xf32>
    %12 = arith.addf %9, %11 : vector<2x192xf32>
    %13 = vector.extract_strided_slice %12 {offsets = [0, 0], sizes = [2, 64], strides = [1, 1]} : vector<2x192xf32> to vector<2x64xf32>
    %14 = arith.negf %13 : vector<2x64xf32>
    %15 = math.exp %14 : vector<2x64xf32>
    %cst_10 = arith.constant 1.000000e+00 : f32
    %16 = vector.broadcast %cst_10 : f32 to vector<2x64xf32>
    %17 = arith.addf %16, %15 : vector<2x64xf32>
    %18 = arith.divf %16, %17 : vector<2x64xf32>
    %19 = vector.extract_strided_slice %12 {offsets = [0, 64], sizes = [2, 64], strides = [1, 1]} : vector<2x192xf32> to vector<2x64xf32>
    %20 = arith.negf %19 : vector<2x64xf32>
    %21 = math.exp %20 : vector<2x64xf32>
    %cst_11 = arith.constant 1.000000e+00 : f32
    %22 = vector.broadcast %cst_11 : f32 to vector<2x64xf32>
    %23 = arith.addf %22, %21 : vector<2x64xf32>
    %24 = arith.divf %22, %23 : vector<2x64xf32>
    %25 = vector.extract_strided_slice %12 {offsets = [0, 128], sizes = [2, 64], strides = [1, 1]} : vector<2x192xf32> to vector<2x64xf32>
    %c0_12 = arith.constant 0 : index
    %c0_13 = arith.constant 0 : index
    %26 = vector.load %arg6[%c0_12, %c0_13] : memref<1x64xf32, #tpu.memory_space<vmem>>, vector<1x64xf32>
    %27 = vector.broadcast %26 : vector<1x64xf32> to vector<2x64xf32>
    %28 = arith.mulf %18, %27 : vector<2x64xf32>
    %29 = arith.addf %25, %28 : vector<2x64xf32>
    %30 = math.tanh %29 : vector<2x64xf32>
    %cst_14 = arith.constant 1.000000e+00 : f32
    %31 = vector.broadcast %cst_14 : f32 to vector<2x64xf32>
    %32 = arith.subf %31, %24 : vector<2x64xf32>
    %33 = arith.mulf %32, %30 : vector<2x64xf32>
    %c0_15 = arith.constant 0 : index
    %c0_16 = arith.constant 0 : index
    %34 = vector.load %arg7[%c0_15, %c0_16] : memref<64x5xbf16, #tpu.memory_space<vmem>>, vector<64x5xbf16>
    %35 = arith.truncf %33 : vector<2x64xf32> to vector<2x64xbf16>
    %cst_17 = arith.constant dense<0.000000e+00> : vector<2x5xf32>
    %36 = tpu.matmul %35, %34, %cst_17 {dimension_numbers = #tpu.dot_dimension_numbers<[1], [0], [0], [1], [0, 0, 1, 1], [], []>} : vector<2x64xbf16>, vector<64x5xbf16>, vector<2x5xf32> -> vector<2x5xf32>
    %c0_18 = arith.constant 0 : index
    %c0_19 = arith.constant 0 : index
    %37 = vector.load %arg8[%c0_18, %c0_19] : memref<1x5xf32, #tpu.memory_space<vmem>>, vector<1x5xf32>
    %38 = vector.broadcast %37 : vector<1x5xf32> to vector<2x5xf32>
    %39 = arith.addf %36, %38 : vector<2x5xf32>
    %c0_20 = arith.constant 0 : index
    %c0_21 = arith.constant 0 : index
    %40 = vector.load %arg9[%c0_20, %c0_21] : memref<2x5xf32, #tpu.memory_space<vmem>>, vector<2x5xf32>
    tpu.vector_store %arg9[%c0_20, %c0_21], %39 {strides = array<i32>} : memref<2x5xf32, #tpu.memory_space<vmem>>, vector<2x5xf32>,
    return
  }
  func.func @transform_0(%arg0: i32) -> (i32, i32) {
    %c0_i32 = arith.constant 0 : i32
    %c0_i32_0 = arith.constant 0 : i32
    %c0_i32_1 = arith.constant 0 : i32
    return %c0_i32, %c0_i32_0 : i32, i32
  }
  func.func @transform_1(%arg0: i32) -> (i32, i32) {
    %c0_i32 = arith.constant 0 : i32
    %c0_i32_0 = arith.constant 0 : i32
    %c0_i32_1 = arith.constant 0 : i32
    return %c0_i32, %c0_i32_0 : i32, i32
  }
  func.func @transform_2(%arg0: i32) -> (i32, i32) {
    %c0_i32 = arith.constant 0 : i32
    %c0_i32_0 = arith.constant 0 : i32
    %c0_i32_1 = arith.constant 0 : i32
    return %c0_i32, %c0_i32_0 : i32, i32
  }
  func.func @transform_3(%arg0: i32) -> (i32, i32) {
    %c0_i32 = arith.constant 0 : i32
    %c0_i32_0 = arith.constant 0 : i32
    %c0_i32_1 = arith.constant 0 : i32
    return %c0_i32, %c0_i32_0 : i32, i32
  }
  func.func @transform_4(%arg0: i32) -> (i32, i32) {
    %c0_i32 = arith.constant 0 : i32
    %c0_i32_0 = arith.constant 0 : i32
    %c0_i32_1 = arith.constant 0 : i32
    return %c0_i32, %c0_i32_0 : i32, i32
  }
  func.func @transform_5(%arg0: i32) -> (i32, i32) {
    %c0_i32 = arith.constant 0 : i32
    %c0_i32_0 = arith.constant 0 : i32
    %c0_i32_1 = arith.constant 0 : i32
    return %c0_i32, %c0_i32_0 : i32, i32
  }
  func.func @transform_6(%arg0: i32) -> (i32, i32) {
    %c0_i32 = arith.constant 0 : i32
    %c0_i32_0 = arith.constant 0 : i32
    %c0_i32_1 = arith.constant 0 : i32
    return %c0_i32, %c0_i32_0 : i32, i32
  }
  func.func @transform_7(%arg0: i32) -> (i32, i32) {
    %c0_i32 = arith.constant 0 : i32
    %c0_i32_0 = arith.constant 0 : i32
    %c0_i32_1 = arith.constant 0 : i32
    return %c0_i32, %c0_i32_0 : i32, i32
  }
  func.func @transform_8(%arg0: i32) -> (i32, i32) {
    %c0_i32 = arith.constant 0 : i32
    %c0_i32_0 = arith.constant 0 : i32
    %c0_i32_1 = arith.constant 0 : i32
    return %c0_i32, %c0_i32_0 : i32, i32
  }
}

</mosaic_0001>

<bundles_post_ra>
// kernel: resnet_bigru_forward.5
= control target key start
LH: loop header
LB: loop body
LE: loop exit
PB: predicated region body
PF: predicated region fallthrough
CT: control target
= control target key end

     0   :  { %v22_v0 = vlaneseq  ;;  %s274_s20 = smov 4   ;;  %vm171_vm2 = vcmask 1045504   ;;  %vm141_vm7 = vcmask 31744   ;;  %vm146_vm8 = vcmask 64512   ;;  %s346_s0 = inlined_call_operand.vmem [shape: f32[32,4], index: 0, kind: input, shape index: {}]   ;;  %s347_s1 = inlined_call_operand.vmem [shape: bf16[12,64], index: 1, kind: input, shape index: {}]   ;;  %s348_s2 = inlined_call_operand.vmem [shape: f32[1,64], index: 2, kind: input, shape index: {}]   ;;  %s349_s3 = inlined_call_operand.vmem [shape: f32[32,64], index: 3, kind: output, shape index: {}]  }
   0x1   :  { %v15_v1 = vld [vmem:[%s346_s0] sm:$0xff]  ;;  %v16_v2 = vld [vmem:[%s346_s0 + $0x8] sm:$0xff]  ;;  %v17_v3 = vld [vmem:[%s346_s0 + $0x10] sm:$0xff]  ;;  %vm164_vm9 = vcmask 97280   ;;  %vm228_vm10 = vcmask 523264  }
   0x2   :  { %v80_v4 = vrot.slane %v16_v2, 7  ;;  %v97_v5 = vrot.slane %v16_v2, 1  ;;  %v253_v6 = vpack.i.bf16 %v16_v2, %v15_v1  ;;  %v18_v7 = vld [vmem:[%s346_s0 + $0x18] sm:$0xff]  ;;  %v79_v8 = vrot.slane %v15_v1, 7  ;;  %v273_v19 = vld [vmem:[%s347_s1] sm:$0x3f]  }
   0x3   :  { %v96_v9 = vrot.slane %v15_v1, 1  ;;  %v23_v10 = vshrl.u32 %v22_v0, 7  ;;  %v98_v11 = vrot.slane %v17_v3, 1  ;;  %v82_v12 = vrot.slane %v18_v7, 7  ;;  %250 = vmatprep.subr.msk.bf16.mxu0 %vm171_vm2, %v273_v19  ;;  %s275_s0 = smov 8  }
   0x4   :  { %254 = vrot.lane.b32.xlu0 %v253_v6, %s274_s20  ;;  %v99_v13 = vrot.slane %v18_v7, 1  ;;  %v258_v14 = vpack.i.bf16 %v18_v7, %v17_v3  ;;  %v81_v15 = vrot.slane %v17_v3, 7  ;;  %v173_v39 = vsel %vm171_vm2, %v273_v19, 0  ;;  %v237_v63 = vld [vmem:[%s348_s2] ss:$0 sm:$0xff] }
   0x5   :  { %v24_v16 = vadd.s32 8, %v23_v10  ;;  %vm100_vm0 = vcmp.lt.s32.totalorder %v23_v10, 7  ;;  %v26_v17 = vadd.s32 24, %v23_v10  ;;  %v25_v18 = vadd.s32 16, %v23_v10  ;;  %245 = vmatpush3.bf16.msra.mxu0 %v173_v39 }
   0x6   :  { %v102_v20 = vsel %vm100_vm0, %v97_v5, %v98_v11  ;;  %v103_v21 = vsel %vm100_vm0, %v96_v9, %v97_v5  ;;  %v101_v22 = vsel %vm100_vm0, %v98_v11, %v99_v13  ;;  %v104_v23 = vsel %vm100_vm0, %v99_v13, %v96_v9 }
   0x7   :  { %v38_v24 = vand.u32 15, %v24_v16  ;;  %v52_v25 = vand.u32 15, %v26_v17  ;;  %v45_v26 = vand.u32 15, %v25_v18  ;;  %vm83_vm1 = vcmp.lt.s32.totalorder %v23_v10, 1 }
   0x8   :  { %259 = vrot.lane.b32.xlu0 %v258_v14, %s274_s20  ;;  %v84_v27 = vsel %vm83_vm1, %v81_v15, %v82_v12  ;;  %v85_v28 = vsel %vm83_vm1, %v80_v4, %v81_v15  ;;  %v31_v29 = vand.u32 15, %v23_v10  ;;  %v86_v31 = vsel %vm83_vm1, %v79_v8, %v80_v4 }
   0x9   :  { %vm93_vm3 = vcmp.lt.s32.totalorder %v38_v24, 15  ;;  %vm95_vm4 = vcmp.lt.s32.totalorder %v52_v25, 15  ;;  %vm313_vm5 = vcmp.ge.s32.totalorder %v45_v26, 1  ;;  %v87_v37 = vsel %vm83_vm1, %v82_v12, %v79_v8 }
   0xa   :  { %v106_v32 = vsel %vm93_vm3, %v102_v20, 0.0  ;;  %v108_v33 = vsel %vm95_vm4, %v104_v23, 0.0  ;;  %v90_v34 = vsel %vm313_vm5, %v85_v28, 0.0  ;;  %vm320_vm6 = vcmp.ge.s32.totalorder %v31_v29, 1 }
   0xb   :  { %v263_v36 = vpack.i.bf16 %v106_v32, %v103_v21  ;;  %v88_v38 = vsel %vm320_vm6, %v87_v37, 0.0  ;;  %v268_v40 = vpack.i.bf16 %v108_v33, %v101_v22 }
   0xd   :  { %264 = vrot.lane.b32.xlu1 %v263_v36, %s275_s0 }
  0x11   :  { %269 = vrot.lane.b32.xlu1 %v268_v40, %s275_s0 }
  0x76   :  { %v255_v41 = vpop.permute.xlu0 %254 }
  0x77   :  { %v257_v42 = vunpack.i.h.bf16 %v255_v41  ;;  %v256_v43 = vunpack.i.l.bf16 %v255_v41 }
  0x79   :  { %v142_v48 = vsel %vm141_vm7, %v88_v38, %v256_v43  ;;  %v143_v49 = vsel %vm141_vm7, %v86_v31, %v257_v42 }
  0x7a   :  { %v260_v44 = vpop.permute.xlu0 %259 }
  0x7b   :  { %v262_v46 = vunpack.i.h.bf16 %v260_v44  ;;  %v261_v47 = vunpack.i.l.bf16 %v260_v44 }
  0x7d   :  { %v145_v54 = vsel %vm141_vm7, %v84_v27, %v262_v46  ;;  %v144_v55 = vsel %vm141_vm7, %v90_v34, %v261_v47 }
  0x7f   :  { %v265_v45 = vpop.permute.xlu1 %264 }
  0x80   :  { %v267_v50 = vunpack.i.h.bf16 %v265_v45  ;;  %v266_v51 = vunpack.i.l.bf16 %v265_v45 }
  0x82   :  { %v147_v52 = vsel %vm146_vm8, %v142_v48, %v266_v51  ;;  %v148_v53 = vsel %vm146_vm8, %v143_v49, %v267_v50 }
  0x83   :  { %v270_v56 = vpop.permute.xlu1 %269  ;;  %v151_v57 = vpack.c.bf16 %v148_v53, %v147_v52 }
  0x84   :  { %v272_v58 = vunpack.i.h.bf16 %v270_v56  ;;  %v271_v59 = vunpack.i.l.bf16 %v270_v56 }
  0x85   :  { %246 = vmatprep.mubr.msk.bf16.mxu0 %vm164_vm9, %v151_v57 }
  0x86   :  { %v150_v60 = vsel %vm146_vm8, %v145_v54, %v272_v58  ;;  %v149_v61 = vsel %vm146_vm8, %v144_v55, %v271_v59 }
  0x87   :  { %v152_v62 = vpack.c.bf16 %v150_v60, %v149_v61 }
  0x89   :  { %247 = vmatmul.mubr.msk.bf16.vlgmr.msra.gmra.mrb[0].mxu0 %vm164_vm9, %v152_v62 }
 0x15c   :  { %v248_v0 = vpop.f32.mrb[0].mxu0 }
 0x15d   :  { %v218_v1 = vadd.f32 %v248_v0, %v237_v63  ;;  %v209_v2 = vpop.f32.mrb[1].mxu0 }
 0x15e   :  { %v210_v3 = vadd.f32 %v237_v63, %v209_v2  ;;  %v249_v4 = vpop.f32.mrb[2].mxu0 }
 0x15f   :  { %v226_v5 = vmax.f32 %v218_v1, 0.0  ;;  %v221_v6 = vadd.f32 %v249_v4, %v237_v63  ;;  %v212_v7 = vpop.f32.mrb[3].mxu0 }
 0x160   :  { %v224_v8 = vmax.f32 %v210_v3, 0.0  ;;  %v213_v9 = vadd.f32 %v237_v63, %v212_v7 }
 0x161   :  { %231 = vst.msk [vmem:[%s349_s3 + $0x10] sm:$0xff] %vm228_vm10, %v226_v5  ;;  %v227_v10 = vmax.f32 %v221_v6, 0.0 }
 0x162   :  { %229 = vst.msk [vmem:[%s349_s3] sm:$0xff] %vm228_vm10, %v224_v8  ;;  %v225_v11 = vmax.f32 %v213_v9, 0.0 }
 0x163   :  { %232 = vst.msk [vmem:[%s349_s3 + $0x18] sm:$0xff] %vm228_vm10, %v227_v10 }
 0x164   :  { %230 = vst.msk [vmem:[%s349_s3 + $0x8] sm:$0xff] %vm228_vm10, %v225_v11 }

// kernel: resnet_bigru_forward.6
= control target key start
LH: loop header
LB: loop body
LE: loop exit
PB: predicated region body
PF: predicated region fallthrough
CT: control target
= control target key end

     0   :  { %17 = vsyncpa [#allocation3], 0  ;;  %s1620_s0 = inlined_call_operand.vmem [shape: f32[32,64], index: 0, kind: input, shape index: {}]   ;;  %s1621_s1 = inlined_call_operand.vmem [shape: f32[1,64], index: 1, kind: input, shape index: {}]   ;;  %s1622_s2 = inlined_call_operand.vmem [shape: f32[1,64], index: 2, kind: input, shape index: {}]   ;;  %s1623_s3 = inlined_call_operand.vmem [shape: bf16[192,64], index: 3, kind: input, shape index: {}]   ;;  %s1624_s4 = inlined_call_operand.vmem [shape: f32[1,64], index: 4, kind: input, shape index: {}]   ;;  %s1625_s5 = inlined_call_operand.vmem [shape: bf16[192,64], index: 5, kind: input, shape index: {}]   ;;  %s1626_s6 = inlined_call_operand.vmem [shape: f32[1,64], index: 6, kind: input, shape index: {}]   ;;  %s1627_s7 = inlined_call_operand.vmem [shape: bf16[64,4], index: 7, kind: input, shape index: {}]   ;;  %s1628_s8 = inlined_call_operand.hbm [shape: bf16[4,64], index: 8, kind: input, shape index: {}]   ;;  %s1629_s9 = inlined_call_operand.vmem [shape: bf16[64,4], index: 9, kind: input, shape index: {}]   ;;  %s1630_s10 = inlined_call_operand.hbm [shape: bf16[4,32], index: 10, kind: input, shape index: {}]   ;;  %s1631_s11 = inlined_call_operand.vmem [shape: bf16[32,64], index: 11, kind: input, shape index: {}]   ;;  %s1632_s12 = inlined_call_operand.vmem [shape: f32[32,64], index: 12, kind: output, shape index: {}]  }
   0x1   :  { %18 = vsyncpa [#allocation5], 0  ;;  %s1206_s21 = smov [#allocation2]   ;;  %s1207_s23 = smov [#allocation4]  }
   0x2   :  { %s41_s22 = sshll.u32 %s1206_s21, 4  ;;  %s53_s24 = sshll.u32 %s1207_s23, 4  ;;  %s42_s22 = int_to_ptr.vmem [resolvable:$true] %s41_s22  ;;  %s54_s24 = int_to_ptr.vmem [resolvable:$true] %s53_s24 }
   0x3   :  { %s1158_s27 = scalar_lea.hbm %s1628_s8, 32 }
   0x4   :  { %p1159_p0 = scmp.ne.s32.totalorder %s1628_s8, %s1158_s27  ;;  %p1162_p1 = scmp.lt.u32.totalorder %s1158_s27, %s1628_s8 }
   0x6   :  { %p1164_p2 = pnand %p1162_p1, %p1159_p0 }
   0x8   :  { %1167 = shalt.err (!%p1164_p2)
}
   0x9   :  { %s1168_s14 = scalar_lea.vmem %s42_s22, 32  ;;  %p1173_p4 = scmp.lt.s32.totalorder %s42_s22, %s42_s22 }
   0xa   :  { %p1169_p3 = scmp.ne.s32.totalorder %s42_s22, %s1168_s14  ;;  %p1174_p5 = scmp.lt.s32.totalorder %s1168_s14, %s1168_s14 }
   0xc   :  { %p1175_p6 = por %p1174_p5, %p1173_p4 }
   0xe   :  { %p1176_p7 = pnand %p1175_p6, %p1169_p3 }
  0x10   :  { %1179 = shalt.err (!%p1176_p7)
}
  0x11   :  { %44 = dma.hbm_to_vmem [thread:$0]  %s1628_s8, 32, %s42_s22, [#allocation3]  }
  0x12   :  { %s1180_s19 = scalar_lea.hbm %s1630_s10, 32 }
  0x13   :  { %p1181_p8 = scmp.ne.s32.totalorder %s1630_s10, %s1180_s19  ;;  %p1184_p9 = scmp.lt.u32.totalorder %s1180_s19, %s1630_s10 }
  0x15   :  { %p1186_p10 = pnand %p1184_p9, %p1181_p8 }
  0x17   :  { %1189 = shalt.err (!%p1186_p10)
}
  0x18   :  { %s1190_s26 = scalar_lea.vmem %s54_s24, 32  ;;  %p1195_p12 = scmp.lt.s32.totalorder %s54_s24, %s54_s24 }
  0x19   :  { %p1191_p11 = scmp.ne.s32.totalorder %s54_s24, %s1190_s26  ;;  %p1196_p13 = scmp.lt.s32.totalorder %s1190_s26, %s1190_s26 }
  0x1b   :  { %p1197_p0 = por %p1196_p13, %p1195_p12 }
  0x1d   :  { %p1198_p1 = pnand %p1197_p0, %p1191_p11 }
  0x1f   :  { %1201 = shalt.err (!%p1198_p1)
}
  0x20   :  { %56 = dma.hbm_to_vmem [thread:$0]  %s1630_s10, 32, %s54_s24, [#allocation5]  }
  0x21   :  { %1202 = dma.done.wait [#allocation3], 32  }
  0x22   :  { %1203 = vsyncadd [#allocation3], 4294967264 }
  0x23   :  { %1204 = dma.done.wait [#allocation5], 32  }
  0x24   :  { %1205 = vsyncadd [#allocation5], 4294967264  ;;  %v121_v0 = vlaneseq  ;;  %v1208_v1 = vmov 0   ;;  %v1309_v3 = vld [vmem:[%s1620_s0] sm:$0xff]  ;;  %v1314_v4 = vld [vmem:[%s1620_s0 + $0x8] sm:$0xff]  ;;  %s1209_s23 = smov 64  }
  0x25   :  { %317 = vmatprep.subr.bf16.mxu0 %v1208_v1  ;;  %527 = vmatprep.subr.bf16.mxu1 %v1208_v1  ;;  %v979_v5 = vld [vmem:[%s1621_s1] ss:$0 sm:$0xff]  ;;  %v1327_v9 = vld [vmem:[%s1620_s0 + $0x10] sm:$0xff]  ;;  %v1332_v10 = vld [vmem:[%s1620_s0 + $0x18] sm:$0xff]  ;;  %vm224_vm4 = vcmask 523264   ;;  %vm1211_vm7 = vmmov 0  }
  0x26   :  { %v1304_v2 = vshrl.u32 %v121_v0, 7  ;;  %v77_v6 = vmul.f32 %v979_v5, %v1309_v3  ;;  %v78_v7 = vmul.f32 %v979_v5, %v1314_v4  ;;  %v980_v8 = vld [vmem:[%s1622_s2] ss:$0 sm:$0xff]  ;;  %v79_v12 = vmul.f32 %v979_v5, %v1327_v9  ;;  %v1117_v20 = vld [vmem:[%s1623_s3 + $0x8] sm:$0xff]   ;;  %v1118_v30 = vld [vmem:[%s1623_s3 + $0x10] sm:$0xff]  }
  0x27   :  { %v80_v13 = vmul.f32 %v979_v5, %v1332_v10  ;;  %v1116_v14 = vld [vmem:[%s1623_s3] sm:$0xff]   ;;  %v1119_v40 = vld [vmem:[%s1623_s3 + $0x18] sm:$0xff]   ;;  %v1121_v54 = vld [vmem:[%s1623_s3 + $0x28] sm:$0xff]   ;;  %vm688_vm8 = vcmask 1041408   ;;  %vm611_vm9 = vcmask 1041409   ;;  %vm684_vm10 = vcmask 31744  }
  0x28   :  { %v123_v11 = vadd.s32 8, %v1304_v2  ;;  %v125_v15 = vadd.s32 24, %v1304_v2  ;;  %v88_v16 = vadd.f32 %v980_v8, %v77_v6  ;;  %v89_v17 = vadd.f32 %v980_v8, %v78_v7  ;;  %318 = vmatpush1.bf16.msra.mxu0 %v1116_v14  ;;  %v1120_v48 = vld [vmem:[%s1623_s3 + $0x20] sm:$0xff]   ;;  %v1122_v55 = vld [vmem:[%s1623_s3 + $0x30] sm:$0xff]   ;;  %v1123_v56 = vld [vmem:[%s1623_s3 + $0x38] sm:$0xff]  }
  0x29   :  { %vm199_vm0 = vcmp.lt.s32.totalorder %v1304_v2, 7  ;;  %v90_v18 = vadd.f32 %v980_v8, %v79_v12  ;;  %v91_v19 = vadd.f32 %v980_v8, %v80_v13  ;;  %vm182_vm1 = vcmp.lt.s32.totalorder %v1304_v2, 1  ;;  %319 = vmatprep.subr.bf16.mxu0 %v1208_v1  ;;  %v1124_v57 = vld [vmem:[%s1623_s3 + $0x40] sm:$0xff]   ;;  %v1125_v58 = vld [vmem:[%s1623_s3 + $0x48] sm:$0xff]   ;;  %v1126_v59 = vld [vmem:[%s1623_s3 + $0x50] sm:$0xff]  }
  0x2a   :  { %v92_v21 = vmax.f32 %v88_v16, 0.0  ;;  %v93_v22 = vmax.f32 %v89_v17, 0.0  ;;  %v137_v25 = vand.u32 15, %v123_v11  ;;  %v151_v26 = vand.u32 15, %v125_v15  ;;  %v1127_v60 = vld [vmem:[%s1623_s3 + $0x58] sm:$0xff]   ;;  %v1141_v11 = vld [vmem:[%s1627_s7 + $0x8] sm:$0xff]  }
  0x2b   :  { %v94_v23 = vmax.f32 %v90_v18, 0.0  ;;  %v95_v24 = vmax.f32 %v91_v19, 0.0  ;;  %v130_v61 = vand.u32 15, %v1304_v2  ;;  %v124_v62 = vadd.s32 16, %v1304_v2 }
  0x2c   :  { %v179_v27 = vrot.slane %v93_v22, 7  ;;  %v1096_v28 = vpack.i.bf16 %v93_v22, %v92_v21  ;;  %v178_v29 = vrot.slane %v92_v21, 7  ;;  %320 = vmatpush1.bf16.msra.mxu0 %v1117_v20  ;;  %v195_v31 = vrot.slane %v92_v21, 1 }
  0x2d   :  { %v1101_v32 = vpack.i.bf16 %v95_v24, %v94_v23  ;;  %321 = vmatprep.subr.bf16.mxu0 %v1208_v1  ;;  %v196_v33 = vrot.slane %v93_v22, 1  ;;  %vm1354_vm2 = vcmp.lt.s32.totalorder %v137_v25, 15  ;;  %v197_v36 = vrot.slane %v94_v23, 1  ;;  %v1128_v22 = vld [vmem:[%s1625_s5] sm:$0xff]   ;;  %v1131_v25 = vld [vmem:[%s1625_s5 + $0x18] sm:$0xff]  }
  0x2e   :  { %1097 = vrot.lane.b32.xlu0 %v1096_v28, %s1209_s23  ;;  %v185_v34 = vsel %vm182_vm1, %v178_v29, %v179_v27  ;;  %v181_v38 = vrot.slane %v95_v24, 7  ;;  %vm1360_vm3 = vcmp.lt.s32.totalorder %v151_v26, 15  ;;  %v198_v42 = vrot.slane %v95_v24, 1  ;;  %528 = vmatpush1.bf16.msra.mxu1 %v1128_v22  ;;  %v1130_v24 = vld [vmem:[%s1625_s5 + $0x10] sm:$0xff]   ;;  %v1132_v26 = vld [vmem:[%s1625_s5 + $0x20] sm:$0xff]  }
  0x2f   :  { %v202_v37 = vsel %vm199_vm0, %v195_v31, %v196_v33  ;;  %v201_v41 = vsel %vm199_vm0, %v196_v33, %v197_v36  ;;  %v180_v50 = vrot.slane %v94_v23, 7  ;;  %vm1420_vm5 = vcmp.ge.s32.totalorder %v130_v61, 1  ;;  %v1129_v23 = vld [vmem:[%s1625_s5 + $0x8] sm:$0xff]   ;;  %529 = vmatprep.subr.bf16.mxu1 %v1208_v1  ;;  %v1134_v28 = vld [vmem:[%s1625_s5 + $0x30] sm:$0xff]   ;;  %v1139_v33 = vld [vmem:[%s1625_s5 + $0x58] sm:$0xff]  }
  0x30   :  { %322 = vmatpush1.bf16.msra.mxu0 %v1118_v30  ;;  %v205_v43 = vsel %vm1354_vm2, %v201_v41, 0.0  ;;  %v186_v44 = vsel %vm182_vm1, %v181_v38, %v178_v29  ;;  %v200_v46 = vsel %vm199_vm0, %v197_v36, %v198_v42  ;;  %v203_v47 = vsel %vm199_vm0, %v198_v42, %v195_v31  ;;  %v1135_v29 = vld [vmem:[%s1625_s5 + $0x38] sm:$0xff]   ;;  %v1136_v30 = vld [vmem:[%s1625_s5 + $0x40] sm:$0xff]   ;;  %v1137_v31 = vld [vmem:[%s1625_s5 + $0x48] sm:$0xff]  }
  0x31   :  { %323 = vmatprep.subr.bf16.mxu0 %v1208_v1  ;;  %v230_v45 = vpack.c.bf16 %v205_v43, %v202_v37  ;;  %v207_v49 = vsel %vm1360_vm3, %v203_v47, 0.0  ;;  %v183_v52 = vsel %vm182_vm1, %v180_v50, %v181_v38  ;;  %v184_v53 = vsel %vm182_vm1, %v179_v27, %v180_v50  ;;  %v1133_v27 = vld [vmem:[%s1625_s5 + $0x28] sm:$0xff]  }
  0x32   :  { %1102 = vrot.lane.b32.xlu0 %v1101_v32, %s1209_s23  ;;  %v232_v51 = vpack.c.bf16 %v207_v49, %v200_v46  ;;  %v144_v0 = vand.u32 15, %v124_v62  ;;  %v187_v6 = vsel %vm1420_vm5, %v186_v44, 0.0  ;;  %530 = vmatpush1.bf16.msra.mxu1 %v1129_v23  ;;  %v1138_v32 = vld [vmem:[%s1625_s5 + $0x50] sm:$0xff]   ;;  %vm877_vm11 = vcmask 261120  }
  0x33   :  { %994 = vmatprep.mubr.msk.bf16.mxu0 %vm224_vm4, %v230_v45  ;;  %531 = vmatprep.subr.bf16.mxu1 %v1208_v1 }
  0x34   :  { %324 = vmatpush1.bf16.msra.mxu0 %v1119_v40  ;;  %vm1426_vm6 = vcmp.ge.s32.totalorder %v144_v0, 1 }
  0x35   :  { %325 = vmatprep.subr.bf16.mxu0 %v1208_v1  ;;  %v189_v16 = vsel %vm1426_vm6, %v184_v53, 0.0 }
  0x36   :  { %532 = vmatpush1.bf16.msra.mxu1 %v1130_v24 }
  0x37   :  { %533 = vmatprep.subr.bf16.mxu1 %v1208_v1 }
  0x38   :  { %326 = vmatpush1.bf16.msra.mxu0 %v1120_v48 }
  0x39   :  { %327 = vmatprep.subr.bf16.mxu0 %v1208_v1 }
  0x3a   :  { %534 = vmatpush1.bf16.msra.mxu1 %v1131_v25 }
  0x3b   :  { %535 = vmatprep.subr.bf16.mxu1 %v1208_v1 }
  0x3c   :  { %328 = vmatpush1.bf16.msra.mxu0 %v1121_v54 }
  0x3d   :  { %329 = vmatprep.subr.bf16.mxu0 %v1208_v1 }
  0x3e   :  { %536 = vmatpush1.bf16.msra.mxu1 %v1132_v26 }
  0x3f   :  { %537 = vmatprep.subr.bf16.mxu1 %v1208_v1 }
  0x40   :  { %330 = vmatpush1.bf16.msra.mxu0 %v1122_v55 }
  0x41   :  { %331 = vmatprep.subr.bf16.mxu0 %v1208_v1 }
  0x42   :  { %538 = vmatpush1.bf16.msra.mxu1 %v1133_v27 }
  0x43   :  { %539 = vmatprep.subr.bf16.mxu1 %v1208_v1 }
  0x44   :  { %332 = vmatpush1.bf16.msra.mxu0 %v1123_v56 }
  0x45   :  { %333 = vmatprep.subr.bf16.mxu0 %v1208_v1 }
  0x46   :  { %540 = vmatpush1.bf16.msra.mxu1 %v1134_v28 }
  0x47   :  { %541 = vmatprep.subr.bf16.mxu1 %v1208_v1 }
  0x48   :  { %334 = vmatpush1.bf16.msra.mxu0 %v1124_v57 }
  0x49   :  { %335 = vmatprep.subr.bf16.mxu0 %v1208_v1 }
  0x4a   :  { %542 = vmatpush1.bf16.msra.mxu1 %v1135_v29  ;;  %v1140_v29 = vld [vmem:[%s1627_s7] sm:$0xff]  }
  0x4b   :  { %543 = vmatprep.subr.bf16.mxu1 %v1208_v1 }
  0x4c   :  { %336 = vmatpush1.bf16.msra.mxu0 %v1125_v58 }
  0x4d   :  { %337 = vmatprep.subr.bf16.mxu0 %v1208_v1 }
  0x4e   :  { %544 = vmatpush1.bf16.msra.mxu1 %v1136_v30  ;;  %v1210_v30 = vmov 0.0  }
  0x4f   :  { %545 = vmatprep.subr.bf16.mxu1 %v1208_v1 }
  0x50   :  { %338 = vmatpush1.bf16.msra.mxu0 %v1126_v59 }
  0x51   :  { %339 = vmatprep.subr.bf16.mxu0 %v1208_v1 }
  0x52   :  { %546 = vmatpush1.bf16.msra.mxu1 %v1137_v31  ;;  %v1142_v31 = vld [vmem:[%s1627_s7 + $0x10] sm:$0xff]  }
  0x53   :  { %547 = vmatprep.subr.bf16.mxu1 %v1208_v1 }
  0x54   :  { %340 = vmatpush1.bf16.msra.mxu0 %v1127_v60 }
  0x55   :  { %1045 = vmatprep.subr.bf16.mxu0 %v1210_v30 }
  0x56   :  { %548 = vmatpush1.bf16.msra.mxu1 %v1138_v32  ;;  %v1143_v32 = vld [vmem:[%s1627_s7 + $0x18] sm:$0xff]  }
  0x57   :  { %549 = vmatprep.subr.bf16.mxu1 %v1208_v1 }
  0x5a   :  { %550 = vmatpush1.bf16.msra.mxu1 %v1139_v33  ;;  %v682_v33 = vld [vmem:[#allocation2] sm:$0x3] }
  0x5b   :  { %1057 = vmatprep.subr.bf16.mxu1 %v1210_v30 }
  0xa0   :  { %v1098_v5 = vpop.permute.xlu0 %1097 }
  0xa1   :  { %v1100_v7 = vunpack.i.h.bf16 %v1098_v5  ;;  %v1099_v8 = vunpack.i.l.bf16 %v1098_v5 }
  0xa3   :  { %v225_v12 = vsel %vm224_vm4, %v187_v6, %v1099_v8  ;;  %v226_v13 = vsel %vm224_vm4, %v185_v34, %v1100_v7  ;;  %v981_v34 = vld [vmem:[%s1624_s4] ss:$0 sm:$0xff] }
  0xa4   :  { %v229_v14 = vpack.c.bf16 %v226_v13, %v225_v12  ;;  %v1103_v15 = vpop.permute.xlu0 %1102 }
  0xa5   :  { %v1105_v17 = vunpack.i.h.bf16 %v1103_v15  ;;  %v1104_v18 = vunpack.i.l.bf16 %v1103_v15 }
  0xa6   :  { %350 = vmatmul.mubr.bf16.vlgmr.msra.gmra.mrb[0].mxu0 %v229_v14 }
  0xa7   :  { %995 = vmatprep.mubr.msk.bf16.mxu0 %vm224_vm4, %v232_v51  ;;  %v227_v19 = vsel %vm224_vm4, %v189_v16, %v1104_v18  ;;  %v228_v20 = vsel %vm224_vm4, %v183_v52, %v1105_v17  ;;  %1046 = vmatpush3.bf16.msra.mxu0 %v1140_v29 }
  0xa8   :  { %v231_v21 = vpack.c.bf16 %v228_v20, %v227_v19  ;;  %1047 = vmatprep.subr.bf16.mxu0 %v1210_v30 }
  0xab   :  { %1048 = vmatpush3.bf16.msra.mxu0 %v1141_v11 }
  0xac   :  { %1049 = vmatprep.subr.bf16.mxu0 %v1210_v30 }
  0xae   :  { %358 = vmatmul.mubr.bf16.gmra.mrb[4].mxu0 %v231_v21 }
  0xaf   :  { %1050 = vmatpush3.bf16.msra.mxu0 %v1142_v31  ;;  %1053 = vmatprep.mubr.msk.bf16.mxu0 %vm1211_vm7, %v1210_v30 }
  0xb0   :  { %1051 = vmatprep.subr.bf16.mxu0 %v1210_v30 }
  0xb3   :  { %1052 = vmatpush3.bf16.msra.mxu0 %v1143_v32 }
  0xb4   :  { %1063 = vmatprep.subr.bf16.mxu0 %v1210_v30 }
 0x179   :  { %v351_v36 = vpop.f32.mrb[0].mxu0 }
 0x17a   :  { %v352_v37 = vadd.f32 %v981_v34, %v351_v36  ;;  %v353_v38 = vpop.f32.mrb[1].mxu0  ;;  %v996_v36 = vld [vmem:[%s1626_s6] ss:$0 sm:$0xff] }
 0x17b   :  { %v354_v40 = vpop.f32.mrb[2].mxu0 }
 0x17c   :  { %v366_v41 = vmax.f32 %v352_v37, 0.0  ;;  %v355_v42 = vadd.f32 %v981_v34, %v354_v40  ;;  %v356_v43 = vpop.f32.mrb[3].mxu0 }
 0x17e   :  { %v367_v44 = vmax.f32 %v355_v42, 0.0  ;;  %v395_v45 = vrot.slane %v366_v41, 7  ;;  %v407_v46 = vrot.slane %v366_v41, 1 }
 0x180   :  { %v396_v1 = vrot.slane %v367_v44, 7  ;;  %v408_v47 = vrot.slane %v367_v44, 1  ;;  %v1106_v48 = vpack.i.bf16 %v367_v44, %v366_v41 }
 0x181   :  { %v359_v49 = vpop.f32.mrb[4].mxu0 }
 0x182   :  { %v360_v50 = vadd.f32 %v981_v34, %v359_v49  ;;  %v361_v51 = vpop.f32.mrb[5].mxu0  ;;  %1107 = vrot.lane.b32.xlu1 %v1106_v48, %s1209_s23  ;;  %v413_v52 = vsel %vm199_vm0, %v407_v46, %v408_v47  ;;  %v401_v53 = vsel %vm182_vm1, %v395_v45, %v396_v1 }
 0x183   :  { %v362_v54 = vpop.f32.mrb[6].mxu0 }
 0x184   :  { %v368_v55 = vmax.f32 %v360_v50, 0.0  ;;  %v363_v56 = vadd.f32 %v981_v34, %v362_v54  ;;  %v364_v57 = vpop.f32.mrb[7].mxu0  ;;  %v690_v34 = vsel %vm688_vm8, %v682_v33, 0 }
 0x186   :  { %v397_v58 = vrot.slane %v368_v55, 7  ;;  %v409_v59 = vrot.slane %v368_v55, 1  ;;  %v369_v60 = vmax.f32 %v363_v56, 0.0 }
 0x188   :  { %v398_v61 = vrot.slane %v369_v60, 7  ;;  %v410_v62 = vrot.slane %v369_v60, 1  ;;  %v1111_v0 = vpack.i.bf16 %v369_v60, %v368_v55  ;;  %v412_v5 = vsel %vm199_vm0, %v408_v47, %v409_v59 }
 0x189   :  { %v416_v6 = vsel %vm1354_vm2, %v412_v5, 0.0  ;;  %v400_v7 = vsel %vm182_vm1, %v396_v1, %v397_v58 }
 0x18a   :  { %1112 = vrot.lane.b32.xlu1 %v1111_v0, %s1209_s23  ;;  %v440_v8 = vpack.c.bf16 %v416_v6, %v413_v52  ;;  %v402_v12 = vsel %vm182_vm1, %v398_v61, %v395_v45  ;;  %v411_v13 = vsel %vm199_vm0, %v409_v59, %v410_v62  ;;  %v414_v14 = vsel %vm199_vm0, %v410_v62, %v407_v46 }
 0x18b   :  { %v418_v15 = vsel %vm1360_vm3, %v414_v14, 0.0  ;;  %v399_v35 = vsel %vm182_vm1, %v397_v58, %v398_v61  ;;  %v403_v20 = vsel %vm1420_vm5, %v402_v12, 0.0  ;;  %v405_v26 = vsel %vm1426_vm6, %v400_v7, 0.0 }
 0x18c   :  { %1009 = vmatprep.mubr.msk.bf16.mxu1 %vm224_vm4, %v440_v8  ;;  %v442_v16 = vpack.c.bf16 %v418_v15, %v411_v13 }
 0x1f4   :  { %v1108_v17 = vpop.permute.xlu1 %1107 }
 0x1f5   :  { %v1110_v18 = vunpack.i.h.bf16 %v1108_v17  ;;  %v1109_v19 = vunpack.i.l.bf16 %v1108_v17  ;;  %v1144_v17 = vld [vmem:[%s1629_s9] sm:$0xff]  }
 0x1f7   :  { %v435_v21 = vsel %vm224_vm4, %v403_v20, %v1109_v19  ;;  %v436_v22 = vsel %vm224_vm4, %v401_v53, %v1110_v18  ;;  %v1145_v19 = vld [vmem:[%s1629_s9 + $0x8] sm:$0xff]   ;;  %v1146_v20 = vld [vmem:[%s1629_s9 + $0x10] sm:$0xff]  }
 0x1f8   :  { %v439_v23 = vpack.c.bf16 %v436_v22, %v435_v21  ;;  %v1147_v21 = vld [vmem:[%s1629_s9 + $0x18] sm:$0xff]  }
 0x1fa   :  { %560 = vmatmul.mubr.bf16.vlgmr.msra.gmra.mrb[0].mxu1 %v439_v23  ;;  %v811_v23 = vld [vmem:[#allocation4] sm:$0x3] }
 0x1fb   :  { %1010 = vmatprep.mubr.msk.bf16.mxu1 %vm224_vm4, %v442_v16  ;;  %1058 = vmatpush3.bf16.msra.mxu1 %v690_v34  ;;  %v1148_v34 = vld [vmem:[%s1631_s11] sm:$0xff]  }
 0x1fc   :  { %v1113_v39 = vpop.permute.xlu1 %1112  ;;  %1075 = vmatprep.subr.bf16.mxu1 %v1210_v30 }
 0x1fd   :  { %v1115_v24 = vunpack.i.h.bf16 %v1113_v39  ;;  %v1114_v25 = vunpack.i.l.bf16 %v1113_v39 }
 0x1ff   :  { %v437_v27 = vsel %vm224_vm4, %v405_v26, %v1114_v25  ;;  %v438_v28 = vsel %vm224_vm4, %v399_v35, %v1115_v24 }
 0x200   :  { %v441_v63 = vpack.c.bf16 %v438_v28, %v437_v27  ;;  %v817_v28 = vsel %vm688_vm8, %v811_v23, 0 }
 0x202   :  { %568 = vmatmul.mubr.bf16.gmra.mrb[4].mxu1 %v441_v63 }
 0x203   :  { %1059 = vmatprep.mubr.msk.bf16.mxu1 %vm1211_vm7, %v1210_v30 }
 0x2cd   :  { %v561_v37 = vpop.f32.mrb[0].mxu1 }
 0x2ce   :  { %v1546_v38 = vadd.f32 %v996_v36, %v561_v37  ;;  %v563_v40 = vpop.f32.mrb[1].mxu1 }
 0x2cf   :  { %v564_v41 = vpop.f32.mrb[2].mxu1 }
 0x2d0   :  { %v1548_v42 = vadd.f32 %v996_v36, %v564_v41  ;;  %v566_v43 = vpop.f32.mrb[3].mxu1  ;;  %v576_v44 = vsel %vm224_vm4, %v1546_v38, 0.0 }
 0x2d2   :  { %v577_v45 = vsel %vm224_vm4, %v1548_v42, 0.0 }
 0x2d3   :  { %v578_v46 = vadd.f32 %v577_v45, %v576_v44 }
 0x2d5   :  { %v579_v1 = vrot.slane %v578_v46, 4  ;;  %v569_v47 = vpop.f32.mrb[4].mxu1 }
 0x2d6   :  { %v1554_v48 = vadd.f32 %v996_v36, %v569_v47  ;;  %v571_v49 = vpop.f32.mrb[5].mxu1 }
 0x2d7   :  { %v580_v50 = vadd.f32 %v579_v1, %v578_v46  ;;  %v572_v51 = vpop.f32.mrb[6].mxu1 }
 0x2d8   :  { %v1556_v52 = vadd.f32 %v996_v36, %v572_v51  ;;  %v574_v53 = vpop.f32.mrb[7].mxu1  ;;  %v585_v55 = vsel %vm224_vm4, %v1554_v48, 0.0  ;;  %v1149_v36 = vld [vmem:[%s1631_s11 + $0x8] sm:$0xff]  }
 0x2d9   :  { %v581_v54 = vrot.slane %v580_v50, 2 }
 0x2da   :  { %v586_v56 = vsel %vm224_vm4, %v1556_v52, 0.0 }
 0x2db   :  { %v582_v57 = vadd.f32 %v581_v54, %v580_v50  ;;  %v587_v58 = vadd.f32 %v586_v56, %v585_v55 }
 0x2dd   :  { %v583_v59 = vrot.slane %v582_v57, 1  ;;  %v588_v60 = vrot.slane %v587_v58, 4 }
 0x2df   :  { %v589_v61 = vadd.f32 %v588_v60, %v587_v58  ;;  %v584_v62 = vadd.f32 %v583_v59, %v582_v57  ;;  %v1212_v60 = vmov 1966171168  }
 0x2e1   :  { %v590_v0 = vrot.slane %v589_v61, 2  ;;  %v595_v6 = vmul.f32 0.0625, %v584_v62 }
 0x2e3   :  { %v591_v5 = vadd.f32 %v590_v0, %v589_v61  ;;  %v605_v12 = vpack.c.bf16 %v595_v6, %v595_v6  ;;  %v930_v61 = vunpack.c.l.s4 %v1212_v60 }
 0x2e5   :  { %v592_v7 = vrot.slane %v591_v5, 1  ;;  %v609_v15 = vunpack.c.l.b16 %v605_v12  ;;  %v931_v62 = vunpack.c.0.s8 %v930_v61  ;;  %v953_v12 = vsub.s32 0, %v1304_v2 }
 0x2e7   :  { %v593_v8 = vadd.f32 %v592_v7, %v591_v5  ;;  %v934_v5 = vsub.s32 %v931_v62, %v1304_v2 }
 0x2e9   :  { %v596_v13 = vmul.f32 0.0625, %v593_v8 }
 0x2eb   :  { %v606_v14 = vpack.c.bf16 %v596_v13, %v596_v13 }
 0x2ed   :  { %v610_v35 = vunpack.c.l.b16 %v606_v14 }
 0x2ef   :  { %v612_v16 = vsel %vm611_vm9, %v610_v35, %v609_v15 }
 0x2f0   :  { %v613_v18 = vpack.c.b16 %v612_v16, %v612_v16 }
 0x2f2   :  { %1054 = vmatmul.mubr.msk.bf16.vlgmr.msra.gmra.mrb[8].mxu0 %vm224_vm4, %v613_v18 }
 0x2f3   :  { %1064 = vmatpush3.bf16.msra.mxu0 %v1144_v17  ;;  %1071 = vmatprep.mubr.msk.bf16.mxu0 %vm1211_vm7, %v1210_v30 }
 0x2f4   :  { %1065 = vmatprep.subr.bf16.mxu0 %v1210_v30 }
 0x2f7   :  { %1066 = vmatpush3.bf16.msra.mxu0 %v1145_v19 }
 0x2f8   :  { %1067 = vmatprep.subr.bf16.mxu0 %v1210_v30 }
 0x2fb   :  { %1068 = vmatpush3.bf16.msra.mxu0 %v1146_v20 }
 0x2fc   :  { %1069 = vmatprep.subr.bf16.mxu0 %v1210_v30 }
 0x2ff   :  { %1070 = vmatpush3.bf16.msra.mxu0 %v1147_v21 }
 0x302   :  { %1072 = vmatmul.mubr.msk.bf16.vlgmr.msra.gmra.mrb[12].mxu0 %vm224_vm4, %v613_v18 }
 0x3c5   :  { %v675_v22 = vpop.f32.mrb[8].mxu0 }
 0x3c6   :  { %v681_v39 = vmax.f32 %v675_v22, 0.0  ;;  %v1055_v24 = vpop.f32.mrb[9].mxu0 }
 0x3c7   :  { %v678_v25 = vpop.f32.mrb[10].mxu0 }
 0x3c8   :  { %v683_v26 = vpack.c.bf16 %v681_v39, %v681_v39  ;;  %v1056_v27 = vpop.f32.mrb[11].mxu0 }
 0x3ca   :  { %1060 = vmatmul.mubr.msk.bf16.vlgmr.msra.gmra.mrb[8].mxu1 %vm684_vm10, %v683_v26 }
 0x3cb   :  { %1076 = vmatpush3.bf16.msra.mxu1 %v817_v28  ;;  %1077 = vmatprep.mubr.msk.bf16.mxu1 %vm1211_vm7, %v1210_v30 }
 0x3cc   :  { %1081 = vmatprep.subr.bf16.mxu1 %v1210_v30 }
 0x3d5   :  { %v804_v63 = vpop.f32.mrb[12].mxu0 }
 0x3d6   :  { %v810_v29 = vmax.f32 %v804_v63, 0.0  ;;  %v1073_v11 = vpop.f32.mrb[13].mxu0 }
 0x3d7   :  { %v807_v31 = vpop.f32.mrb[14].mxu0 }
 0x3d8   :  { %v812_v32 = vpack.c.bf16 %v810_v29, %v810_v29  ;;  %v1074_v33 = vpop.f32.mrb[15].mxu0 }
 0x3da   :  { %1078 = vmatmul.mubr.msk.bf16.vlgmr.msra.gmra.mrb[12].mxu1 %vm684_vm10, %v812_v32 }
 0x3db   :  { %1085 = vmatprep.mubr.msk.bf16.mxu1 %vm1211_vm7, %v1210_v30  ;;  %1082 = vmatpush3.bf16.msra.mxu1 %v1148_v34 }
 0x3dc   :  { %1083 = vmatprep.subr.bf16.mxu1 %v1210_v30 }
 0x3df   :  { %1084 = vmatpush3.bf16.msra.mxu1 %v1149_v36 }
 0x49d   :  { %v726_v37 = vpop.f32.mrb[8].mxu1 }
 0x49e   :  { %v1061_v40 = vpop.f32.mrb[9].mxu1  ;;  %v1017_v50 = vmul.f32 -1.442695, %v726_v37 }
 0x49f   :  { %v729_v41 = vpop.f32.mrb[10].mxu1 }
 0x4a0   :  { %v1062_v43 = vpop.f32.mrb[11].mxu1  ;;  %1150 = vpow2.f32 %v1017_v50 }
 0x4aa   :  { %v1151_v56 = vpop.eup %1150 }
 0x4ab   :  { %v735_v57 = vadd.f32 1.0, %v1151_v56 }
 0x4ad   :  { %v853_v44 = vpop.f32.mrb[12].mxu1 }
 0x4ae   :  { %v859_v45 = vmax.f32 %v853_v44, 0.0  ;;  %v1079_v46 = vpop.f32.mrb[13].mxu1 }
 0x4af   :  { %v856_v1 = vpop.f32.mrb[14].mxu1 }
 0x4b0   :  { %v864_v47 = vpack.c.bf16 %v859_v45, %v859_v45  ;;  %v1080_v49 = vpop.f32.mrb[15].mxu1 }
 0x4b2   :  { %1086 = vmatmul.mubr.msk.bf16.vlgmr.msra.gmra.mrb[16].mxu1 %vm877_vm11, %v864_v47 }
 0x585   :  { %v915_v30 = vpop.f32.mrb[16].mxu1 }
 0x586   :  { %v1027_v51 = vmul.f32 -1.442695, %v915_v30  ;;  %v1087_v53 = vpop.f32.mrb[17].mxu1 }
 0x587   :  { %v918_v54 = vpop.f32.mrb[18].mxu1 }
 0x588   :  { %1152 = vpow2.f32 %v1027_v51  ;;  %v1088_v55 = vpop.f32.mrb[19].mxu1 }
 0x589   :  { %1154 = vrcp.f32 %v735_v57 }
 0x592   :  { %v1153_v58 = vpop.eup %1152 }
 0x593   :  { %v924_v59 = vadd.f32 1.0, %v1153_v58  ;;  %v1155_v0 = vpop.eup %1154 }
 0x595   :  { %1156 = vrcp.f32 %v924_v59 }
 0x59f   :  { %v1157_v6 = vpop.eup %1156 }
 0x5a0   :  { %v927_v7 = vadd.f32 %v1157_v6, %v1155_v0 }
 0x5a2   :  { %v935_v8 = vrot.slane %v927_v7, %v934_v5 }
 0x5a4   :  { %v936_v13 = vcombine.high %v935_v8, %v935_v8  ;;  %v943_v14 = vrot.slane %v935_v8, %v934_v5 }
 0x5a6   :  { %v950_v15 = vrot.slane %v936_v13, %v934_v5  ;;  %v954_v35 = vrot.slane %v943_v14, %v953_v12 }
 0x5a8   :  { %v958_v16 = vrot.slane %v950_v15, %v953_v12  ;;  %v961_v17 = vmul.f32 %v954_v35, %v1546_v38  ;;  %v962_v18 = vmul.f32 %v954_v35, %v1548_v42 }
 0x5aa   :  { %v963_v19 = vmul.f32 %v958_v16, %v1554_v48  ;;  %v964_v20 = vmul.f32 %v958_v16, %v1556_v52  ;;  %v965_v21 = vadd.f32 %v961_v17, %v1309_v3  ;;  %v966_v22 = vadd.f32 %v962_v18, %v1314_v4 }
 0x5ac   :  { %v967_v23 = vadd.f32 %v963_v19, %v1327_v9  ;;  %v968_v2 = vadd.f32 %v964_v20, %v1332_v10  ;;  %969 = vst.msk [vmem:[%s1632_s12] sm:$0xff] %vm224_vm4, %v965_v21  ;;  %970 = vst.msk [vmem:[%s1632_s12 + $0x8] sm:$0xff] %vm224_vm4, %v966_v22 }
 0x5ae   :  { %971 = vst.msk [vmem:[%s1632_s12 + $0x10] sm:$0xff] %vm224_vm4, %v967_v23  ;;  %972 = vst.msk [vmem:[%s1632_s12 + $0x18] sm:$0xff] %vm224_vm4, %v968_v2 }
 0x5af   :  { %977 = vsyncpa [#allocation3], 1 }
 0x5b0   :  { %978 = vsyncpa [#allocation5], 1 }

// kernel: resnet_bigru_forward.7
= control target key start
LH: loop header
LB: loop body
LE: loop exit
PB: predicated region body
PF: predicated region fallthrough
CT: control target
= control target key end

     0   :  { %19 = vsyncpa [#allocation3], 0  ;;  %s2386_s0 = inlined_call_operand.vmem [shape: f32[32,64], index: 0, kind: input, shape index: {}]   ;;  %s2387_s1 = inlined_call_operand.hbm [shape: f32[1,64], index: 1, kind: input, shape index: {}]   ;;  %s2388_s2 = inlined_call_operand.hbm [shape: f32[1,64], index: 2, kind: input, shape index: {}]   ;;  %s2389_s3 = inlined_call_operand.vmem [shape: bf16[192,128], index: 3, kind: input, shape index: {}]   ;;  %s2390_s4 = inlined_call_operand.hbm [shape: f32[1,128], index: 4, kind: input, shape index: {}]   ;;  %s2391_s5 = inlined_call_operand.vmem [shape: bf16[384,128], index: 5, kind: input, shape index: {}]   ;;  %s2392_s6 = inlined_call_operand.hbm [shape: f32[1,128], index: 6, kind: input, shape index: {}]   ;;  %s2393_s7 = inlined_call_operand.vmem [shape: bf16[128,8], index: 7, kind: input, shape index: {}]   ;;  %s2394_s8 = inlined_call_operand.hbm [shape: bf16[8,128], index: 8, kind: input, shape index: {}]   ;;  %s2395_s9 = inlined_call_operand.vmem [shape: bf16[128,8], index: 9, kind: input, shape index: {}]   ;;  %s2396_s10 = inlined_call_operand.hbm [shape: bf16[8,64], index: 10, kind: input, shape index: {}]   ;;  %s2397_s11 = inlined_call_operand.vmem [shape: bf16[64,128], index: 11, kind: input, shape index: {}]   ;;  %s2398_s12 = inlined_call_operand.vmem [shape: bf16[64,128], index: 12, kind: input, shape index: {}]   ;;  %s2399_s13 = inlined_call_operand.hbm [shape: f32[1,128], index: 13, kind: input, shape index: {}]   ;;  %s2400_s14 = inlined_call_operand.vmem [shape: f32[32,128], index: 14, kind: output, shape index: {}]  }
   0x1   :  { %20 = vsyncpa [#allocation5], 0 }
   0x2   :  { %21 = vsyncpa [#allocation8], 0 }
   0x3   :  { %22 = vsyncpa [#allocation11], 0  ;;  %s1840_s29 = smov [#allocation4]   ;;  %s1841_s15 = smov [#allocation7]  }
   0x4   :  { %s41_s30 = sshll.u32 %s1840_s29, 4  ;;  %s65_s16 = sshll.u32 %s1841_s15, 4  ;;  %s42_s30 = int_to_ptr.vmem [resolvable:$true] %s41_s30  ;;  %s66_s16 = int_to_ptr.vmem [resolvable:$true] %s65_s16 }
   0x5   :  { %s1678_s19 = scalar_lea.hbm %s2388_s2, 16 }
   0x6   :  { %p1679_p0 = scmp.ne.s32.totalorder %s2388_s2, %s1678_s19  ;;  %p1682_p1 = scmp.lt.u32.totalorder %s1678_s19, %s2388_s2 }
   0x8   :  { %p1684_p2 = pnand %p1682_p1, %p1679_p0 }
   0xa   :  { %1687 = shalt.err (!%p1684_p2)
}
   0xb   :  { %s1688_s24 = scalar_lea.vmem %s42_s30, 16  ;;  %s1692_s25 = scalar_lea.vmem %s42_s30, 32 }
   0xc   :  { %p1689_p3 = scmp.ne.s32.totalorder %s42_s30, %s1688_s24  ;;  %p1693_p4 = scmp.lt.s32.totalorder %s42_s30, %s42_s30 }
   0xd   :  { %p1694_p5 = scmp.lt.s32.totalorder %s1692_s25, %s1688_s24 }
   0xf   :  { %p1695_p6 = por %p1694_p5, %p1693_p4 }
  0x11   :  { %p1696_p7 = pnand %p1695_p6, %p1689_p3 }
  0x13   :  { %1699 = shalt.err (!%p1696_p7)
}
  0x14   :  { %44 = dma.hbm_to_vmem [thread:$0]  %s2388_s2, 16, %s42_s30, [#allocation5]  }
  0x15   :  { %s1700_s15 = scalar_lea.hbm %s2392_s6, 16 }
  0x16   :  { %p1701_p8 = scmp.ne.s32.totalorder %s2392_s6, %s1700_s15  ;;  %p1704_p9 = scmp.lt.u32.totalorder %s1700_s15, %s2392_s6 }
  0x18   :  { %p1706_p10 = pnand %p1704_p9, %p1701_p8 }
  0x1a   :  { %1709 = shalt.err (!%p1706_p10)
}
  0x1b   :  { %s1710_s21 = scalar_lea.vmem %s66_s16, 16  ;;  %s1714_s22 = scalar_lea.vmem %s66_s16, 32 }
  0x1c   :  { %p1711_p11 = scmp.ne.s32.totalorder %s66_s16, %s1710_s21  ;;  %p1715_p12 = scmp.lt.s32.totalorder %s66_s16, %s66_s16 }
  0x1d   :  { %p1716_p13 = scmp.lt.s32.totalorder %s1714_s22, %s1710_s21 }
  0x1f   :  { %p1717_p0 = por %p1716_p13, %p1715_p12 }
  0x21   :  { %p1718_p1 = pnand %p1717_p0, %p1711_p11 }
  0x23   :  { %1721 = shalt.err (!%p1718_p1)
}
  0x24   :  { %68 = dma.hbm_to_vmem [thread:$0]  %s2392_s6, 16, %s66_s16, [#allocation8]  }
  0x25   :  { %s1842_s23 = smov [#allocation10]   ;;  %s1843_s25 = smov [#allocation2]  }
  0x26   :  { %s89_s24 = sshll.u32 %s1842_s23, 4  ;;  %s31_s26 = sshll.u32 %s1843_s25, 4  ;;  %s90_s24 = int_to_ptr.vmem [resolvable:$true] %s89_s24  ;;  %s32_s26 = int_to_ptr.vmem [resolvable:$true] %s31_s26 }
  0x27   :  { %s1722_s29 = scalar_lea.hbm %s2396_s10, 64 }
  0x28   :  { %p1723_p2 = scmp.ne.s32.totalorder %s2396_s10, %s1722_s29  ;;  %p1726_p3 = scmp.lt.u32.totalorder %s1722_s29, %s2396_s10 }
  0x2a   :  { %p1728_p4 = pnand %p1726_p3, %p1723_p2 }
  0x2c   :  { %1731 = shalt.err (!%p1728_p4)
}
  0x2d   :  { %s1732_s6 = scalar_lea.vmem %s90_s24, 64  ;;  %p1737_p6 = scmp.lt.s32.totalorder %s90_s24, %s90_s24 }
  0x2e   :  { %p1733_p5 = scmp.ne.s32.totalorder %s90_s24, %s1732_s6  ;;  %p1738_p7 = scmp.lt.s32.totalorder %s1732_s6, %s1732_s6 }
  0x30   :  { %p1739_p8 = por %p1738_p7, %p1737_p6 }
  0x32   :  { %p1740_p9 = pnand %p1739_p8, %p1733_p5 }
  0x34   :  { %1743 = shalt.err (!%p1740_p9)
}
  0x35   :  { %92 = dma.hbm_to_vmem [thread:$0]  %s2396_s10, 64, %s90_s24, [#allocation11]  }
  0x36   :  { %s1744_s2 = scalar_lea.hbm %s2387_s1, 16 }
  0x37   :  { %p1745_p10 = scmp.ne.s32.totalorder %s2387_s1, %s1744_s2  ;;  %p1748_p11 = scmp.lt.u32.totalorder %s1744_s2, %s2387_s1 }
  0x39   :  { %p1750_p12 = pnand %p1748_p11, %p1745_p10 }
  0x3b   :  { %1753 = shalt.err (!%p1750_p12)
}
  0x3c   :  { %s1754_s28 = scalar_lea.vmem %s32_s26, 16  ;;  %s1758_s29 = scalar_lea.vmem %s32_s26, 32 }
  0x3d   :  { %p1755_p13 = scmp.ne.s32.totalorder %s32_s26, %s1754_s28  ;;  %p1759_p0 = scmp.lt.s32.totalorder %s32_s26, %s32_s26 }
  0x3e   :  { %p1760_p1 = scmp.lt.s32.totalorder %s1758_s29, %s1754_s28 }
  0x40   :  { %p1761_p2 = por %p1760_p1, %p1759_p0 }
  0x42   :  { %p1762_p3 = pnand %p1761_p2, %p1755_p13 }
  0x44   :  { %1765 = shalt.err (!%p1762_p3)
}
  0x45   :  { %34 = dma.hbm_to_vmem [thread:$0]  %s2387_s1, 16, %s32_s26, [#allocation3]  }
  0x46   :  { %s1844_s15 = smov [#allocation6]   ;;  %s1845_s18 = smov [#allocation9]  }
  0x47   :  { %s53_s17 = sshll.u32 %s1844_s15, 4  ;;  %s77_s19 = sshll.u32 %s1845_s18, 4  ;;  %s54_s17 = int_to_ptr.vmem [resolvable:$true] %s53_s17  ;;  %s78_s19 = int_to_ptr.vmem [resolvable:$true] %s77_s19 }
  0x48   :  { %s1766_s20 = scalar_lea.hbm %s2390_s4, 16 }
  0x49   :  { %p1767_p4 = scmp.ne.s32.totalorder %s2390_s4, %s1766_s20  ;;  %p1770_p5 = scmp.lt.u32.totalorder %s1766_s20, %s2390_s4 }
  0x4b   :  { %p1772_p6 = pnand %p1770_p5, %p1767_p4 }
  0x4d   :  { %1775 = shalt.err (!%p1772_p6)
}
  0x4e   :  { %s1776_s1 = scalar_lea.vmem %s54_s17, 16  ;;  %s1780_s26 = scalar_lea.vmem %s54_s17, 32 }
  0x4f   :  { %p1777_p7 = scmp.ne.s32.totalorder %s54_s17, %s1776_s1  ;;  %p1781_p8 = scmp.lt.s32.totalorder %s54_s17, %s54_s17 }
  0x50   :  { %p1782_p9 = scmp.lt.s32.totalorder %s1780_s26, %s1776_s1 }
  0x52   :  { %p1783_p10 = por %p1782_p9, %p1781_p8 }
  0x54   :  { %p1784_p11 = pnand %p1783_p10, %p1777_p7 }
  0x56   :  { %1787 = shalt.err (!%p1784_p11)
}
  0x57   :  { %56 = dma.hbm_to_vmem [thread:$0]  %s2390_s4, 16, %s54_s17, [#allocation5]  }
  0x58   :  { %s1788_s29 = scalar_lea.hbm %s2394_s8, 64 }
  0x59   :  { %p1789_p12 = scmp.ne.s32.totalorder %s2394_s8, %s1788_s29  ;;  %p1792_p13 = scmp.lt.u32.totalorder %s1788_s29, %s2394_s8 }
  0x5b   :  { %p1794_p0 = pnand %p1792_p13, %p1789_p12 }
  0x5d   :  { %1797 = shalt.err (!%p1794_p0)
}
  0x5e   :  { %s1798_s6 = scalar_lea.vmem %s78_s19, 64  ;;  %p1803_p2 = scmp.lt.s32.totalorder %s78_s19, %s78_s19 }
  0x5f   :  { %p1799_p1 = scmp.ne.s32.totalorder %s78_s19, %s1798_s6  ;;  %p1804_p3 = scmp.lt.s32.totalorder %s1798_s6, %s1798_s6 }
  0x61   :  { %p1805_p4 = por %p1804_p3, %p1803_p2 }
  0x63   :  { %p1806_p5 = pnand %p1805_p4, %p1799_p1 }
  0x65   :  { %1809 = shalt.err (!%p1806_p5)
}
  0x66   :  { %80 = dma.hbm_to_vmem [thread:$0]  %s2394_s8, 64, %s78_s19, [#allocation8]  }
  0x67   :  { %s1846_s16 = smov [#allocation12]   ;;  %s1810_s2 = scalar_lea.hbm %s2399_s13, 16 }
  0x68   :  { %s103_s20 = sshll.u32 %s1846_s16, 4  ;;  %p1811_p6 = scmp.ne.s32.totalorder %s2399_s13, %s1810_s2  ;;  %s104_s20 = int_to_ptr.vmem [resolvable:$true] %s103_s20 }
  0x69   :  { %p1814_p7 = scmp.lt.u32.totalorder %s1810_s2, %s2399_s13 }
  0x6b   :  { %p1816_p8 = pnand %p1814_p7, %p1811_p6 }
  0x6d   :  { %1819 = shalt.err (!%p1816_p8)
}
  0x6e   :  { %s1820_s25 = scalar_lea.vmem %s104_s20, 16  ;;  %s1824_s8 = scalar_lea.vmem %s104_s20, 32 }
  0x6f   :  { %p1821_p9 = scmp.ne.s32.totalorder %s104_s20, %s1820_s25  ;;  %p1825_p10 = scmp.lt.s32.totalorder %s104_s20, %s104_s20 }
  0x70   :  { %p1826_p11 = scmp.lt.s32.totalorder %s1824_s8, %s1820_s25 }
  0x72   :  { %p1827_p12 = por %p1826_p11, %p1825_p10 }
  0x74   :  { %p1828_p13 = pnand %p1827_p12, %p1821_p9 }
  0x76   :  { %1831 = shalt.err (!%p1828_p13)
}
  0x77   :  { %106 = dma.hbm_to_vmem [thread:$0]  %s2399_s13, 16, %s104_s20, [#allocation11]  }
  0x78   :  { %1832 = dma.done.wait [#allocation3], 16  }
  0x79   :  { %1833 = vsyncadd [#allocation3], 4294967280 }
  0x7a   :  { %1834 = dma.done.wait [#allocation5], 32  }
  0x7b   :  { %1835 = vsyncadd [#allocation5], 4294967264 }
  0x7c   :  { %1836 = dma.done.wait [#allocation8], 80  }
  0x7d   :  { %1837 = vsyncadd [#allocation8], 4294967216 }
  0x7e   :  { %1838 = dma.done.wait [#allocation11], 80  }
  0x7f   :  { %1839 = vsyncadd [#allocation11], 4294967216  ;;  %v184_v0 = vlaneseq  ;;  %v1847_v1 = vmov 0   ;;  %v2018_v3 = vld [vmem:[%s2386_s0] sm:$0xff]  ;;  %v2023_v4 = vld [vmem:[%s2386_s0 + $0x8] sm:$0xff]  ;;  %s1848_s22 = smov 64  }
  0x80   :  { %380 = vmatprep.subr.bf16.mxu0 %v1847_v1  ;;  %v1334_v5 = vld [vmem:[#allocation2] ss:$0 sm:$0xff]  ;;  %v1335_v8 = vld [vmem:[#allocation4] ss:$0 sm:$0xff]  ;;  %v2030_v9 = vld [vmem:[%s2386_s0 + $0x10] sm:$0xff]  ;;  %vm287_vm4 = vcmask 523264  }
  0x81   :  { %v2013_v2 = vshrl.u32 %v184_v0, 7  ;;  %v140_v6 = vmul.f32 %v1334_v5, %v2018_v3  ;;  %v141_v7 = vmul.f32 %v1334_v5, %v2023_v4  ;;  %v2035_v10 = vld [vmem:[%s2386_s0 + $0x18] sm:$0xff]  ;;  %v142_v12 = vmul.f32 %v1334_v5, %v2030_v9  ;;  %v1610_v14 = vld [vmem:[%s2389_s3] sm:$0xff]   ;;  %v1611_v20 = vld [vmem:[%s2389_s3 + $0x8] sm:$0xff]  }
  0x82   :  { %v143_v13 = vmul.f32 %v1334_v5, %v2035_v10  ;;  %381 = vmatpush1.bf16.msra.mxu0 %v1610_v14  ;;  %v1612_v30 = vld [vmem:[%s2389_s3 + $0x10] sm:$0xff]   ;;  %v1613_v40 = vld [vmem:[%s2389_s3 + $0x18] sm:$0xff]   ;;  %v1614_v48 = vld [vmem:[%s2389_s3 + $0x20] sm:$0xff]   ;;  %vm1849_vm7 = vmmov 1   ;;  %vm1851_vm12 = vmmov 0   ;;  %vm898_vm13 = vcmask 1043456  }
  0x83   :  { %v186_v11 = vadd.s32 8, %v2013_v2  ;;  %v188_v15 = vadd.s32 24, %v2013_v2  ;;  %v151_v16 = vadd.f32 %v1335_v8, %v140_v6  ;;  %v152_v17 = vadd.f32 %v1335_v8, %v141_v7  ;;  %382 = vmatprep.subr.bf16.mxu0 %v1847_v1  ;;  %v1622_v51 = vld [vmem:[%s2391_s5 + $0x40] sm:$0xff]   ;;  %v1624_v56 = vld [vmem:[%s2391_s5 + $0x48] sm:$0xff]   ;;  %v1626_v58 = vld [vmem:[%s2391_s5 + $0x50] sm:$0xff]  }
  0x84   :  { %vm262_vm0 = vcmp.lt.s32.totalorder %v2013_v2, 7  ;;  %v153_v18 = vadd.f32 %v1335_v8, %v142_v12  ;;  %v154_v19 = vadd.f32 %v1335_v8, %v143_v13  ;;  %vm245_vm1 = vcmp.lt.s32.totalorder %v2013_v2, 1  ;;  %v1623_v53 = vld [vmem:[%s2391_s5] sm:$0xff]   ;;  %1420 = vmatprep.subr.bf16.mxu1 %v1622_v51  ;;  %v1625_v57 = vld [vmem:[%s2391_s5 + $0x8] sm:$0xff]   ;;  %v1627_v60 = vld [vmem:[%s2391_s5 + $0x10] sm:$0xff]  }
  0x85   :  { %v155_v21 = vmax.f32 %v151_v16, 0.0  ;;  %v156_v22 = vmax.f32 %v152_v17, 0.0  ;;  %v200_v25 = vand.u32 15, %v186_v11  ;;  %v214_v26 = vand.u32 15, %v188_v15  ;;  %1421 = vmatpush3.bf16.msra.mxu1 %v1623_v53  ;;  %v1615_v59 = vld [vmem:[%s2389_s3 + $0x28] sm:$0xff]   ;;  %v1616_v61 = vld [vmem:[%s2389_s3 + $0x30] sm:$0xff]  }
  0x86   :  { %v157_v23 = vmax.f32 %v153_v18, 0.0  ;;  %v158_v24 = vmax.f32 %v154_v19, 0.0  ;;  %383 = vmatpush1.bf16.msra.mxu0 %v1611_v20  ;;  %1422 = vmatprep.subr.bf16.mxu1 %v1624_v56  ;;  %v1628_v62 = vld [vmem:[%s2391_s5 + $0x58] sm:$0xff]   ;;  %v1618_v0 = vld [vmem:[%s2389_s3 + $0x40] sm:$0xff]   ;;  %v1619_v5 = vld [vmem:[%s2389_s3 + $0x48] sm:$0xff]   ;;  %v193_v8 = vand.u32 15, %v2013_v2 }
  0x87   :  { %v242_v27 = vrot.slane %v156_v22, 7  ;;  %v1600_v28 = vpack.i.bf16 %v156_v22, %v155_v21  ;;  %v241_v29 = vrot.slane %v155_v21, 7  ;;  %v258_v31 = vrot.slane %v155_v21, 1  ;;  %384 = vmatprep.subr.bf16.mxu0 %v1847_v1  ;;  %v1617_v63 = vld [vmem:[%s2389_s3 + $0x38] sm:$0xff]   ;;  %v1620_v6 = vld [vmem:[%s2389_s3 + $0x50] sm:$0xff]   ;;  %v1643_v18 = vld [vmem:[%s2391_s5 + $0xa8] sm:$0xff]  }
  0x88   :  { %v1605_v32 = vpack.i.bf16 %v158_v24, %v157_v23  ;;  %v259_v33 = vrot.slane %v156_v22, 1  ;;  %vm2058_vm2 = vcmp.lt.s32.totalorder %v200_v25, 15  ;;  %v260_v36 = vrot.slane %v157_v23, 1  ;;  %v1621_v7 = vld [vmem:[%s2389_s3 + $0x58] sm:$0xff]   ;;  %v1640_v12 = vld [vmem:[%s2391_s5 + $0x90] sm:$0xff]  }
  0x89   :  { %1601 = vrot.lane.b32.xlu0 %v1600_v28, %s1848_s22  ;;  %v2056_v34 = vsel %vm245_vm1, %v241_v29, %v242_v27  ;;  %v244_v38 = vrot.slane %v158_v24, 7  ;;  %vm2064_vm3 = vcmp.lt.s32.totalorder %v214_v26, 15  ;;  %v261_v42 = vrot.slane %v158_v24, 1  ;;  %1423 = vmatpush3.bf16.msra.mxu1 %v1625_v57  ;;  %v1629_v28 = vld [vmem:[%s2391_s5 + $0x18] sm:$0xff]   ;;  %vm1382_vm10 = vmpackc.low %vm2058_vm2, %vm1849_vm7  ;;  %v1644_v35 = vld [vmem:[%s2391_s5 + $0xb0] sm:$0xff]  }
  0x8a   :  { %v265_v37 = vsel %vm262_vm0, %v258_v31, %v259_v33  ;;  %385 = vmatpush1.bf16.msra.mxu0 %v1612_v30  ;;  %v264_v41 = vsel %vm262_vm0, %v259_v33, %v260_v36  ;;  %v243_v50 = vrot.slane %v157_v23, 7  ;;  %1424 = vmatprep.subr.bf16.mxu1 %v1626_v58  ;;  %v187_v11 = vadd.s32 16, %v2013_v2  ;;  %v1631_v30 = vld [vmem:[%s2391_s5 + $0x20] sm:$0xff]   ;;  %v1634_v33 = vld [vmem:[%s2391_s5 + $0x70] sm:$0xff]   ;;  %vm1385_vm11 = vmpackc.low %vm2064_vm3, %vm1849_vm7 }
  0x8b   :  { %386 = vmatprep.subr.bf16.mxu0 %v1847_v1  ;;  %v268_v43 = vsel %vm2058_vm2, %v264_v41, 0.0  ;;  %v249_v44 = vsel %vm245_vm1, %v244_v38, %v241_v29  ;;  %v263_v46 = vsel %vm262_vm0, %v260_v36, %v261_v42  ;;  %v266_v47 = vsel %vm262_vm0, %v261_v42, %v258_v31  ;;  %v1630_v29 = vld [vmem:[%s2391_s5 + $0x60] sm:$0xff]   ;;  %v1632_v31 = vld [vmem:[%s2391_s5 + $0x68] sm:$0xff]   ;;  %v1636_v36 = vld [vmem:[%s2391_s5 + $0x78] sm:$0xff]  }
  0x8c   :  { %v293_v45 = vpack.c.bf16 %v268_v43, %v265_v37  ;;  %v270_v49 = vsel %vm2064_vm3, %v266_v47, 0.0  ;;  %v246_v54 = vsel %vm245_vm1, %v243_v50, %v244_v38  ;;  %v247_v55 = vsel %vm245_vm1, %v242_v27, %v243_v50  ;;  %v1637_v37 = vld [vmem:[%s2391_s5 + $0x38] sm:$0xff]   ;;  %v1638_v38 = vld [vmem:[%s2391_s5 + $0x80] sm:$0xff]   ;;  %v1648_v39 = vld [vmem:[%s2393_s7 + $0x10] sm:$0xff]  }
  0x8d   :  { %1606 = vrot.lane.b32.xlu0 %v1605_v32, %s1848_s22  ;;  %v295_v52 = vpack.c.bf16 %v270_v49, %v263_v46  ;;  %1425 = vmatpush3.bf16.msra.mxu1 %v1627_v60  ;;  %vm2144_vm5 = vcmp.ge.s32.totalorder %v193_v8, 1  ;;  %v207_v13 = vand.u32 15, %v187_v11  ;;  %v1633_v32 = vld [vmem:[%s2391_s5 + $0x28] sm:$0xff]   ;;  %vm799_vm14 = vcmask 1041409  }
  0x8e   :  { %387 = vmatpush1.bf16.msra.mxu0 %v1613_v40  ;;  %1349 = vmatprep.mubr.msk.bf16.mxu0 %vm287_vm4, %v293_v45  ;;  %v250_v15 = vsel %vm2144_vm5, %v249_v44, 0.0  ;;  %v1336_v40 = vld [vmem:[#allocation6] ss:$0 sm:$0xff]  ;;  %vm1376_vm8 = vmpackc.low %vm1849_vm7, %vm2144_vm5  ;;  %vm894_vm15 = vcmask 64512  }
  0x8f   :  { %388 = vmatprep.subr.bf16.mxu0 %v1847_v1  ;;  %1426 = vmatprep.subr.bf16.mxu1 %v1628_v62  ;;  %vm2150_vm6 = vcmp.ge.s32.totalorder %v207_v13, 1 }
  0x90   :  { %v252_v22 = vsel %vm2150_vm6, %v247_v55, 0.0  ;;  %vm1379_vm9 = vmpackc.low %vm1849_vm7, %vm2150_vm6 }
  0x91   :  { %1427 = vmatpush3.bf16.msra.mxu1 %v1629_v28  ;;  %v1647_v28 = vld [vmem:[%s2393_s7 + $0x8] sm:$0xff]  }
  0x92   :  { %389 = vmatpush1.bf16.msra.mxu0 %v1614_v48  ;;  %1428 = vmatprep.subr.bf16.mxu1 %v1630_v29  ;;  %v1649_v29 = vld [vmem:[%s2393_s7 + $0x18] sm:$0xff]  }
  0x93   :  { %390 = vmatprep.subr.bf16.mxu0 %v1847_v1 }
  0x95   :  { %1429 = vmatpush3.bf16.msra.mxu1 %v1631_v30  ;;  %v1650_v30 = vld [vmem:[%s2393_s7 + $0x20] sm:$0xff]  }
  0x96   :  { %391 = vmatpush1.bf16.msra.mxu0 %v1615_v59  ;;  %1430 = vmatprep.subr.bf16.mxu1 %v1632_v31  ;;  %v1651_v31 = vld [vmem:[%s2393_s7 + $0x28] sm:$0xff]  }
  0x97   :  { %392 = vmatprep.subr.bf16.mxu0 %v1847_v1 }
  0x99   :  { %1431 = vmatpush3.bf16.msra.mxu1 %v1633_v32  ;;  %v1652_v32 = vld [vmem:[%s2393_s7 + $0x30] sm:$0xff]  }
  0x9a   :  { %393 = vmatpush1.bf16.msra.mxu0 %v1616_v61  ;;  %1432 = vmatprep.subr.bf16.mxu1 %v1634_v33  ;;  %v1653_v33 = vld [vmem:[%s2393_s7 + $0x38] sm:$0xff]  }
  0x9b   :  { %394 = vmatprep.subr.bf16.mxu0 %v1847_v1 }
  0x9e   :  { %395 = vmatpush1.bf16.msra.mxu0 %v1617_v63 }
  0x9f   :  { %396 = vmatprep.subr.bf16.mxu0 %v1847_v1 }
  0xa2   :  { %397 = vmatpush1.bf16.msra.mxu0 %v1618_v0 }
  0xa3   :  { %398 = vmatprep.subr.bf16.mxu0 %v1847_v1 }
  0xa6   :  { %399 = vmatpush1.bf16.msra.mxu0 %v1619_v5 }
  0xa7   :  { %400 = vmatprep.subr.bf16.mxu0 %v1847_v1 }
  0xaa   :  { %401 = vmatpush1.bf16.msra.mxu0 %v1620_v6 }
  0xab   :  { %402 = vmatprep.subr.bf16.mxu0 %v1847_v1 }
  0xae   :  { %403 = vmatpush1.bf16.msra.mxu0 %v1621_v7 }
  0xfb   :  { %v1602_v14 = vpop.permute.xlu0 %1601 }
  0xfc   :  { %v1604_v16 = vunpack.i.h.bf16 %v1602_v14  ;;  %v1603_v17 = vunpack.i.l.bf16 %v1602_v14 }
  0xfe   :  { %v288_v1 = vsel %vm287_vm4, %v250_v15, %v1603_v17  ;;  %v289_v19 = vsel %vm287_vm4, %v2056_v34, %v1604_v16  ;;  %v1635_v34 = vld [vmem:[%s2391_s5 + $0x30] sm:$0xff]  }
  0xff   :  { %v292_v20 = vpack.c.bf16 %v289_v19, %v288_v1  ;;  %v1607_v21 = vpop.permute.xlu0 %1606  ;;  %1433 = vmatpush3.bf16.msra.mxu1 %v1635_v34  ;;  %v892_v34 = vld [vmem:[#allocation9] sm:$0xf] }
 0x100   :  { %v1609_v23 = vunpack.i.h.bf16 %v1607_v21  ;;  %v1608_v24 = vunpack.i.l.bf16 %v1607_v21  ;;  %1434 = vmatprep.subr.bf16.mxu1 %v1636_v36  ;;  %v900_v36 = vsel %vm898_vm13, %v892_v34, 0  ;;  %v1657_v34 = vld [vmem:[%s2395_s9 + $0x18] sm:$0xff]  }
 0x101   :  { %413 = vmatmul.mubr.bf16.vlgmr.msra.gmra.mrb[0].mxu0 %v292_v20  ;;  %v1639_v20 = vld [vmem:[%s2391_s5 + $0x88] sm:$0xff]  }
 0x102   :  { %1350 = vmatprep.mubr.msk.bf16.mxu0 %vm287_vm4, %v295_v52  ;;  %v290_v25 = vsel %vm287_vm4, %v252_v22, %v1608_v24  ;;  %v291_v26 = vsel %vm287_vm4, %v246_v54, %v1609_v23  ;;  %v1641_v23 = vld [vmem:[%s2391_s5 + $0x98] sm:$0xff]   ;;  %v1642_v24 = vld [vmem:[%s2391_s5 + $0xa0] sm:$0xff]  }
 0x103   :  { %v294_v27 = vpack.c.bf16 %v291_v26, %v290_v25  ;;  %1435 = vmatpush3.bf16.msra.mxu1 %v1637_v37  ;;  %v1645_v25 = vld [vmem:[%s2391_s5 + $0xb8] sm:$0xff]   ;;  %v1646_v26 = vld [vmem:[%s2393_s7] sm:$0xff]  }
 0x104   :  { %1491 = vmatprep.subr.bf16.mxu1 %v1638_v38 }
 0x109   :  { %421 = vmatmul.mubr.bf16.gmra.mrb[4].mxu0 %v294_v27  ;;  %v1850_v27 = vmov 0.0  }
 0x10a   :  { %1511 = vmatprep.subr.bf16.mxu0 %v1850_v27  ;;  %1527 = vmatprep.mubr.msk.bf16.mxu0 %vm1851_vm12, %v1850_v27 }
 0x10b   :  { %1512 = vmatpush3.bf16.msra.mxu0 %v1646_v26 }
 0x10c   :  { %1513 = vmatprep.subr.bf16.mxu0 %v1850_v27 }
 0x10f   :  { %1514 = vmatpush3.bf16.msra.mxu0 %v1647_v28 }
 0x110   :  { %1515 = vmatprep.subr.bf16.mxu0 %v1850_v27 }
 0x113   :  { %1516 = vmatpush3.bf16.msra.mxu0 %v1648_v39 }
 0x114   :  { %1517 = vmatprep.subr.bf16.mxu0 %v1850_v27 }
 0x117   :  { %1518 = vmatpush3.bf16.msra.mxu0 %v1649_v29  ;;  %v1654_v29 = vld [vmem:[%s2395_s9] sm:$0xff]  }
 0x118   :  { %1519 = vmatprep.subr.bf16.mxu0 %v1850_v27 }
 0x11b   :  { %1520 = vmatpush3.bf16.msra.mxu0 %v1650_v30 }
 0x11c   :  { %1521 = vmatprep.subr.bf16.mxu0 %v1850_v27 }
 0x11f   :  { %1522 = vmatpush3.bf16.msra.mxu0 %v1651_v31 }
 0x120   :  { %1523 = vmatprep.subr.bf16.mxu0 %v1850_v27 }
 0x123   :  { %1524 = vmatpush3.bf16.msra.mxu0 %v1652_v32  ;;  %v1655_v32 = vld [vmem:[%s2395_s9 + $0x8] sm:$0xff]  }
 0x124   :  { %1525 = vmatprep.subr.bf16.mxu0 %v1850_v27 }
 0x127   :  { %1526 = vmatpush3.bf16.msra.mxu0 %v1653_v33  ;;  %v1656_v33 = vld [vmem:[%s2395_s9 + $0x10] sm:$0xff]  }
 0x128   :  { %1563 = vmatprep.subr.bf16.mxu0 %v1850_v27 }
 0x1d4   :  { %v414_v41 = vpop.f32.mrb[0].mxu0 }
 0x1d5   :  { %v415_v42 = vadd.f32 %v1336_v40, %v414_v41  ;;  %v416_v43 = vpop.f32.mrb[1].mxu0 }
 0x1d6   :  { %v417_v44 = vpop.f32.mrb[2].mxu0 }
 0x1d7   :  { %v429_v45 = vmax.f32 %v415_v42, 0.0  ;;  %v418_v46 = vadd.f32 %v1336_v40, %v417_v44  ;;  %v419_v47 = vpop.f32.mrb[3].mxu0 }
 0x1d9   :  { %v430_v48 = vmax.f32 %v418_v46, 0.0  ;;  %v482_v49 = vrot.slane %v429_v45, 7  ;;  %v494_v50 = vrot.slane %v429_v45, 1 }
 0x1db   :  { %v483_v51 = vrot.slane %v430_v48, 7  ;;  %v495_v52 = vrot.slane %v430_v48, 1  ;;  %v507_v53 = vpack.c.bf16 %v430_v48, %v429_v45 }
 0x1dc   :  { %v422_v54 = vpop.f32.mrb[4].mxu0 }
 0x1dd   :  { %v423_v55 = vadd.f32 %v1336_v40, %v422_v54  ;;  %v424_v56 = vpop.f32.mrb[5].mxu0  ;;  %694 = vmatprep.mubr.bf16.mxu1 %v507_v53  ;;  %v488_v57 = vsel %vm245_vm1, %v482_v49, %v483_v51  ;;  %v500_v58 = vsel %vm262_vm0, %v494_v50, %v495_v52 }
 0x1de   :  { %v425_v59 = vpop.f32.mrb[6].mxu0 }
 0x1df   :  { %v431_v60 = vmax.f32 %v423_v55, 0.0  ;;  %v426_v61 = vadd.f32 %v1336_v40, %v425_v59  ;;  %v427_v62 = vpop.f32.mrb[7].mxu0 }
 0x1e1   :  { %v484_v63 = vrot.slane %v431_v60, 7  ;;  %v496_v0 = vrot.slane %v431_v60, 1  ;;  %v432_v5 = vmax.f32 %v426_v61, 0.0 }
 0x1e3   :  { %v485_v6 = vrot.slane %v432_v5, 7  ;;  %v497_v7 = vrot.slane %v432_v5, 1  ;;  %v510_v8 = vpack.c.bf16 %v432_v5, %v431_v60  ;;  %v487_v11 = vsel %vm245_vm1, %v483_v51, %v484_v63 }
 0x1e4   :  { %v499_v13 = vsel %vm262_vm0, %v495_v52, %v496_v0 }
 0x1e5   :  { %v498_v14 = vsel %vm262_vm0, %v496_v0, %v497_v7  ;;  %v501_v15 = vsel %vm262_vm0, %v497_v7, %v494_v50  ;;  %v489_v16 = vsel %vm245_vm1, %v485_v6, %v482_v49  ;;  %v486_v17 = vsel %vm245_vm1, %v484_v63, %v485_v6  ;;  %v1351_v50 = vld [vmem:[#allocation7] ss:$0 sm:$0xff] }
 0x1e6   :  { %v1386_v1 = vpack.c.bf16 %v501_v15, %v498_v14  ;;  %v1377_v19 = vpack.c.bf16 %v488_v57, %v489_v16  ;;  %v1380_v21 = vpack.c.bf16 %v486_v17, %v487_v11  ;;  %v1383_v22 = vpack.c.bf16 %v499_v13, %v500_v58 }
 0x1e8   :  { %1378 = vmatmul.mubr.msk.bf16.vlgmr.msra.gmra.mrb[0].mxu1 %vm1376_vm8, %v1377_v19 }
 0x1e9   :  { %1492 = vmatpush3.bf16.msra.mxu1 %v1638_v38  ;;  %702 = vmatprep.mubr.bf16.mxu1 %v510_v8 }
 0x1ea   :  { %1493 = vmatprep.subr.bf16.mxu1 %v1639_v20 }
 0x1ed   :  { %1494 = vmatpush3.bf16.msra.mxu1 %v1639_v20 }
 0x1ee   :  { %1495 = vmatprep.subr.bf16.mxu1 %v1640_v12 }
 0x1f0   :  { %1381 = vmatmul.mubr.msk.bf16.gmra.mrb[4].mxu1 %vm1379_vm9, %v1380_v21 }
 0x1f1   :  { %1496 = vmatpush3.bf16.msra.mxu1 %v1640_v12  ;;  %1507 = vmatprep.mubr.msk.bf16.mxu1 %vm1382_vm10, %v1383_v22 }
 0x1f2   :  { %1497 = vmatprep.subr.bf16.mxu1 %v1641_v23 }
 0x1f5   :  { %1498 = vmatpush3.bf16.msra.mxu1 %v1641_v23 }
 0x1f6   :  { %1499 = vmatprep.subr.bf16.mxu1 %v1642_v24 }
 0x1f9   :  { %1500 = vmatpush3.bf16.msra.mxu1 %v1642_v24 }
 0x1fa   :  { %1501 = vmatprep.subr.bf16.mxu1 %v1643_v18 }
 0x1fd   :  { %1502 = vmatpush3.bf16.msra.mxu1 %v1643_v18 }
 0x1fe   :  { %1503 = vmatprep.subr.bf16.mxu1 %v1644_v35 }
 0x201   :  { %1504 = vmatpush3.bf16.msra.mxu1 %v1644_v35 }
 0x202   :  { %1505 = vmatprep.subr.bf16.mxu1 %v1645_v25 }
 0x205   :  { %1506 = vmatpush3.bf16.msra.mxu1 %v1645_v25 }
 0x206   :  { %1531 = vmatprep.subr.bf16.mxu1 %v1850_v27 }
 0x208   :  { %1508 = vmatmul.mubr.msk.bf16.vlgmr.msra.gmra.mrb[8].mxu1 %vm1385_vm11, %v1386_v1 }
 0x209   :  { %1533 = vmatprep.mubr.msk.bf16.mxu1 %vm1851_vm12, %v1850_v27  ;;  %1532 = vmatpush3.bf16.msra.mxu1 %v900_v36  ;;  %v1658_v36 = vld [vmem:[%s2395_s9 + $0x20] sm:$0xff]  }
 0x20a   :  { %1537 = vmatprep.subr.bf16.mxu1 %v1850_v27 }
 0x2bb   :  { %v1436_v37 = vpop.f32.mrb[0].mxu1 }
 0x2bc   :  { %v1437_v38 = vpop.f32.mrb[1].mxu1 }
 0x2bd   :  { %v1438_v40 = vadd.f32 %v1437_v38, %v1436_v37  ;;  %v1439_v41 = vpop.f32.mrb[2].mxu1  ;;  %v1659_v37 = vld [vmem:[%s2395_s9 + $0x28] sm:$0xff]   ;;  %v1660_v38 = vld [vmem:[%s2395_s9 + $0x30] sm:$0xff]  }
 0x2be   :  { %v1440_v42 = vpop.f32.mrb[3].mxu1 }
 0x2bf   :  { %v1441_v43 = vadd.f32 %v1440_v42, %v1439_v41  ;;  %v697_v53 = vadd.f32 %v1438_v40, %v1351_v50  ;;  %v1661_v40 = vld [vmem:[%s2395_s9 + $0x38] sm:$0xff]   ;;  %v1053_v41 = vld [vmem:[#allocation10] sm:$0xf] }
 0x2c0   :  { %v1059_v42 = vsel %vm898_vm13, %v1053_v41, 0 }
 0x2c1   :  { %v700_v59 = vadd.f32 %v1441_v43, %v1351_v50  ;;  %v1662_v43 = vld [vmem:[%s2397_s11] sm:$0xff]  }
 0x2c3   :  { %v1442_v44 = vpop.f32.mrb[4].mxu1 }
 0x2c4   :  { %v1443_v45 = vpop.f32.mrb[5].mxu1 }
 0x2c5   :  { %v1444_v46 = vadd.f32 %v1443_v45, %v1442_v44  ;;  %v1445_v47 = vpop.f32.mrb[6].mxu1  ;;  %v1663_v44 = vld [vmem:[%s2397_s11 + $0x8] sm:$0xff]   ;;  %v1664_v45 = vld [vmem:[%s2397_s11 + $0x10] sm:$0xff]  }
 0x2c6   :  { %v1446_v48 = vpop.f32.mrb[7].mxu1 }
 0x2c7   :  { %v1447_v49 = vadd.f32 %v1446_v48, %v1445_v47  ;;  %v705_v51 = vadd.f32 %v1444_v46, %v1351_v50 }
 0x2c9   :  { %v708_v56 = vadd.f32 %v1447_v49, %v1351_v50 }
 0x2db   :  { %v1509_v52 = vpop.f32.mrb[8].mxu1 }
 0x2dc   :  { %v2281_v54 = vadd.f32 %v1509_v52, %v705_v51  ;;  %v745_v55 = vpop.f32.mrb[9].mxu1 }
 0x2dd   :  { %v2283_v57 = vadd.f32 %v745_v55, %v697_v53  ;;  %v1510_v58 = vpop.f32.mrb[10].mxu1 }
 0x2de   :  { %v2285_v60 = vadd.f32 %v1510_v58, %v708_v56  ;;  %v748_v61 = vpop.f32.mrb[11].mxu1  ;;  %v1665_v58 = vld [vmem:[%s2397_s11 + $0x18] sm:$0xff]  }
 0x2df   :  { %v2287_v62 = vadd.f32 %v748_v61, %v700_v59 }
 0x2e0   :  { %v767_v63 = vadd.f32 %v2285_v60, %v2281_v54 }
 0x2e1   :  { %v760_v0 = vadd.f32 %v2287_v62, %v2283_v57 }
 0x2e2   :  { %v768_v5 = vrot.slane %v767_v63, 4 }
 0x2e3   :  { %v761_v6 = vrot.slane %v760_v0, 4 }
 0x2e4   :  { %v769_v7 = vadd.f32 %v768_v5, %v767_v63  ;;  %v1193_v5 = vpack.c.bf16 %v2023_v4, %v2018_v3  ;;  %v1669_v3 = vld [vmem:[%s2398_s12 + $0x18] sm:$0xff]   ;;  %v1194_v4 = vpack.c.bf16 %v2035_v10, %v2030_v9 }
 0x2e5   :  { %v762_v8 = vadd.f32 %v761_v6, %v760_v0 }
 0x2e6   :  { %v770_v11 = vrot.slane %v769_v7, 2 }
 0x2e7   :  { %v763_v13 = vrot.slane %v762_v8, 2 }
 0x2e8   :  { %v771_v14 = vadd.f32 %v770_v11, %v769_v7  ;;  %v1668_v11 = vld [vmem:[%s2398_s12 + $0x10] sm:$0xff]  }
 0x2e9   :  { %v764_v15 = vadd.f32 %v763_v13, %v762_v8  ;;  %v1667_v8 = vld [vmem:[%s2398_s12 + $0x8] sm:$0xff]  }
 0x2ea   :  { %v772_v16 = vrot.slane %v771_v14, 1 }
 0x2eb   :  { %v765_v17 = vrot.slane %v764_v15, 1 }
 0x2ec   :  { %v773_v1 = vadd.f32 %v772_v16, %v771_v14 }
 0x2ed   :  { %v766_v19 = vadd.f32 %v765_v17, %v764_v15 }
 0x2ee   :  { %v776_v20 = vmul.f32 0.0625, %v773_v1 }
 0x2ef   :  { %v775_v21 = vmul.f32 0.0625, %v766_v19 }
 0x2f0   :  { %v794_v22 = vpack.c.bf16 %v776_v20, %v776_v20 }
 0x2f1   :  { %v793_v12 = vpack.c.bf16 %v775_v21, %v775_v21 }
 0x2f2   :  { %v798_v23 = vunpack.c.l.b16 %v794_v22 }
 0x2f3   :  { %v797_v24 = vunpack.c.l.b16 %v793_v12 }
 0x2f5   :  { %v800_v18 = vsel %vm799_vm14, %v798_v23, %v797_v24  ;;  %v1852_v23 = vmov 1966171168  }
 0x2f6   :  { %v801_v35 = vpack.c.b16 %v800_v18, %v800_v18  ;;  %v1283_v9 = vunpack.c.l.s4 %v1852_v23 }
 0x2f8   :  { %1528 = vmatmul.mubr.bf16.vlgmr.msra.gmra.mrb[8].mxu0 %v801_v35 }
 0x2f9   :  { %1571 = vmatprep.mubr.msk.bf16.mxu0 %vm1851_vm12, %v1850_v27  ;;  %1564 = vmatpush3.bf16.msra.mxu0 %v1662_v43 }
 0x2fa   :  { %1565 = vmatprep.subr.bf16.mxu0 %v1850_v27 }
 0x2fd   :  { %1566 = vmatpush3.bf16.msra.mxu0 %v1663_v44 }
 0x2fe   :  { %1567 = vmatprep.subr.bf16.mxu0 %v1850_v27 }
 0x301   :  { %1568 = vmatpush3.bf16.msra.mxu0 %v1664_v45 }
 0x302   :  { %1569 = vmatprep.subr.bf16.mxu0 %v1850_v27 }
 0x305   :  { %1570 = vmatpush3.bf16.msra.mxu0 %v1665_v58 }
 0x3cb   :  { %v885_v25 = vpop.f32.mrb[8].mxu0 }
 0x3cc   :  { %v891_v26 = vmax.f32 %v885_v25, 0.0  ;;  %v1529_v28 = vpop.f32.mrb[9].mxu0 }
 0x3cd   :  { %v888_v39 = vpop.f32.mrb[10].mxu0 }
 0x3ce   :  { %v893_v30 = vpack.c.bf16 %v891_v26, %v891_v26  ;;  %v1530_v31 = vpop.f32.mrb[11].mxu0 }
 0x3cf   :  { %v1413_v31 = vld [vmem:[#allocation12] ss:$0 sm:$0xff] }
 0x3d0   :  { %1534 = vmatmul.mubr.msk.bf16.vlgmr.msra.gmra.mrb[12].mxu1 %vm894_vm15, %v893_v30  ;;  %v1306_v30 = vsub.s32 0, %v2013_v2 }
 0x3d1   :  { %1538 = vmatpush3.bf16.msra.mxu1 %v1654_v29  ;;  %1553 = vmatprep.mubr.msk.bf16.mxu1 %vm1851_vm12, %v1850_v27 }
 0x3d2   :  { %1539 = vmatprep.subr.bf16.mxu1 %v1850_v27 }
 0x3d5   :  { %1540 = vmatpush3.bf16.msra.mxu1 %v1655_v32 }
 0x3d6   :  { %1541 = vmatprep.subr.bf16.mxu1 %v1850_v27 }
 0x3d9   :  { %1542 = vmatpush3.bf16.msra.mxu1 %v1656_v33 }
 0x3da   :  { %1543 = vmatprep.subr.bf16.mxu1 %v1850_v27 }
 0x3dd   :  { %1544 = vmatpush3.bf16.msra.mxu1 %v1657_v34 }
 0x3de   :  { %1545 = vmatprep.subr.bf16.mxu1 %v1850_v27 }
 0x3e1   :  { %1546 = vmatpush3.bf16.msra.mxu1 %v1658_v36 }
 0x3e2   :  { %1547 = vmatprep.subr.bf16.mxu1 %v1850_v27 }
 0x3e5   :  { %1548 = vmatpush3.bf16.msra.mxu1 %v1659_v37 }
 0x3e6   :  { %1549 = vmatprep.subr.bf16.mxu1 %v1850_v27 }
 0x3e9   :  { %1550 = vmatpush3.bf16.msra.mxu1 %v1660_v38 }
 0x3ea   :  { %1551 = vmatprep.subr.bf16.mxu1 %v1850_v27 }
 0x3ed   :  { %1552 = vmatpush3.bf16.msra.mxu1 %v1661_v40 }
 0x3ee   :  { %1557 = vmatprep.subr.bf16.mxu1 %v1850_v27 }
 0x3f0   :  { %1554 = vmatmul.mubr.bf16.vlgmr.msra.gmra.mrb[16].mxu1 %v801_v35  ;;  %v1284_v35 = vunpack.c.0.s8 %v1283_v9 }
 0x3f1   :  { %1559 = vmatprep.mubr.msk.bf16.mxu1 %vm1851_vm12, %v1850_v27  ;;  %1558 = vmatpush3.bf16.msra.mxu1 %v1059_v42  ;;  %v1666_v27 = vld [vmem:[%s2398_s12] sm:$0xff]  }
 0x3f2   :  { %1575 = vmatprep.subr.bf16.mxu0 %v1666_v27  ;;  %v1287_v26 = vsub.s32 %v1284_v35, %v2013_v2 }
 0x4a3   :  { %v936_v46 = vpop.f32.mrb[12].mxu1 }
 0x4a4   :  { %v1535_v47 = vpop.f32.mrb[13].mxu1  ;;  %v1397_v13 = vmul.f32 -1.442695, %v936_v46 }
 0x4a5   :  { %v939_v48 = vpop.f32.mrb[14].mxu1 }
 0x4a6   :  { %v1536_v49 = vpop.f32.mrb[15].mxu1  ;;  %1670 = vpow2.f32 %v1397_v13 }
 0x4b0   :  { %v1671_v19 = vpop.eup %1670 }
 0x4b1   :  { %v945_v20 = vadd.f32 1.0, %v1671_v19 }
 0x4c3   :  { %v1046_v50 = vpop.f32.mrb[16].mxu1 }
 0x4c4   :  { %v1052_v51 = vmax.f32 %v1046_v50, 0.0  ;;  %v1555_v52 = vpop.f32.mrb[17].mxu1 }
 0x4c5   :  { %v1049_v53 = vpop.f32.mrb[18].mxu1 }
 0x4c6   :  { %v1054_v55 = vpack.c.bf16 %v1052_v51, %v1052_v51  ;;  %v1556_v56 = vpop.f32.mrb[19].mxu1 }
 0x4c8   :  { %1560 = vmatmul.mubr.msk.bf16.vlgmr.msra.gmra.mrb[20].mxu1 %vm894_vm15, %v1054_v55 }
 0x59b   :  { %v1095_v59 = vpop.f32.mrb[20].mxu1 }
 0x59c   :  { %v1101_v61 = vmax.f32 %v1095_v59, 0.0  ;;  %v1561_v63 = vpop.f32.mrb[21].mxu1 }
 0x59d   :  { %v1098_v0 = vpop.f32.mrb[22].mxu1 }
 0x59e   :  { %v1110_v6 = vpack.c.bf16 %v1101_v61, %v1101_v61  ;;  %v1562_v7 = vpop.f32.mrb[23].mxu1 }
 0x5a0   :  { %1572 = vmatmul.mubr.msk.bf16.vlgmr.msra.gmra.mrb[12].mxu0 %vm287_vm4, %v1110_v6 }
 0x5a1   :  { %1576 = vmatpush3.bf16.msra.mxu0 %v1666_v27  ;;  %1583 = vmatprep.mubr.msk.bf16.mxu0 %vm287_vm4, %v1193_v5 }
 0x5a2   :  { %1577 = vmatprep.subr.bf16.mxu0 %v1667_v8 }
 0x5a5   :  { %1578 = vmatpush3.bf16.msra.mxu0 %v1667_v8 }
 0x5a6   :  { %1579 = vmatprep.subr.bf16.mxu0 %v1668_v11 }
 0x5a9   :  { %1580 = vmatpush3.bf16.msra.mxu0 %v1668_v11 }
 0x5aa   :  { %1581 = vmatprep.subr.bf16.mxu0 %v1669_v3 }
 0x5ad   :  { %1582 = vmatpush3.bf16.msra.mxu0 %v1669_v3 }
 0x5b0   :  { %1584 = vmatmul.mubr.msk.bf16.vlgmr.msra.gmra.mrb[16].mxu0 %vm287_vm4, %v1194_v4 }
 0x673   :  { %v1172_v14 = vpop.f32.mrb[12].mxu0 }
 0x674   :  { %v1412_v15 = vmul.f32 -1.442695, %v1172_v14  ;;  %v1573_v16 = vpop.f32.mrb[13].mxu0 }
 0x675   :  { %v1175_v17 = vpop.f32.mrb[14].mxu0 }
 0x676   :  { %1672 = vpow2.f32 %v1412_v15  ;;  %v1574_v1 = vpop.f32.mrb[15].mxu0 }
 0x677   :  { %1674 = vrcp.f32 %v945_v20 }
 0x680   :  { %v1673_v21 = vpop.eup %1672 }
 0x681   :  { %v1181_v22 = vadd.f32 1.0, %v1673_v21  ;;  %v1675_v25 = vpop.eup %1674 }
 0x683   :  { %1676 = vrcp.f32 %v1181_v22  ;;  %v1585_v12 = vpop.f32.mrb[16].mxu0 }
 0x684   :  { %v1266_v10 = vpop.f32.mrb[17].mxu0  ;;  %v1275_v43 = vadd.f32 %v1585_v12, %v1413_v31 }
 0x685   :  { %v1586_v24 = vpop.f32.mrb[18].mxu0  ;;  %v1267_v36 = vadd.f32 %v1413_v31, %v1266_v10 }
 0x686   :  { %v1269_v18 = vpop.f32.mrb[19].mxu0  ;;  %v1278_v44 = vadd.f32 %v1586_v24, %v1413_v31 }
 0x687   :  { %v1270_v38 = vadd.f32 %v1413_v31, %v1269_v18 }
 0x68d   :  { %v1677_v28 = vpop.eup %1676 }
 0x68e   :  { %v1184_v39 = vadd.f32 %v1677_v28, %v1675_v25 }
 0x690   :  { %v1288_v29 = vrot.slane %v1184_v39, %v1287_v26 }
 0x692   :  { %v1289_v32 = vcombine.high %v1288_v29, %v1288_v29  ;;  %v1296_v33 = vrot.slane %v1288_v29, %v1287_v26 }
 0x694   :  { %v1303_v34 = vrot.slane %v1289_v32, %v1287_v26  ;;  %v1307_v37 = vrot.slane %v1296_v33, %v1306_v30 }
 0x696   :  { %v1311_v40 = vrot.slane %v1303_v34, %v1306_v30  ;;  %v1314_v41 = vmul.f32 %v1307_v37, %v2283_v57  ;;  %v1315_v42 = vmul.f32 %v1307_v37, %v2287_v62 }
 0x698   :  { %v1316_v45 = vmul.f32 %v1311_v40, %v2281_v54  ;;  %v1318_v46 = vadd.f32 %v1314_v41, %v1267_v36  ;;  %v1317_v47 = vmul.f32 %v1311_v40, %v2285_v60  ;;  %v1319_v2 = vadd.f32 %v1315_v42, %v1270_v38 }
 0x69a   :  { %v1320_v48 = vadd.f32 %v1316_v45, %v1275_v43  ;;  %1322 = vst [vmem:[%s2400_s14] sm:$0xff] %v1318_v46  ;;  %v1321_v49 = vadd.f32 %v1317_v47, %v1278_v44  ;;  %1323 = vst [vmem:[%s2400_s14 + $0x8] sm:$0xff] %v1319_v2 }
 0x69c   :  { %1324 = vst [vmem:[%s2400_s14 + $0x10] sm:$0xff] %v1320_v48  ;;  %1325 = vst [vmem:[%s2400_s14 + $0x18] sm:$0xff] %v1321_v49 }
 0x69d   :  { %1330 = vsyncpa [#allocation3], 1 }
 0x69e   :  { %1331 = vsyncpa [#allocation5], 1 }
 0x69f   :  { %1332 = vsyncpa [#allocation8], 1 }
 0x6a0   :  { %1333 = vsyncpa [#allocation11], 1 }

// kernel: resnet_bigru_forward.9
= control target key start
LH: loop header
LB: loop body
LE: loop exit
PB: predicated region body
PF: predicated region fallthrough
CT: control target
= control target key end

     0   :  { %s1172_s0 = inlined_call_operand.vmem [shape: f32[2,256], index: 0, kind: input, shape index: {}]   ;;  %s1173_s1 = inlined_call_operand.vmem [shape: bf16[256,256], index: 1, kind: input, shape index: {}]   ;;  %s1174_s2 = inlined_call_operand.vmem [shape: f32[1,256], index: 2, kind: input, shape index: {}]   ;;  %s1175_s3 = inlined_call_operand.vmem [shape: bf16[256,192], index: 3, kind: input, shape index: {}]   ;;  %s1176_s4 = inlined_call_operand.vmem [shape: f32[1,192], index: 4, kind: input, shape index: {}]   ;;  %s1177_s5 = inlined_call_operand.vmem [shape: f32[1,64], index: 5, kind: input, shape index: {}]   ;;  %s1178_s6 = inlined_call_operand.vmem [shape: bf16[64,5], index: 6, kind: input, shape index: {}]   ;;  %s1179_s7 = inlined_call_operand.vmem [shape: f32[1,5], index: 7, kind: input, shape index: {}]   ;;  %s1180_s8 = inlined_call_operand.hbm [shape: f32[2,5], index: 8, kind: output, shape index: {}]  }
   0x1   :  { %v756_v0 = vld [vmem:[%s1173_s1 + $0x4] ss:$8 sps:$4 sm:$0xff]   ;;  %v758_v1 = vld [vmem:[%s1173_s1] ss:$8 sps:$4 sm:$0xff]   ;;  %v759_v2 = vld [vmem:[%s1173_s1 + $0x14] ss:$8 sps:$4 sm:$0xff]  }
   0x2   :  { %249 = vmatprep.subr.bf16.mxu0 %v756_v0  ;;  %v761_v3 = vld [vmem:[%s1173_s1 + $0x10] ss:$8 sps:$4 sm:$0xff]   ;;  %v762_v4 = vld [vmem:[%s1173_s1 + $0x24] ss:$8 sps:$4 sm:$0xff]   ;;  %v764_v5 = vld [vmem:[%s1173_s1 + $0x20] ss:$8 sps:$4 sm:$0xff]  }
   0x3   :  { %250 = vmatpush1.bf16.msra.mxu0 %v758_v1  ;;  %v765_v6 = vld [vmem:[%s1173_s1 + $0x34] ss:$8 sps:$4 sm:$0xff]   ;;  %v767_v7 = vld [vmem:[%s1173_s1 + $0x30] ss:$8 sps:$4 sm:$0xff]   ;;  %v768_v8 = vld [vmem:[%s1173_s1 + $0x44] ss:$8 sps:$4 sm:$0xff]  }
   0x4   :  { %251 = vmatprep.subr.bf16.mxu0 %v759_v2  ;;  %v770_v9 = vld [vmem:[%s1173_s1 + $0x40] ss:$8 sps:$4 sm:$0xff]   ;;  %v771_v10 = vld [vmem:[%s1173_s1 + $0x54] ss:$8 sps:$4 sm:$0xff]   ;;  %v773_v11 = vld [vmem:[%s1173_s1 + $0x50] ss:$8 sps:$4 sm:$0xff]  }
   0x5   :  { %v774_v12 = vld [vmem:[%s1173_s1 + $0x64] ss:$8 sps:$4 sm:$0xff]   ;;  %v776_v13 = vld [vmem:[%s1173_s1 + $0x60] ss:$8 sps:$4 sm:$0xff]   ;;  %v777_v18 = vld [vmem:[%s1173_s1 + $0x74] ss:$8 sps:$4 sm:$0xff]  }
   0x6   :  { %v980_v14 = vld.sshfl [vmem:[%s1172_s0] sm:$0x33 pattern:$0x76325410]  ;;  %v804_v16 = vld [vmem:[%s1175_s3 + $0x4] ss:$8 sps:$4 sm:$0xff]  }
   0x7   :  { %252 = vmatpush1.bf16.msra.mxu0 %v761_v3  ;;  %v72_v15 = vcombine.high %v980_v14, %v980_v14  ;;  %v806_v17 = vld [vmem:[%s1175_s3] ss:$8 sps:$4 sm:$0xff]   ;;  %496 = vmatprep.subr.bf16.mxu1 %v804_v16  ;;  %v807_v20 = vld [vmem:[%s1175_s3 + $0x14] ss:$8 sps:$4 sm:$0xff]   ;;  %v809_v21 = vld [vmem:[%s1175_s3 + $0x10] ss:$8 sps:$4 sm:$0xff]  }
   0x8   :  { %253 = vmatprep.subr.bf16.mxu0 %v762_v4  ;;  %497 = vmatpush1.bf16.msra.mxu1 %v806_v17  ;;  %v810_v22 = vld [vmem:[%s1175_s3 + $0x24] ss:$8 sps:$4 sm:$0xff]   ;;  %v779_v23 = vld [vmem:[%s1173_s1 + $0x70] ss:$8 sps:$4 sm:$0xff]   ;;  %v812_v25 = vld [vmem:[%s1175_s3 + $0x20] ss:$8 sps:$4 sm:$0xff]  }
   0x9   :  { %v76_v19 = vpack.c.bf16 %v72_v15, %v72_v15  ;;  %498 = vmatprep.subr.bf16.mxu1 %v807_v20  ;;  %v780_v24 = vld [vmem:[%s1173_s1 + $0x84] ss:$8 sps:$4 sm:$0xff]   ;;  %v813_v26 = vld [vmem:[%s1175_s3 + $0x34] ss:$8 sps:$4 sm:$0xff]   ;;  %v782_v27 = vld [vmem:[%s1173_s1 + $0x80] ss:$8 sps:$4 sm:$0xff]  }
   0xa   :  { %v783_v28 = vld [vmem:[%s1173_s1 + $0x94] ss:$8 sps:$4 sm:$0xff]   ;;  %v815_v29 = vld [vmem:[%s1175_s3 + $0x30] ss:$8 sps:$4 sm:$0xff]   ;;  %v816_v30 = vld [vmem:[%s1175_s3 + $0x44] ss:$8 sps:$4 sm:$0xff]  }
   0xb   :  { %254 = vmatpush1.bf16.msra.mxu0 %v764_v5  ;;  %281 = vmatprep.mubr.bf16.mxu0 %v76_v19  ;;  %v785_v31 = vld [vmem:[%s1173_s1 + $0x90] ss:$8 sps:$4 sm:$0xff]   ;;  %v786_v32 = vld [vmem:[%s1173_s1 + $0xa4] ss:$8 sps:$4 sm:$0xff]   ;;  %v818_v33 = vld [vmem:[%s1175_s3 + $0x40] ss:$8 sps:$4 sm:$0xff]  }
   0xc   :  { %255 = vmatprep.subr.bf16.mxu0 %v765_v6  ;;  %499 = vmatpush1.bf16.msra.mxu1 %v809_v21  ;;  %v819_v34 = vld [vmem:[%s1175_s3 + $0x54] ss:$8 sps:$4 sm:$0xff]   ;;  %v788_v35 = vld [vmem:[%s1173_s1 + $0xa0] ss:$8 sps:$4 sm:$0xff]   ;;  %v791_v37 = vld [vmem:[%s1173_s1 + $0xb0] ss:$8 sps:$4 sm:$0xff]  }
   0xd   :  { %500 = vmatprep.subr.bf16.mxu1 %v810_v22  ;;  %v789_v36 = vld [vmem:[%s1173_s1 + $0xb4] ss:$8 sps:$4 sm:$0xff]   ;;  %v821_v38 = vld [vmem:[%s1175_s3 + $0x50] ss:$8 sps:$4 sm:$0xff]   ;;  %v822_v39 = vld [vmem:[%s1175_s3 + $0x64] ss:$8 sps:$4 sm:$0xff]  }
   0xe   :  { %v792_v40 = vld [vmem:[%s1173_s1 + $0xc4] ss:$8 sps:$4 sm:$0xff]   ;;  %v824_v41 = vld [vmem:[%s1175_s3 + $0x60] ss:$8 sps:$4 sm:$0xff]  }
   0xf   :  { %256 = vmatpush1.bf16.msra.mxu0 %v767_v7 }
  0x10   :  { %257 = vmatprep.subr.bf16.mxu0 %v768_v8  ;;  %501 = vmatpush1.bf16.msra.mxu1 %v812_v25 }
  0x11   :  { %502 = vmatprep.subr.bf16.mxu1 %v813_v26 }
  0x13   :  { %258 = vmatpush1.bf16.msra.mxu0 %v770_v9 }
  0x14   :  { %259 = vmatprep.subr.bf16.mxu0 %v771_v10  ;;  %503 = vmatpush1.bf16.msra.mxu1 %v815_v29 }
  0x15   :  { %504 = vmatprep.subr.bf16.mxu1 %v816_v30 }
  0x17   :  { %260 = vmatpush1.bf16.msra.mxu0 %v773_v11 }
  0x18   :  { %261 = vmatprep.subr.bf16.mxu0 %v774_v12  ;;  %505 = vmatpush1.bf16.msra.mxu1 %v818_v33 }
  0x19   :  { %506 = vmatprep.subr.bf16.mxu1 %v819_v34 }
  0x1b   :  { %262 = vmatpush1.bf16.msra.mxu0 %v776_v13 }
  0x1c   :  { %263 = vmatprep.subr.bf16.mxu0 %v777_v18  ;;  %507 = vmatpush1.bf16.msra.mxu1 %v821_v38 }
  0x1f   :  { %264 = vmatpush1.bf16.msra.mxu0 %v779_v23 }
  0x20   :  { %265 = vmatprep.subr.bf16.mxu0 %v780_v24 }
  0x23   :  { %266 = vmatpush1.bf16.msra.mxu0 %v782_v27 }
  0x24   :  { %267 = vmatprep.subr.bf16.mxu0 %v783_v28 }
  0x27   :  { %268 = vmatpush1.bf16.msra.mxu0 %v785_v31 }
  0x28   :  { %269 = vmatprep.subr.bf16.mxu0 %v786_v32 }
  0x2b   :  { %270 = vmatpush1.bf16.msra.mxu0 %v788_v35 }
  0x2c   :  { %271 = vmatprep.subr.bf16.mxu0 %v789_v36 }
  0x2d   :  { %13 = vsyncpa [#allocation3], 0  ;;  %508 = vmatprep.subr.bf16.mxu1 %v822_v39  ;;  %v825_v42 = vld [vmem:[%s1175_s3 + $0x74] ss:$8 sps:$4 sm:$0xff]   ;;  %v794_v43 = vld [vmem:[%s1173_s1 + $0xc0] ss:$8 sps:$4 sm:$0xff]   ;;  %v75_v57 = vpack.c.bf16 %v980_v14, %v980_v14  ;;  %v79_v4 = vlaneseq }
  0x2e   :  { %v795_v44 = vld [vmem:[%s1173_s1 + $0xd4] ss:$8 sps:$4 sm:$0xff]   ;;  %509 = vmatpush1.bf16.msra.mxu1 %v824_v41  ;;  %v827_v45 = vld [vmem:[%s1175_s3 + $0x70] ss:$8 sps:$4 sm:$0xff]   ;;  %v828_v46 = vld [vmem:[%s1175_s3 + $0x84] ss:$8 sps:$4 sm:$0xff]  }
  0x2f   :  { %272 = vmatpush1.bf16.msra.mxu0 %v791_v37  ;;  %510 = vmatprep.subr.bf16.mxu1 %v825_v42  ;;  %v797_v47 = vld [vmem:[%s1173_s1 + $0xd0] ss:$8 sps:$4 sm:$0xff]   ;;  %v798_v48 = vld [vmem:[%s1173_s1 + $0xe4] ss:$8 sps:$4 sm:$0xff]   ;;  %v830_v49 = vld [vmem:[%s1175_s3 + $0x80] ss:$8 sps:$4 sm:$0xff]  }
  0x30   :  { %273 = vmatprep.subr.bf16.mxu0 %v792_v40  ;;  %v831_v50 = vld [vmem:[%s1175_s3 + $0x94] ss:$8 sps:$4 sm:$0xff]   ;;  %v800_v51 = vld [vmem:[%s1173_s1 + $0xe0] ss:$8 sps:$4 sm:$0xff]   ;;  %v833_v53 = vld [vmem:[%s1175_s3 + $0x90] ss:$8 sps:$4 sm:$0xff]  }
  0x31   :  { %v801_v52 = vld [vmem:[%s1173_s1 + $0xf4] ss:$8 sps:$4 sm:$0xff]   ;;  %v834_v54 = vld [vmem:[%s1175_s3 + $0xa4] ss:$8 sps:$4 sm:$0xff]   ;;  %v803_v55 = vld [vmem:[%s1173_s1 + $0xf0] ss:$8 sps:$4 sm:$0xff]  }
  0x32   :  { %511 = vmatpush1.bf16.msra.mxu1 %v827_v45  ;;  %v836_v56 = vld [vmem:[%s1175_s3 + $0xa0] ss:$8 sps:$4 sm:$0xff]   ;;  %v837_v58 = vld [vmem:[%s1175_s3 + $0xb4] ss:$8 sps:$4 sm:$0xff]   ;;  %v839_v59 = vld [vmem:[%s1175_s3 + $0xb0] ss:$8 sps:$4 sm:$0xff]  }
  0x33   :  { %274 = vmatpush1.bf16.msra.mxu0 %v794_v43  ;;  %512 = vmatprep.subr.bf16.mxu1 %v828_v46  ;;  %v840_v60 = vld [vmem:[%s1175_s3 + $0xc4] ss:$8 sps:$4 sm:$0xff]   ;;  %v842_v61 = vld [vmem:[%s1175_s3 + $0xc0] ss:$8 sps:$4 sm:$0xff]   ;;  %v843_v62 = vld [vmem:[%s1175_s3 + $0xd4] ss:$8 sps:$4 sm:$0xff]  }
  0x34   :  { %275 = vmatprep.subr.bf16.mxu0 %v795_v44  ;;  %v845_v63 = vld [vmem:[%s1175_s3 + $0xd0] ss:$8 sps:$4 sm:$0xff]   ;;  %v846_v0 = vld [vmem:[%s1175_s3 + $0xe4] ss:$8 sps:$4 sm:$0xff]   ;;  %v848_v1 = vld [vmem:[%s1175_s3 + $0xe0] ss:$8 sps:$4 sm:$0xff]  }
  0x35   :  { %v849_v2 = vld [vmem:[%s1175_s3 + $0xf4] ss:$8 sps:$4 sm:$0xff]   ;;  %v851_v3 = vld [vmem:[%s1175_s3 + $0xf0] ss:$8 sps:$4 sm:$0xff]   ;;  %v80_v5 = vshrl.u32 %v79_v4, 7  ;;  %v852_v35 = vld [vmem:[%s1178_s6] sm:$0xff]  }
  0x36   :  { %513 = vmatpush1.bf16.msra.mxu1 %v830_v49  ;;  %v77_v7 = vld [vmem:[%s1174_s2] sm:$0x3]  ;;  %v886_v36 = vmov 0.0   ;;  %vm887_vm0 = vmmov 0   ;;  %v853_v37 = vld [vmem:[%s1178_s6 + $0x8] sm:$0xff]   ;;  %v854_v38 = vld [vmem:[%s1178_s6 + $0x10] sm:$0xff]  }
  0x37   :  { %276 = vmatpush1.bf16.msra.mxu0 %v797_v47  ;;  %514 = vmatprep.subr.bf16.mxu1 %v831_v50  ;;  %v81_v6 = vsub.s32 0, %v80_v5  ;;  %v85_v8 = vsub.s32 1, %v80_v5  ;;  %v324_v19 = vld [vmem:[%s1176_s4] sm:$0x3]  ;;  %s888_s1 = smov 64   ;;  %v855_v40 = vld [vmem:[%s1178_s6 + $0x18] sm:$0xff]  }
  0x38   :  { %277 = vmatprep.subr.bf16.mxu0 %v798_v48  ;;  %v728_v30 = vld [vmem:[%s1177_s5] ss:$0 sm:$0xff]  ;;  %vm602_vm1 = vcmask 523264   ;;  %s889_s9 = smov [#allocation2]   ;;  %vm646_vm2 = vcmask 33792  }
  0x39   :  { %v82_v9 = vrot.slane %v77_v7, %v81_v6  ;;  %v86_v10 = vrot.slane %v77_v7, %v85_v8  ;;  %v329_v20 = vrot.slane %v324_v19, %v81_v6  ;;  %v333_v29 = vrot.slane %v324_v19, %v85_v8  ;;  %v729_v46 = vld [vmem:[%s1179_s7] ss:$0 sm:$0xff]  ;;  %s654_s10 = sshll.u32 %s889_s9, 4  ;;  %s655_s10 = int_to_ptr.vmem [resolvable:$true] %s654_s10 }
  0x3a   :  { %515 = vmatpush1.bf16.msra.mxu1 %v833_v53  ;;  %s862_s6 = scalar_lea.vmem %s655_s10, 32  ;;  %p867_p1 = scmp.lt.s32.totalorder %s655_s10, %s655_s10 }
  0x3b   :  { %278 = vmatpush1.bf16.msra.mxu0 %v800_v51  ;;  %516 = vmatprep.subr.bf16.mxu1 %v834_v54  ;;  %p863_p0 = scmp.ne.s32.totalorder %s655_s10, %s862_s6  ;;  %p868_p2 = scmp.lt.s32.totalorder %s862_s6, %s862_s6 }
  0x3c   :  { %279 = vmatprep.subr.bf16.mxu0 %v801_v52 }
  0x3d   :  { %p869_p3 = por %p868_p2, %p867_p1 }
  0x3e   :  { %517 = vmatpush1.bf16.msra.mxu1 %v836_v56 }
  0x3f   :  { %280 = vmatpush1.bf16.msra.mxu0 %v803_v55  ;;  %518 = vmatprep.subr.bf16.mxu1 %v837_v58  ;;  %p870_p4 = pnand %p869_p3, %p863_p0 }
  0x40   :  { %740 = vmatprep.subr.bf16.mxu0 %v886_v36 }
  0x42   :  { %282 = vmatmul.mubr.bf16.vlgmr.msra.gmra.mrb[0].mxu0 %v75_v57  ;;  %519 = vmatpush1.bf16.msra.mxu1 %v839_v59 }
  0x43   :  { %520 = vmatprep.subr.bf16.mxu1 %v840_v60  ;;  %748 = vmatprep.mubr.msk.bf16.mxu0 %vm887_vm0, %v886_v36 }
  0x44   :  { %741 = vmatpush3.bf16.msra.mxu0 %v852_v35 }
  0x45   :  { %742 = vmatprep.subr.bf16.mxu0 %v886_v36 }
  0x46   :  { %521 = vmatpush1.bf16.msra.mxu1 %v842_v61 }
  0x47   :  { %522 = vmatprep.subr.bf16.mxu1 %v843_v62 }
  0x48   :  { %743 = vmatpush3.bf16.msra.mxu0 %v853_v37 }
  0x49   :  { %744 = vmatprep.subr.bf16.mxu0 %v886_v36 }
  0x4a   :  { %523 = vmatpush1.bf16.msra.mxu1 %v845_v63 }
  0x4b   :  { %524 = vmatprep.subr.bf16.mxu1 %v846_v0 }
  0x4c   :  { %745 = vmatpush3.bf16.msra.mxu0 %v854_v38 }
  0x4d   :  { %746 = vmatprep.subr.bf16.mxu0 %v886_v36 }
  0x4e   :  { %525 = vmatpush1.bf16.msra.mxu1 %v848_v1 }
  0x4f   :  { %526 = vmatprep.subr.bf16.mxu1 %v849_v2 }
  0x50   :  { %747 = vmatpush3.bf16.msra.mxu0 %v855_v40 }
  0x52   :  { %527 = vmatpush1.bf16.msra.mxu1 %v851_v3 }
 0x115   :  { %v283_v11 = vpop.f32.mrb[0].mxu0 }
 0x116   :  { %v284_v12 = vadd.f32 %v283_v11, %v82_v9  ;;  %v285_v13 = vpop.f32.mrb[1].mxu0 }
 0x117   :  { %v287_v14 = vpop.f32.mrb[2].mxu0  ;;  %v286_v15 = vadd.f32 %v285_v13, %v86_v10 }
 0x118   :  { %v288_v16 = vpop.f32.mrb[3].mxu0  ;;  %v322_v18 = vpack.c.bf16 %v284_v12, %v284_v12 }
 0x119   :  { %v323_v17 = vpack.c.bf16 %v286_v15, %v286_v15 }
 0x11b   :  { %528 = vmatprep.mubr.bf16.mxu1 %v323_v17 }
 0x11c   :  { %529 = vmatmul.mubr.bf16.vlgmr.msra.gmra.mrb[0].mxu1 %v322_v18 }
 0x1ef   :  { %v530_v21 = vpop.f32.mrb[0].mxu1 }
 0x1f0   :  { %v531_v22 = vadd.f32 %v530_v21, %v329_v20  ;;  %v532_v23 = vpop.f32.mrb[1].mxu1 }
 0x1f1   :  { %v534_v24 = vpop.f32.mrb[2].mxu1  ;;  %v533_v32 = vadd.f32 %v532_v23, %v333_v29 }
 0x1f2   :  { %v727_v25 = vmul.f32 -1.442695, %v531_v22  ;;  %v535_v26 = vpop.f32.mrb[3].mxu1 }
 0x1f4   :  { %856 = vpow2.f32 %v727_v25 }
 0x1fe   :  { %v857_v27 = vpop.eup %856 }
 0x1ff   :  { %v540_v28 = vadd.f32 1.0, %v857_v27 }
 0x201   :  { %858 = vrcp.f32 %v540_v28 }
 0x20b   :  { %v859_v31 = vpop.eup %858 }
 0x20c   :  { %v550_v33 = vmul.f32 %v859_v31, %v728_v30  ;;  %v553_v41 = vsub.f32 1.0, %v859_v31 }
 0x20e   :  { %v551_v34 = vadd.f32 %v550_v33, %v533_v32 }
 0x210   :  { %860 = vtanh.f32 %v551_v34 }
 0x21a   :  { %v861_v39 = vpop.eup %860 }
 0x21b   :  { %555 = vrot.lane.b32.xlu0 %v861_v39, %s888_s1 }
 0x28d   :  { %v556_v42 = vpop.permute.xlu0 %555 }
 0x28e   :  { %v558_v43 = vmul.f32 %v556_v42, %v553_v41 }
 0x290   :  { %v567_v44 = vpack.c.bf16 %v558_v43, %v558_v43 }
 0x292   :  { %576 = vrot.lane.b32.xlu0 %v567_v44, %s888_s1 }
 0x304   :  { %v577_v45 = vpop.permute.xlu0 %576 }
 0x305   :  { %749 = vmatmul.mubr.msk.bf16.vlgmr.msra.gmra.mrb[4].mxu0 %vm602_vm1, %v577_v45 }
 0x3d8   :  { %v640_v47 = vpop.f32.mrb[4].mxu0 }
 0x3d9   :  { %v641_v48 = vadd.f32 %v729_v46, %v640_v47  ;;  %v750_v49 = vpop.f32.mrb[5].mxu0 }
 0x3da   :  { %v643_v50 = vpop.f32.mrb[6].mxu0 }
 0x3db   :  { %v751_v51 = vpop.f32.mrb[7].mxu0  ;;  %647 = vst.msk [vmem:[#allocation2] sm:$0x3] %vm646_vm2, %v641_v48 }
 0x3dc   :  { %873 = shalt.err (!%p870_p4)
}
 0x3dd   :  { %s874_s7 = scalar_lea.hbm %s1180_s8, 32 }
 0x3de   :  { %p875_p5 = scmp.ne.s32.totalorder %s1180_s8, %s874_s7  ;;  %p878_p6 = scmp.lt.u32.totalorder %s874_s7, %s1180_s8 }
 0x3e0   :  { %p880_p7 = pnand %p878_p6, %p875_p5 }
 0x3e2   :  { %883 = shalt.err (!%p880_p7)
}
 0x3e3   :  { %657 = dma.vmem_to_hbm [thread:$0]  %s655_s10, 32, %s1180_s8, [#allocation3]  }
 0x3e4   :  { %884 = dma.done.wait [#allocation3], 32  }
 0x3e5   :  { %885 = vsyncadd [#allocation3], 4294967264 }
 0x3e6   :  { %661 = vsyncpa [#allocation3], 1 }

// kernel: resnet_bigru_forward.8
= control target key start
LH: loop header
LB: loop body
LE: loop exit
PB: predicated region body
PF: predicated region fallthrough
CT: control target
= control target key end

     0   :  { %19 = vsyncpa [#allocation3], 0  ;;  %s4272_s0 = inlined_call_operand.vmem [shape: f32[32,128], index: 0, kind: input, shape index: {}]   ;;  %s4273_s1 = inlined_call_operand.vmem [shape: f32[1,128], index: 1, kind: input, shape index: {}]   ;;  %s4274_s2 = inlined_call_operand.hbm [shape: f32[1,128], index: 2, kind: input, shape index: {}]   ;;  %s4275_s3 = inlined_call_operand.vmem [shape: bf16[384,256], index: 3, kind: input, shape index: {}]   ;;  %s4276_s4 = inlined_call_operand.hbm [shape: f32[1,256], index: 4, kind: input, shape index: {}]   ;;  %s4277_s5 = inlined_call_operand.vmem [shape: bf16[768,256], index: 5, kind: input, shape index: {}]   ;;  %s4278_s6 = inlined_call_operand.hbm [shape: f32[1,256], index: 6, kind: input, shape index: {}]   ;;  %s4279_s7 = inlined_call_operand.vmem [shape: bf16[256,16], index: 7, kind: input, shape index: {}]   ;;  %s4280_s8 = inlined_call_operand.vmem [shape: bf16[16,256], index: 8, kind: input, shape index: {}]   ;;  %s4281_s9 = inlined_call_operand.vmem [shape: bf16[256,16], index: 9, kind: input, shape index: {}]   ;;  %s4282_s10 = inlined_call_operand.vmem [shape: bf16[16,128], index: 10, kind: input, shape index: {}]   ;;  %s4283_s11 = inlined_call_operand.vmem [shape: bf16[128,256], index: 11, kind: input, shape index: {}]   ;;  %s4284_s12 = inlined_call_operand.vmem [shape: bf16[128,256], index: 12, kind: input, shape index: {}]   ;;  %s4285_s13 = inlined_call_operand.hbm [shape: f32[1,256], index: 13, kind: input, shape index: {}]   ;;  %s4286_s14 = inlined_call_operand.vmem [shape: f32[2,256], index: 14, kind: output, shape index: {}]  }
   0x1   :  { %20 = vsyncpa [#allocation5], 0 }
   0x2   :  { %21 = vsyncpa [#allocation8], 0  ;;  %s3170_s29 = smov [#allocation4]   ;;  %s3171_s15 = smov [#allocation2]  }
   0x3   :  { %s44_s30 = sshll.u32 %s3170_s29, 4  ;;  %s32_s16 = sshll.u32 %s3171_s15, 4  ;;  %s45_s30 = int_to_ptr.vmem [resolvable:$true] %s44_s30  ;;  %s33_s16 = int_to_ptr.vmem [resolvable:$true] %s32_s16 }
   0x4   :  { %s3076_s19 = scalar_lea.hbm %s4276_s4, 32 }
   0x5   :  { %p3077_p0 = scmp.ne.s32.totalorder %s4276_s4, %s3076_s19  ;;  %p3080_p1 = scmp.lt.u32.totalorder %s3076_s19, %s4276_s4 }
   0x7   :  { %p3082_p2 = pnand %p3080_p1, %p3077_p0 }
   0x9   :  { %3085 = shalt.err (!%p3082_p2)
}
   0xa   :  { %s3086_s24 = scalar_lea.vmem %s45_s30, 32  ;;  %p3091_p4 = scmp.lt.s32.totalorder %s45_s30, %s45_s30 }
   0xb   :  { %p3087_p3 = scmp.ne.s32.totalorder %s45_s30, %s3086_s24  ;;  %p3092_p5 = scmp.lt.s32.totalorder %s3086_s24, %s3086_s24 }
   0xd   :  { %p3093_p6 = por %p3092_p5, %p3091_p4 }
   0xf   :  { %p3094_p7 = pnand %p3093_p6, %p3087_p3 }
  0x11   :  { %3097 = shalt.err (!%p3094_p7)
}
  0x12   :  { %47 = dma.hbm_to_vmem [thread:$0]  %s4276_s4, 32, %s45_s30, [#allocation5]  }
  0x13   :  { %s3098_s29 = scalar_lea.hbm %s4274_s2, 16 }
  0x14   :  { %p3099_p8 = scmp.ne.s32.totalorder %s4274_s2, %s3098_s29  ;;  %p3102_p9 = scmp.lt.u32.totalorder %s3098_s29, %s4274_s2 }
  0x16   :  { %p3104_p10 = pnand %p3102_p9, %p3099_p8 }
  0x18   :  { %3107 = shalt.err (!%p3104_p10)
}
  0x19   :  { %s3108_s20 = scalar_lea.vmem %s33_s16, 16  ;;  %s3112_s21 = scalar_lea.vmem %s33_s16, 32 }
  0x1a   :  { %p3109_p11 = scmp.ne.s32.totalorder %s33_s16, %s3108_s20  ;;  %p3113_p12 = scmp.lt.s32.totalorder %s33_s16, %s33_s16 }
  0x1b   :  { %p3114_p13 = scmp.lt.s32.totalorder %s3112_s21, %s3108_s20 }
  0x1d   :  { %p3115_p0 = por %p3114_p13, %p3113_p12 }
  0x1f   :  { %p3116_p1 = pnand %p3115_p0, %p3109_p11 }
  0x21   :  { %3119 = shalt.err (!%p3116_p1)
}
  0x22   :  { %35 = dma.hbm_to_vmem [thread:$0]  %s4274_s2, 16, %s33_s16, [#allocation3]  }
  0x23   :  { %s3172_s22 = smov [#allocation6]   ;;  %s3173_s24 = smov [#allocation7]  }
  0x24   :  { %s56_s23 = sshll.u32 %s3172_s22, 4  ;;  %s78_s25 = sshll.u32 %s3173_s24, 4  ;;  %s57_s23 = int_to_ptr.vmem [resolvable:$true] %s56_s23  ;;  %s79_s25 = int_to_ptr.vmem [resolvable:$true] %s78_s25 }
  0x25   :  { %s3120_s28 = scalar_lea.hbm %s4278_s6, 32 }
  0x26   :  { %p3121_p2 = scmp.ne.s32.totalorder %s4278_s6, %s3120_s28  ;;  %p3124_p3 = scmp.lt.u32.totalorder %s3120_s28, %s4278_s6 }
  0x28   :  { %p3126_p4 = pnand %p3124_p3, %p3121_p2 }
  0x2a   :  { %3129 = shalt.err (!%p3126_p4)
}
  0x2b   :  { %s3130_s2 = scalar_lea.vmem %s57_s23, 32  ;;  %p3135_p6 = scmp.lt.s32.totalorder %s57_s23, %s57_s23 }
  0x2c   :  { %p3131_p5 = scmp.ne.s32.totalorder %s57_s23, %s3130_s2  ;;  %p3136_p7 = scmp.lt.s32.totalorder %s3130_s2, %s3130_s2 }
  0x2e   :  { %p3137_p8 = por %p3136_p7, %p3135_p6 }
  0x30   :  { %p3138_p9 = pnand %p3137_p8, %p3131_p5 }
  0x32   :  { %3141 = shalt.err (!%p3138_p9)
}
  0x33   :  { %59 = dma.hbm_to_vmem [thread:$0]  %s4278_s6, 32, %s57_s23, [#allocation5]  }
  0x34   :  { %s3142_s4 = scalar_lea.hbm %s4285_s13, 32 }
  0x35   :  { %p3143_p10 = scmp.ne.s32.totalorder %s4285_s13, %s3142_s4  ;;  %p3146_p11 = scmp.lt.u32.totalorder %s3142_s4, %s4285_s13 }
  0x37   :  { %p3148_p12 = pnand %p3146_p11, %p3143_p10 }
  0x39   :  { %3151 = shalt.err (!%p3148_p12)
}
  0x3a   :  { %s3152_s27 = scalar_lea.vmem %s79_s25, 32  ;;  %p3157_p0 = scmp.lt.s32.totalorder %s79_s25, %s79_s25 }
  0x3b   :  { %p3153_p13 = scmp.ne.s32.totalorder %s79_s25, %s3152_s27  ;;  %p3158_p1 = scmp.lt.s32.totalorder %s3152_s27, %s3152_s27 }
  0x3d   :  { %p3159_p2 = por %p3158_p1, %p3157_p0 }
  0x3f   :  { %p3160_p3 = pnand %p3159_p2, %p3153_p13 }
  0x41   :  { %3163 = shalt.err (!%p3160_p3)
}
  0x42   :  { %81 = dma.hbm_to_vmem [thread:$0]  %s4285_s13, 32, %s79_s25, [#allocation8]  }
  0x43   :  { %3164 = dma.done.wait [#allocation3], 16  }
  0x44   :  { %3165 = vsyncadd [#allocation3], 4294967280 }
  0x45   :  { %3166 = dma.done.wait [#allocation5], 64  }
  0x46   :  { %3167 = vsyncadd [#allocation5], 4294967232 }
  0x47   :  { %3168 = dma.done.wait [#allocation8], 32  }
  0x48   :  { %3169 = vsyncadd [#allocation8], 4294967264  ;;  %v2758_v0 = vld [vmem:[%s4275_s3 + $0x4] ss:$8 sps:$4 sm:$0xff]   ;;  %v2760_v1 = vld [vmem:[%s4275_s3] ss:$8 sps:$4 sm:$0xff]   ;;  %v174_v17 = vlaneseq }
  0x49   :  { %518 = vmatprep.subr.bf16.mxu0 %v2758_v0  ;;  %v2761_v2 = vld [vmem:[%s4275_s3 + $0x14] ss:$8 sps:$4 sm:$0xff]   ;;  %v2763_v3 = vld [vmem:[%s4275_s3 + $0x10] ss:$8 sps:$4 sm:$0xff]   ;;  %v2764_v4 = vld [vmem:[%s4275_s3 + $0x24] ss:$8 sps:$4 sm:$0xff]  }
  0x4a   :  { %519 = vmatpush1.bf16.msra.mxu0 %v2760_v1  ;;  %v2766_v5 = vld [vmem:[%s4275_s3 + $0x20] ss:$8 sps:$4 sm:$0xff]   ;;  %v2767_v6 = vld [vmem:[%s4275_s3 + $0x34] ss:$8 sps:$4 sm:$0xff]   ;;  %v2769_v7 = vld [vmem:[%s4275_s3 + $0x30] ss:$8 sps:$4 sm:$0xff]  }
  0x4b   :  { %520 = vmatprep.subr.bf16.mxu0 %v2761_v2  ;;  %v2770_v8 = vld [vmem:[%s4275_s3 + $0x44] ss:$8 sps:$4 sm:$0xff]   ;;  %v2772_v9 = vld [vmem:[%s4275_s3 + $0x40] ss:$8 sps:$4 sm:$0xff]   ;;  %v2773_v10 = vld [vmem:[%s4275_s3 + $0x54] ss:$8 sps:$4 sm:$0xff]  }
  0x4c   :  { %v2775_v11 = vld [vmem:[%s4275_s3 + $0x50] ss:$8 sps:$4 sm:$0xff]   ;;  %v2776_v12 = vld [vmem:[%s4275_s3 + $0x64] ss:$8 sps:$4 sm:$0xff]   ;;  %v2401_v15 = vld [vmem:[%s4273_s1] ss:$0 sm:$0xff] }
  0x4d   :  { %v3345_v13 = vld [vmem:[%s4272_s0] sm:$0xff]  ;;  %v3350_v14 = vld [vmem:[%s4272_s0 + $0x8] sm:$0xff]  ;;  %v2779_v22 = vld [vmem:[%s4275_s3 + $0x74] ss:$8 sps:$4 sm:$0xff]   ;;  %v3369_v25 = vshrl.u32 %v174_v17, 7  ;;  %vm3174_vm2 = vmmov 1  }
  0x4e   :  { %521 = vmatpush1.bf16.msra.mxu0 %v2763_v3  ;;  %v3355_v16 = vld [vmem:[#allocation2] ss:$0 sm:$0xff]  ;;  %v2120_v18 = vpack.c.bf16 %v3350_v14, %v3345_v13  ;;  %v106_v20 = vmul.f32 %v2401_v15, %v3345_v13  ;;  %v107_v21 = vmul.f32 %v2401_v15, %v3350_v14  ;;  %v2781_v26 = vld [vmem:[%s4275_s3 + $0x70] ss:$8 sps:$4 sm:$0xff]   ;;  %v2782_v29 = vld [vmem:[%s4275_s3 + $0x84] ss:$8 sps:$4 sm:$0xff]  }
  0x4f   :  { %522 = vmatprep.subr.bf16.mxu0 %v2764_v4  ;;  %v2778_v19 = vld [vmem:[%s4275_s3 + $0x60] ss:$8 sps:$4 sm:$0xff]   ;;  %vm252_vm0 = vcmp.lt.s32.totalorder %v3369_v25, 7  ;;  %v2785_v34 = vld [vmem:[%s4275_s3 + $0x94] ss:$8 sps:$4 sm:$0xff]   ;;  %v183_v62 = vand.u32 15, %v3369_v25 }
  0x50   :  { %v117_v23 = vadd.f32 %v3355_v16, %v106_v20  ;;  %v118_v24 = vadd.f32 %v3355_v16, %v107_v21  ;;  %v2784_v33 = vld [vmem:[%s4275_s3 + $0x80] ss:$8 sps:$4 sm:$0xff]   ;;  %v97_v36 = vld [vmem:[%s4272_s0 + $0x10] sm:$0xff]  ;;  %v2788_v39 = vld [vmem:[%s4275_s3 + $0xa4] ss:$8 sps:$4 sm:$0xff]   ;;  %vm235_vm4 = vcmp.lt.s32.totalorder %v3369_v25, 1 }
  0x51   :  { %v108_v37 = vmul.f32 %v2401_v15, %v97_v36  ;;  %v2787_v38 = vld [vmem:[%s4275_s3 + $0x90] ss:$8 sps:$4 sm:$0xff]   ;;  %v2830_v41 = vld [vmem:[%s4277_s5 + $0x4] ss:$8 sps:$4 sm:$0xff]   ;;  %v2832_v42 = vld [vmem:[%s4277_s5] ss:$8 sps:$4 sm:$0xff]  }
  0x52   :  { %523 = vmatpush1.bf16.msra.mxu0 %v2766_v5  ;;  %v3374_v27 = vmax.f32 %v117_v23, 0.0  ;;  %v3376_v28 = vmax.f32 %v118_v24, 0.0  ;;  %v2790_v43 = vld [vmem:[%s4275_s3 + $0xa0] ss:$8 sps:$4 sm:$0xff]   ;;  %v2833_v45 = vld [vmem:[%s4277_s5 + $0x14] ss:$8 sps:$4 sm:$0xff]   ;;  %1280 = vmatprep.subr.bf16.mxu1 %v2830_v41 }
  0x53   :  { %524 = vmatprep.subr.bf16.mxu0 %v2767_v6  ;;  %v119_v40 = vadd.f32 %v3355_v16, %v108_v37  ;;  %v2791_v46 = vld [vmem:[%s4275_s3 + $0xb4] ss:$8 sps:$4 sm:$0xff]   ;;  %1281 = vmatpush1.bf16.msra.mxu1 %v2832_v42  ;;  %v2835_v48 = vld [vmem:[%s4277_s5 + $0x10] ss:$8 sps:$4 sm:$0xff]   ;;  %v2836_v50 = vld [vmem:[%s4277_s5 + $0x24] ss:$8 sps:$4 sm:$0xff]  }
  0x54   :  { %v248_v30 = vrot.slane %v3374_v27, 1  ;;  %v249_v31 = vrot.slane %v3376_v28, 1  ;;  %v262_v32 = vpack.c.bf16 %v3376_v28, %v3374_v27  ;;  %v98_v49 = vld [vmem:[%s4272_s0 + $0x18] sm:$0xff]  ;;  %1282 = vmatprep.subr.bf16.mxu1 %v2833_v45  ;;  %v2838_v55 = vld [vmem:[%s4277_s5 + $0x20] ss:$8 sps:$4 sm:$0xff]   ;;  %vm227_vm1 = vcmp.ge.s32.totalorder %v183_v62, 1 }
  0x55   :  { %v3417_v44 = vmax.f32 %v119_v40, 0.0  ;;  %v2793_v52 = vld [vmem:[%s4275_s3 + $0xb0] ss:$8 sps:$4 sm:$0xff]   ;;  %v109_v54 = vmul.f32 %v2401_v15, %v98_v49  ;;  %v2794_v56 = vld [vmem:[%s4275_s3 + $0xc4] ss:$8 sps:$4 sm:$0xff]   ;;  %v177_v5 = vadd.s32 16, %v3369_v25  ;;  %vm3500_vm3 = vmpackc.low %vm3174_vm2, %vm227_vm1 }
  0x56   :  { %525 = vmatpush1.bf16.msra.mxu0 %v2769_v7  ;;  %v3396_v35 = vsel %vm252_vm0, %v248_v30, %v249_v31  ;;  %550 = vmatprep.mubr.bf16.mxu0 %v262_v32  ;;  %v2839_v57 = vld [vmem:[%s4277_s5 + $0x34] ss:$8 sps:$4 sm:$0xff]   ;;  %v2796_v58 = vld [vmem:[%s4275_s3 + $0xc0] ss:$8 sps:$4 sm:$0xff]   ;;  %v2841_v60 = vld [vmem:[%s4277_s5 + $0x30] ss:$8 sps:$4 sm:$0xff]  }
  0x57   :  { %526 = vmatprep.subr.bf16.mxu0 %v2770_v8  ;;  %v250_v47 = vrot.slane %v3417_v44, 1  ;;  %1283 = vmatpush1.bf16.msra.mxu1 %v2835_v48  ;;  %v120_v59 = vadd.f32 %v3355_v16, %v109_v54  ;;  %v2797_v61 = vld [vmem:[%s4275_s3 + $0xd4] ss:$8 sps:$4 sm:$0xff]   ;;  %v2842_v63 = vld [vmem:[%s4277_s5 + $0x44] ss:$8 sps:$4 sm:$0xff]   ;;  %v197_v16 = vand.u32 15, %v177_v5 }
  0x58   :  { %1284 = vmatprep.subr.bf16.mxu1 %v2836_v50  ;;  %v2799_v0 = vld [vmem:[%s4275_s3 + $0xd0] ss:$8 sps:$4 sm:$0xff]   ;;  %v2844_v1 = vld [vmem:[%s4277_s5 + $0x40] ss:$8 sps:$4 sm:$0xff]   ;;  %v2800_v2 = vld [vmem:[%s4275_s3 + $0xe4] ss:$8 sps:$4 sm:$0xff]  }
  0x59   :  { %v3439_v51 = vsel %vm252_vm0, %v249_v31, %v250_v47  ;;  %v2845_v3 = vld [vmem:[%s4277_s5 + $0x54] ss:$8 sps:$4 sm:$0xff]   ;;  %v3481_v4 = vmax.f32 %v120_v59, 0.0  ;;  %v2802_v6 = vld [vmem:[%s4275_s3 + $0xe0] ss:$8 sps:$4 sm:$0xff]   ;;  %vm229_vm5 = vcmp.ge.s32.totalorder %v197_v16, 1 }
  0x5a   :  { %527 = vmatpush1.bf16.msra.mxu0 %v2772_v9  ;;  %v2458_v53 = vpack.c.bf16 %v3439_v51, %v3396_v35  ;;  %v2847_v7 = vld [vmem:[%s4277_s5 + $0x50] ss:$8 sps:$4 sm:$0xff]   ;;  %v2803_v8 = vld [vmem:[%s4275_s3 + $0xf4] ss:$8 sps:$4 sm:$0xff]   ;;  %v2848_v9 = vld [vmem:[%s4277_s5 + $0x64] ss:$8 sps:$4 sm:$0xff]  }
  0x5b   :  { %528 = vmatprep.subr.bf16.mxu0 %v2773_v10  ;;  %1285 = vmatpush1.bf16.msra.mxu1 %v2838_v55  ;;  %v231_v10 = vrot.slane %v3374_v27, 7  ;;  %v2805_v17 = vld [vmem:[%s4275_s3 + $0xf0] ss:$8 sps:$4 sm:$0xff]   ;;  %v2808_v20 = vld [vmem:[%s4275_s3 + $0x104] ss:$8 sps:$4 sm:$0xff]   ;;  %v265_v31 = vpack.c.bf16 %v3481_v4, %v3417_v44  ;;  %v233_v32 = vrot.slane %v3417_v44, 7  ;;  %vm3534_vm6 = vmpackc.low %vm3174_vm2, %vm229_vm5 }
  0x5c   :  { %1286 = vmatprep.subr.bf16.mxu1 %v2839_v57  ;;  %v2851_v21 = vld [vmem:[%s4277_s5 + $0x74] ss:$8 sps:$4 sm:$0xff]   ;;  %v2806_v24 = vld [vmem:[%s4275_s3 + $0x100] ss:$8 sps:$4 sm:$0xff]   ;;  %v2809_v36 = vld [vmem:[%s4275_s3 + $0x110] ss:$8 sps:$4 sm:$0xff]  }
  0x5d   :  { %v2814_v37 = vld [vmem:[%s4275_s3 + $0x124] ss:$8 sps:$4 sm:$0xff]   ;;  %v2857_v41 = vld [vmem:[%s4277_s5 + $0x94] ss:$8 sps:$4 sm:$0xff]   ;;  %v176_v42 = vadd.s32 8, %v3369_v25  ;;  %v178_v48 = vadd.s32 24, %v3369_v25 }
  0x5e   :  { %529 = vmatpush1.bf16.msra.mxu0 %v2775_v11  ;;  %v232_v11 = vrot.slane %v3376_v28, 7  ;;  %v2811_v28 = vld [vmem:[%s4275_s3 + $0x114] ss:$8 sps:$4 sm:$0xff]   ;;  %v2859_v49 = vld [vmem:[%s4277_s5 + $0x90] ss:$8 sps:$4 sm:$0xff]   ;;  %v3673_v16 = vsub.s32 0, %v3369_v25 }
  0x5f   :  { %530 = vmatprep.subr.bf16.mxu0 %v2776_v12  ;;  %1287 = vmatpush1.bf16.msra.mxu1 %v2841_v60  ;;  %v234_v12 = vrot.slane %v3481_v4, 7  ;;  %v2817_v45 = vld [vmem:[%s4275_s3 + $0x134] ss:$8 sps:$4 sm:$0xff]   ;;  %v2860_v50 = vld [vmem:[%s4277_s5 + $0xa4] ss:$8 sps:$4 sm:$0xff]   ;;  %vm1516_vm11 = vcmask 1041409  }
  0x60   :  { %1288 = vmatprep.subr.bf16.mxu1 %v2842_v63  ;;  %v237_v40 = vsel %vm235_vm4, %v232_v11, %v233_v32  ;;  %v2815_v54 = vld [vmem:[%s4275_s3 + $0x130] ss:$8 sps:$4 sm:$0xff]   ;;  %v2820_v55 = vld [vmem:[%s4275_s3 + $0x144] ss:$8 sps:$4 sm:$0xff]   ;;  %v2862_v57 = vld [vmem:[%s4277_s5 + $0xa0] ss:$8 sps:$4 sm:$0xff]  }
  0x61   :  { %v239_v23 = vsel %vm235_vm4, %v234_v12, %v231_v10  ;;  %v2818_v60 = vld [vmem:[%s4275_s3 + $0x140] ss:$8 sps:$4 sm:$0xff]   ;;  %v2821_v62 = vld [vmem:[%s4275_s3 + $0x150] ss:$8 sps:$4 sm:$0xff]   ;;  %v2826_v63 = vld [vmem:[%s4275_s3 + $0x164] ss:$8 sps:$4 sm:$0xff]  }
  0x62   :  { %531 = vmatpush1.bf16.msra.mxu0 %v2778_v19  ;;  %v2850_v19 = vld [vmem:[%s4277_s5 + $0x60] ss:$8 sps:$4 sm:$0xff]   ;;  %v2827_v5 = vld [vmem:[%s4275_s3 + $0x170] ss:$8 sps:$4 sm:$0xff]   ;;  %v2863_v35 = vld [vmem:[%s4277_s5 + $0xb4] ss:$8 sps:$4 sm:$0xff]  }
  0x63   :  { %532 = vmatprep.subr.bf16.mxu0 %v2779_v22  ;;  %1289 = vmatpush1.bf16.msra.mxu1 %v2844_v1  ;;  %v238_v22 = vsel %vm235_vm4, %v231_v10, %v232_v11  ;;  %v2829_v1 = vld [vmem:[%s4275_s3 + $0x174] ss:$8 sps:$4 sm:$0xff]   ;;  %v2865_v44 = vld [vmem:[%s4277_s5 + $0xb0] ss:$8 sps:$4 sm:$0xff]   ;;  %v2866_v27 = vld [vmem:[%s4277_s5 + $0xc4] ss:$8 sps:$4 sm:$0xff]  }
  0x64   :  { %1290 = vmatprep.subr.bf16.mxu1 %v2845_v3  ;;  %v2871_v51 = vld [vmem:[%s4277_s5 + $0xd0] ss:$8 sps:$4 sm:$0xff]   ;;  %v2875_v10 = vld [vmem:[%s4277_s5 + $0xf4] ss:$8 sps:$4 sm:$0xff]   ;;  %v2975_v3 = vld [vmem:[%s4279_s7] sm:$0xff]   ;;  %vm1673_vm12 = vcmask 130048  }
  0x65   :  { %v2877_v11 = vld [vmem:[%s4277_s5 + $0xf0] ss:$8 sps:$4 sm:$0xff]   ;;  %v2889_v15 = vld [vmem:[%s4277_s5 + $0x134] ss:$8 sps:$4 sm:$0xff]   ;;  %vm3177_vm13 = vmmov 0   ;;  %vm2386_vm14 = vcmask 1043459  }
  0x66   :  { %533 = vmatpush1.bf16.msra.mxu0 %v2781_v26  ;;  %v2452_v26 = vpack.c.bf16 %v238_v22, %v239_v23  ;;  %vm2388_vm15 = vcmask 1045509  }
  0x67   :  { %534 = vmatprep.subr.bf16.mxu0 %v2782_v29  ;;  %1291 = vmatpush1.bf16.msra.mxu1 %v2847_v7  ;;  %v2853_v29 = vld [vmem:[%s4277_s5 + $0x70] ss:$8 sps:$4 sm:$0xff]  }
  0x68   :  { %1292 = vmatprep.subr.bf16.mxu1 %v2848_v9  ;;  %v2874_v9 = vld [vmem:[%s4277_s5 + $0xe0] ss:$8 sps:$4 sm:$0xff]  }
  0x6a   :  { %535 = vmatpush1.bf16.msra.mxu0 %v2784_v33  ;;  %v2895_v33 = vld [vmem:[%s4277_s5 + $0x154] ss:$8 sps:$4 sm:$0xff]  }
  0x6b   :  { %536 = vmatprep.subr.bf16.mxu0 %v2785_v34  ;;  %1293 = vmatpush1.bf16.msra.mxu1 %v2850_v19  ;;  %v2854_v34 = vld [vmem:[%s4277_s5 + $0x84] ss:$8 sps:$4 sm:$0xff]   ;;  %v3676_v19 = vsub.s32 1, %v3369_v25 }
  0x6c   :  { %1294 = vmatprep.subr.bf16.mxu1 %v2851_v21 }
  0x6e   :  { %537 = vmatpush1.bf16.msra.mxu0 %v2787_v38  ;;  %v2856_v38 = vld [vmem:[%s4277_s5 + $0x80] ss:$8 sps:$4 sm:$0xff]  }
  0x6f   :  { %538 = vmatprep.subr.bf16.mxu0 %v2788_v39  ;;  %v236_v39 = vsel %vm235_vm4, %v233_v32, %v234_v12  ;;  %1295 = vmatpush1.bf16.msra.mxu1 %v2853_v29  ;;  %v2880_v12 = vld [vmem:[%s4277_s5 + $0x104] ss:$8 sps:$4 sm:$0xff]  }
  0x70   :  { %1296 = vmatprep.subr.bf16.mxu1 %v2854_v34 }
  0x72   :  { %539 = vmatpush1.bf16.msra.mxu0 %v2790_v43  ;;  %v2812_v43 = vld [vmem:[%s4275_s3 + $0x120] ss:$8 sps:$4 sm:$0xff]  }
  0x73   :  { %540 = vmatprep.subr.bf16.mxu0 %v2791_v46  ;;  %v2455_v46 = vpack.c.bf16 %v236_v39, %v237_v40  ;;  %1297 = vmatpush1.bf16.msra.mxu1 %v2856_v38 }
  0x74   :  { %1298 = vmatprep.subr.bf16.mxu1 %v2857_v41 }
  0x76   :  { %541 = vmatpush1.bf16.msra.mxu0 %v2793_v52  ;;  %v190_v52 = vand.u32 15, %v176_v42 }
  0x77   :  { %542 = vmatprep.subr.bf16.mxu0 %v2794_v56  ;;  %v204_v56 = vand.u32 15, %v178_v48  ;;  %1299 = vmatpush1.bf16.msra.mxu1 %v2859_v49 }
  0x78   :  { %vm3585_vm7 = vcmp.lt.s32.totalorder %v190_v52, 15  ;;  %1300 = vmatprep.subr.bf16.mxu1 %v2860_v50 }
  0x79   :  { %vm247_vm8 = vcmp.lt.s32.totalorder %v204_v56, 15  ;;  %vm3611_vm9 = vmpackc.low %vm3585_vm7, %vm3174_vm2 }
  0x7a   :  { %543 = vmatpush1.bf16.msra.mxu0 %v2796_v58  ;;  %v3175_v58 = vmov 0   ;;  %vm3619_vm10 = vmpackc.low %vm247_vm8, %vm3174_vm2 }
  0x7b   :  { %544 = vmatprep.subr.bf16.mxu0 %v2797_v61  ;;  %v2823_v61 = vld [vmem:[%s4275_s3 + $0x154] ss:$8 sps:$4 sm:$0xff]   ;;  %1301 = vmatpush1.bf16.msra.mxu1 %v2862_v57 }
  0x7c   :  { %1302 = vmatprep.subr.bf16.mxu1 %v2863_v35 }
  0x7e   :  { %545 = vmatpush1.bf16.msra.mxu0 %v2799_v0  ;;  %v2824_v0 = vld [vmem:[%s4275_s3 + $0x160] ss:$8 sps:$4 sm:$0xff]  }
  0x7f   :  { %546 = vmatprep.subr.bf16.mxu0 %v2800_v2  ;;  %v251_v2 = vrot.slane %v3481_v4, 1  ;;  %1303 = vmatpush1.bf16.msra.mxu1 %v2865_v44 }
  0x80   :  { %1304 = vmatprep.subr.bf16.mxu1 %v2866_v27 }
  0x81   :  { %v253_v4 = vsel %vm252_vm0, %v250_v47, %v251_v2  ;;  %v256_v7 = vsel %vm252_vm0, %v251_v2, %v248_v30  ;;  %v2868_v30 = vld [vmem:[%s4277_s5 + $0xc0] ss:$8 sps:$4 sm:$0xff]   ;;  %v2869_v47 = vld [vmem:[%s4277_s5 + $0xd4] ss:$8 sps:$4 sm:$0xff]  }
  0x82   :  { %547 = vmatpush1.bf16.msra.mxu0 %v2802_v6  ;;  %v2977_v6 = vld [vmem:[%s4279_s7 + $0x8] sm:$0xff]  }
  0x83   :  { %548 = vmatprep.subr.bf16.mxu0 %v2803_v8  ;;  %v2461_v8 = vpack.c.bf16 %v256_v7, %v253_v4  ;;  %1305 = vmatpush1.bf16.msra.mxu1 %v2868_v30 }
  0x84   :  { %1306 = vmatprep.subr.bf16.mxu1 %v2869_v47 }
  0x86   :  { %549 = vmatpush1.bf16.msra.mxu0 %v2805_v17  ;;  %v173_v17 = vld [vmem:[#allocation4] sm:$0x3] }
  0x87   :  { %571 = vmatprep.subr.bf16.mxu0 %v2808_v20  ;;  %1307 = vmatpush1.bf16.msra.mxu1 %v2871_v51  ;;  %v271_v20 = vrot.slane %v173_v17, %v3673_v16  ;;  %v275_v21 = vrot.slane %v173_v17, %v3676_v19 }
  0x89   :  { %2453 = vmatmul.mubr.msk.bf16.vlgmr.msra.gmra.mrb[0].mxu0 %vm3500_vm3, %v2452_v26 }
  0x8a   :  { %572 = vmatpush1.bf16.msra.mxu0 %v2806_v24  ;;  %560 = vmatprep.mubr.bf16.mxu0 %v265_v31 }
  0x8b   :  { %573 = vmatprep.subr.bf16.mxu0 %v2811_v28 }
  0x8e   :  { %574 = vmatpush1.bf16.msra.mxu0 %v2809_v36 }
  0x8f   :  { %575 = vmatprep.subr.bf16.mxu0 %v2814_v37 }
  0x91   :  { %2456 = vmatmul.mubr.msk.bf16.gmra.mrb[4].mxu0 %vm3534_vm6, %v2455_v46 }
  0x92   :  { %576 = vmatpush1.bf16.msra.mxu0 %v2812_v43  ;;  %603 = vmatprep.mubr.bf16.mxu0 %v3175_v58 }
  0x93   :  { %577 = vmatprep.subr.bf16.mxu0 %v2817_v45 }
  0x96   :  { %578 = vmatpush1.bf16.msra.mxu0 %v2815_v54 }
  0x97   :  { %579 = vmatprep.subr.bf16.mxu0 %v2820_v55 }
  0x9a   :  { %580 = vmatpush1.bf16.msra.mxu0 %v2818_v60 }
  0x9b   :  { %581 = vmatprep.subr.bf16.mxu0 %v2823_v61 }
  0x9e   :  { %582 = vmatpush1.bf16.msra.mxu0 %v2821_v62 }
  0x9f   :  { %583 = vmatprep.subr.bf16.mxu0 %v2826_v63 }
  0xa2   :  { %584 = vmatpush1.bf16.msra.mxu0 %v2824_v0 }
  0xa3   :  { %585 = vmatprep.subr.bf16.mxu0 %v2829_v1 }
  0xa6   :  { %586 = vmatpush1.bf16.msra.mxu0 %v2827_v5 }
  0xa9   :  { %2459 = vmatmul.mubr.msk.bf16.vlgmr.msra.gmra.mrb[0].mxu0 %vm3611_vm9, %v2458_v53  ;;  %v2872_v53 = vld [vmem:[%s4277_s5 + $0xe4] ss:$8 sps:$4 sm:$0xff]  }
  0xaa   :  { %613 = vmatprep.mubr.bf16.mxu0 %v3175_v58  ;;  %1308 = vmatprep.subr.bf16.mxu1 %v2872_v53 }
  0xab   :  { %1309 = vmatpush1.bf16.msra.mxu1 %v2874_v9 }
  0xac   :  { %1310 = vmatprep.subr.bf16.mxu1 %v2875_v10 }
  0xaf   :  { %1311 = vmatpush1.bf16.msra.mxu1 %v2877_v11 }
  0xb0   :  { %1333 = vmatprep.subr.bf16.mxu1 %v2880_v12 }
  0xb1   :  { %2462 = vmatmul.mubr.msk.bf16.gmra.mrb[4].mxu0 %vm3619_vm10, %v2461_v8 }
 0x17c   :  { %v605_v22 = vpop.f32.mrb[0].mxu0 }
 0x17d   :  { %v2708_v23 = vadd.f32 %v605_v22, %v271_v20  ;;  %v607_v24 = vpop.f32.mrb[1].mxu0 }
 0x17e   :  { %v2709_v26 = vadd.f32 %v607_v24, %v275_v21  ;;  %v609_v28 = vpop.f32.mrb[2].mxu0 }
 0x17f   :  { %v3680_v29 = vmax.f32 %v2708_v23, 0.0  ;;  %v2710_v31 = vadd.f32 %v609_v28, %v271_v20  ;;  %v611_v32 = vpop.f32.mrb[3].mxu0 }
 0x180   :  { %v3682_v34 = vmax.f32 %v2709_v26, 0.0  ;;  %v2711_v36 = vadd.f32 %v611_v32, %v275_v21  ;;  %v2878_v32 = vld [vmem:[%s4277_s5 + $0x100] ss:$8 sps:$4 sm:$0xff]  }
 0x181   :  { %v3684_v37 = vmax.f32 %v2710_v31, 0.0  ;;  %v729_v38 = vrot.slane %v3680_v29, 7  ;;  %v753_v39 = vrot.slane %v3680_v29, 1 }
 0x182   :  { %v3688_v40 = vmax.f32 %v2711_v36, 0.0  ;;  %v730_v41 = vrot.slane %v3682_v34, 7  ;;  %v754_v46 = vrot.slane %v3682_v34, 1 }
 0x183   :  { %v731_v42 = vrot.slane %v3684_v37, 7  ;;  %v755_v43 = vrot.slane %v3684_v37, 1  ;;  %v779_v45 = vpack.c.bf16 %v3684_v37, %v3680_v29  ;;  %v2932_v29 = vld [vmem:[%s4277_s5 + $0x220] ss:$8 sps:$4 sm:$0xff]   ;;  %v2937_v37 = vld [vmem:[%s4277_s5 + $0x234] ss:$8 sps:$4 sm:$0xff]  }
 0x184   :  { %v732_v48 = vrot.slane %v3688_v40, 7  ;;  %v756_v49 = vrot.slane %v3688_v40, 1  ;;  %v615_v50 = vpop.f32.mrb[4].mxu0  ;;  %v780_v52 = vpack.c.bf16 %v3688_v40, %v3682_v34  ;;  %v2883_v40 = vld [vmem:[%s4277_s5 + $0x114] ss:$8 sps:$4 sm:$0xff]  }
 0x185   :  { %v3702_v54 = vsel %vm252_vm0, %v753_v39, %v755_v43  ;;  %v2712_v55 = vadd.f32 %v615_v50, %v271_v20  ;;  %v617_v56 = vpop.f32.mrb[5].mxu0  ;;  %v741_v57 = vsel %vm235_vm4, %v729_v38, %v731_v42 }
 0x186   :  { %v2713_v59 = vadd.f32 %v617_v56, %v275_v21  ;;  %v619_v60 = vpop.f32.mrb[6].mxu0  ;;  %v742_v61 = vsel %vm235_vm4, %v730_v41, %v732_v48  ;;  %v3710_v62 = vsel %vm252_vm0, %v754_v46, %v756_v49  ;;  %v2887_v56 = vld [vmem:[%s4277_s5 + $0x130] ss:$8 sps:$4 sm:$0xff]  }
 0x187   :  { %v3712_v63 = vmax.f32 %v2712_v55, 0.0  ;;  %v2714_v0 = vadd.f32 %v619_v60, %v271_v20  ;;  %v621_v1 = vpop.f32.mrb[7].mxu0  ;;  %v2884_v55 = vld [vmem:[%s4277_s5 + $0x120] ss:$8 sps:$4 sm:$0xff]   ;;  %v2898_v60 = vld [vmem:[%s4277_s5 + $0x164] ss:$8 sps:$4 sm:$0xff]  }
 0x188   :  { %v3714_v2 = vmax.f32 %v2713_v59, 0.0  ;;  %v2715_v5 = vadd.f32 %v621_v1, %v275_v21  ;;  %v2890_v59 = vld [vmem:[%s4277_s5 + $0x140] ss:$8 sps:$4 sm:$0xff]   ;;  %v2899_v1 = vld [vmem:[%s4277_s5 + $0x170] ss:$8 sps:$4 sm:$0xff]  }
 0x189   :  { %v733_v4 = vrot.slane %v3712_v63, 7  ;;  %v757_v7 = vrot.slane %v3712_v63, 1  ;;  %v3718_v8 = vmax.f32 %v2714_v0, 0.0  ;;  %v2901_v0 = vld [vmem:[%s4277_s5 + $0x174] ss:$8 sps:$4 sm:$0xff]  }
 0x18a   :  { %v734_v35 = vrot.slane %v3714_v2, 7  ;;  %v758_v44 = vrot.slane %v3714_v2, 1  ;;  %v3722_v27 = vmax.f32 %v2715_v5, 0.0  ;;  %v2904_v5 = vld [vmem:[%s4277_s5 + $0x184] ss:$8 sps:$4 sm:$0xff]  }
 0x18b   :  { %v3726_v30 = vsel %vm252_vm0, %v755_v43, %v757_v7  ;;  %v735_v47 = vrot.slane %v3718_v8, 7  ;;  %v759_v51 = vrot.slane %v3718_v8, 1  ;;  %v739_v53 = vsel %vm235_vm4, %v731_v42, %v733_v4 }
 0x18c   :  { %v2575_v9 = vpack.c.bf16 %v3726_v30, %v3702_v54  ;;  %v736_v10 = vrot.slane %v3722_v27, 7  ;;  %v760_v11 = vrot.slane %v3722_v27, 1  ;;  %v740_v12 = vsel %vm235_vm4, %v732_v48, %v734_v35  ;;  %v2974_v54 = vld [vmem:[%s4279_s7 + $0x40] sm:$0xff]   ;;  %v2976_v30 = vld [vmem:[%s4279_s7 + $0x48] sm:$0xff]  }
 0x18d   :  { %v743_v17 = vsel %vm235_vm4, %v735_v47, %v729_v38  ;;  %v737_v20 = vsel %vm235_vm4, %v733_v4, %v735_v47  ;;  %v786_v21 = vpack.c.bf16 %v3722_v27, %v3714_v2  ;;  %v785_v22 = vpack.c.bf16 %v3718_v8, %v3712_v63  ;;  %v2902_v4 = vld [vmem:[%s4277_s5 + $0x180] ss:$8 sps:$4 sm:$0xff]   ;;  %v2940_v2 = vld [vmem:[%s4277_s5 + $0x244] ss:$8 sps:$4 sm:$0xff]   ;;  %v2941_v8 = vld [vmem:[%s4277_s5 + $0x250] ss:$8 sps:$4 sm:$0xff]   ;;  %2656 = vmatprep.subr.bf16.mxu0 %v2974_v54 }
 0x18e   :  { %v744_v23 = vsel %vm235_vm4, %v736_v10, %v730_v41  ;;  %v2563_v24 = vpack.c.bf16 %v741_v57, %v743_v17  ;;  %v738_v26 = vsel %vm235_vm4, %v734_v35, %v736_v10  ;;  %v2569_v28 = vpack.c.bf16 %v737_v20, %v739_v53  ;;  %v2892_v57 = vld [vmem:[%s4277_s5 + $0x144] ss:$8 sps:$4 sm:$0xff]   ;;  %v2905_v35 = vld [vmem:[%s4277_s5 + $0x190] ss:$8 sps:$4 sm:$0xff]   ;;  %v2908_v47 = vld [vmem:[%s4277_s5 + $0x1a0] ss:$8 sps:$4 sm:$0xff]   ;;  %2657 = vmatpush3.bf16.msra.mxu0 %v2975_v3 }
 0x18f   :  { %v2560_v31 = vpack.c.bf16 %v742_v61, %v744_v23  ;;  %v2566_v34 = vpack.c.bf16 %v738_v26, %v740_v12  ;;  %v3755_v36 = vsel %vm252_vm0, %v756_v49, %v758_v44  ;;  %v3759_v38 = vsel %vm252_vm0, %v758_v44, %v760_v11  ;;  %v2896_v61 = vld [vmem:[%s4277_s5 + $0x160] ss:$8 sps:$4 sm:$0xff]   ;;  %v2910_v44 = vld [vmem:[%s4277_s5 + $0x1a4] ss:$8 sps:$4 sm:$0xff]   ;;  %v2911_v53 = vld [vmem:[%s4277_s5 + $0x1b0] ss:$8 sps:$4 sm:$0xff]   ;;  %2658 = vmatprep.subr.bf16.mxu0 %v2976_v30 }
 0x190   :  { %v2572_v41 = vpack.c.bf16 %v3755_v36, %v3710_v62  ;;  %v3768_v42 = vsel %vm252_vm0, %v760_v11, %v754_v46  ;;  %v3772_v43 = vsel %vm252_vm0, %v757_v7, %v759_v51  ;;  %v3776_v48 = vsel %vm252_vm0, %v759_v51, %v753_v39  ;;  %v2881_v39 = vld [vmem:[%s4277_s5 + $0x110] ss:$8 sps:$4 sm:$0xff]   ;;  %v2886_v46 = vld [vmem:[%s4277_s5 + $0x124] ss:$8 sps:$4 sm:$0xff]   ;;  %v2907_v7 = vld [vmem:[%s4277_s5 + $0x194] ss:$8 sps:$4 sm:$0xff]  }
 0x191   :  { %2561 = vmatprep.mubr.msk.bf16.mxu1 %vm3500_vm3, %v2560_v31  ;;  %v2578_v49 = vpack.c.bf16 %v3768_v42, %v3759_v38  ;;  %v2581_v50 = vpack.c.bf16 %v3776_v48, %v3772_v43  ;;  %v2913_v51 = vld [vmem:[%s4277_s5 + $0x1b4] ss:$8 sps:$4 sm:$0xff]   ;;  %v2916_v10 = vld [vmem:[%s4277_s5 + $0x1c4] ss:$8 sps:$4 sm:$0xff]   ;;  %v2914_v11 = vld [vmem:[%s4277_s5 + $0x1c0] ss:$8 sps:$4 sm:$0xff]  }
 0x192   :  { %2564 = vmatmul.mubr.msk.bf16.vlgmr.msra.gmra.mrb[0].mxu1 %vm3500_vm3, %v2563_v24  ;;  %v2919_v12 = vld [vmem:[%s4277_s5 + $0x1d4] ss:$8 sps:$4 sm:$0xff]   ;;  %v2917_v17 = vld [vmem:[%s4277_s5 + $0x1d0] ss:$8 sps:$4 sm:$0xff]   ;;  %v2922_v20 = vld [vmem:[%s4277_s5 + $0x1e4] ss:$8 sps:$4 sm:$0xff]   ;;  %2659 = vmatpush3.bf16.msra.mxu0 %v2977_v6 }
 0x193   :  { %1334 = vmatpush1.bf16.msra.mxu1 %v2878_v32  ;;  %2567 = vmatprep.mubr.msk.bf16.mxu1 %vm3534_vm6, %v2566_v34  ;;  %v2920_v23 = vld [vmem:[%s4277_s5 + $0x1e0] ss:$8 sps:$4 sm:$0xff]   ;;  %v2925_v24 = vld [vmem:[%s4277_s5 + $0x1f4] ss:$8 sps:$4 sm:$0xff]   ;;  %v2923_v26 = vld [vmem:[%s4277_s5 + $0x1f0] ss:$8 sps:$4 sm:$0xff]  }
 0x194   :  { %1335 = vmatprep.subr.bf16.mxu1 %v2883_v40  ;;  %v2926_v31 = vld [vmem:[%s4277_s5 + $0x200] ss:$8 sps:$4 sm:$0xff]   ;;  %v2931_v32 = vld [vmem:[%s4277_s5 + $0x214] ss:$8 sps:$4 sm:$0xff]   ;;  %v2929_v34 = vld [vmem:[%s4277_s5 + $0x210] ss:$8 sps:$4 sm:$0xff]  }
 0x195   :  { %v2934_v40 = vld [vmem:[%s4277_s5 + $0x224] ss:$8 sps:$4 sm:$0xff]   ;;  %v2938_v63 = vld [vmem:[%s4277_s5 + $0x240] ss:$8 sps:$4 sm:$0xff]   ;;  %v2943_v62 = vld [vmem:[%s4277_s5 + $0x254] ss:$8 sps:$4 sm:$0xff]  }
 0x196   :  { %v2946_v27 = vld [vmem:[%s4277_s5 + $0x264] ss:$8 sps:$4 sm:$0xff]   ;;  %v2947_v36 = vld [vmem:[%s4277_s5 + $0x270] ss:$8 sps:$4 sm:$0xff]   ;;  %vm2390_vm0 = vcmask 1047559  }
 0x197   :  { %1336 = vmatpush1.bf16.msra.mxu1 %v2881_v39  ;;  %v2950_v39 = vld [vmem:[%s4277_s5 + $0x280] ss:$8 sps:$4 sm:$0xff]   ;;  %v2979_v38 = vld [vmem:[%s4279_s7 + $0x10] sm:$0xff]   ;;  %v2980_v42 = vld [vmem:[%s4279_s7 + $0x58] sm:$0xff]  }
 0x198   :  { %1337 = vmatprep.subr.bf16.mxu1 %v2886_v46  ;;  %v2955_v46 = vld [vmem:[%s4277_s5 + $0x294] ss:$8 sps:$4 sm:$0xff]   ;;  %v2982_v48 = vld [vmem:[%s4279_s7 + $0x60] sm:$0xff]  }
 0x199   :  { %v2981_v43 = vld [vmem:[%s4279_s7 + $0x18] sm:$0xff]  }
 0x19a   :  { %2570 = vmatmul.mubr.msk.bf16.gmra.mrb[4].mxu1 %vm3534_vm6, %v2569_v28  ;;  %v2928_v28 = vld [vmem:[%s4277_s5 + $0x204] ss:$8 sps:$4 sm:$0xff]  }
 0x19b   :  { %1338 = vmatpush1.bf16.msra.mxu1 %v2884_v55  ;;  %1365 = vmatprep.mubr.bf16.mxu1 %v780_v52  ;;  %v2893_v52 = vld [vmem:[%s4277_s5 + $0x150] ss:$8 sps:$4 sm:$0xff]  }
 0x19c   :  { %1339 = vmatprep.subr.bf16.mxu1 %v2889_v15  ;;  %v2953_v55 = vld [vmem:[%s4277_s5 + $0x290] ss:$8 sps:$4 sm:$0xff]   ;;  %v2958_v15 = vld [vmem:[%s4277_s5 + $0x2a4] ss:$8 sps:$4 sm:$0xff]  }
 0x19f   :  { %1340 = vmatpush1.bf16.msra.mxu1 %v2887_v56  ;;  %v2956_v56 = vld [vmem:[%s4277_s5 + $0x2a0] ss:$8 sps:$4 sm:$0xff]  }
 0x1a0   :  { %1341 = vmatprep.subr.bf16.mxu1 %v2892_v57  ;;  %v2961_v57 = vld [vmem:[%s4277_s5 + $0x2b4] ss:$8 sps:$4 sm:$0xff]  }
 0x1a3   :  { %1342 = vmatpush1.bf16.msra.mxu1 %v2890_v59  ;;  %v2959_v59 = vld [vmem:[%s4277_s5 + $0x2b0] ss:$8 sps:$4 sm:$0xff]  }
 0x1a4   :  { %1343 = vmatprep.subr.bf16.mxu1 %v2895_v33  ;;  %v2964_v33 = vld [vmem:[%s4277_s5 + $0x2c4] ss:$8 sps:$4 sm:$0xff]  }
 0x1a7   :  { %1344 = vmatpush1.bf16.msra.mxu1 %v2893_v52  ;;  %v2962_v52 = vld [vmem:[%s4277_s5 + $0x2c0] ss:$8 sps:$4 sm:$0xff]  }
 0x1a8   :  { %1345 = vmatprep.subr.bf16.mxu1 %v2898_v60  ;;  %v2967_v60 = vld [vmem:[%s4277_s5 + $0x2d4] ss:$8 sps:$4 sm:$0xff]  }
 0x1ab   :  { %1346 = vmatpush1.bf16.msra.mxu1 %v2896_v61  ;;  %v2965_v61 = vld [vmem:[%s4277_s5 + $0x2d0] ss:$8 sps:$4 sm:$0xff]  }
 0x1ac   :  { %1347 = vmatprep.subr.bf16.mxu1 %v2901_v0  ;;  %v2970_v0 = vld [vmem:[%s4277_s5 + $0x2e4] ss:$8 sps:$4 sm:$0xff]  }
 0x1af   :  { %1348 = vmatpush1.bf16.msra.mxu1 %v2899_v1  ;;  %v2968_v1 = vld [vmem:[%s4277_s5 + $0x2e0] ss:$8 sps:$4 sm:$0xff]  }
 0x1b0   :  { %1349 = vmatprep.subr.bf16.mxu1 %v2904_v5  ;;  %v2973_v5 = vld [vmem:[%s4277_s5 + $0x2f4] ss:$8 sps:$4 sm:$0xff]  }
 0x1b3   :  { %1350 = vmatpush1.bf16.msra.mxu1 %v2902_v4  ;;  %v2971_v4 = vld [vmem:[%s4277_s5 + $0x2f0] ss:$8 sps:$4 sm:$0xff]  }
 0x1b4   :  { %1351 = vmatprep.subr.bf16.mxu1 %v2907_v7  ;;  %v2985_v7 = vld [vmem:[%s4279_s7 + $0x28] sm:$0xff]  }
 0x1b7   :  { %1352 = vmatpush1.bf16.msra.mxu1 %v2905_v35  ;;  %v2986_v35 = vld [vmem:[%s4279_s7 + $0x70] sm:$0xff]  }
 0x1b8   :  { %1353 = vmatprep.subr.bf16.mxu1 %v2910_v44  ;;  %v2987_v44 = vld [vmem:[%s4279_s7 + $0x30] sm:$0xff]  }
 0x1bb   :  { %1354 = vmatpush1.bf16.msra.mxu1 %v2908_v47  ;;  %v2988_v47 = vld [vmem:[%s4279_s7 + $0x78] sm:$0xff]  }
 0x1bc   :  { %1355 = vmatprep.subr.bf16.mxu1 %v2913_v51  ;;  %v2989_v51 = vld [vmem:[%s4279_s7 + $0x38] sm:$0xff]  }
 0x1bf   :  { %1356 = vmatpush1.bf16.msra.mxu1 %v2911_v53  ;;  %v2992_v53 = vld [vmem:[%s4280_s8 + $0x4] ss:$8 sps:$4 sm:$0xff]  }
 0x1c0   :  { %1357 = vmatprep.subr.bf16.mxu1 %v2916_v10  ;;  %v728_v10 = vld [vmem:[#allocation6] sm:$0x3] }
 0x1c3   :  { %1358 = vmatpush1.bf16.msra.mxu1 %v2914_v11  ;;  %v793_v11 = vrot.slane %v728_v10, %v3673_v16 }
 0x1c4   :  { %1359 = vmatprep.subr.bf16.mxu1 %v2919_v12 }
 0x1c7   :  { %1360 = vmatpush1.bf16.msra.mxu1 %v2917_v17  ;;  %v797_v17 = vrot.slane %v728_v10, %v3676_v19 }
 0x1c8   :  { %1361 = vmatprep.subr.bf16.mxu1 %v2922_v20 }
 0x1cb   :  { %1362 = vmatpush1.bf16.msra.mxu1 %v2920_v23 }
 0x1cc   :  { %1363 = vmatprep.subr.bf16.mxu1 %v2925_v24 }
 0x1cf   :  { %1364 = vmatpush1.bf16.msra.mxu1 %v2923_v26 }
 0x1d0   :  { %1386 = vmatprep.subr.bf16.mxu1 %v2928_v28 }
 0x1d2   :  { %1366 = vmatmul.mubr.bf16.vlgmr.msra.gmra.mrb[0].mxu1 %v779_v45  ;;  %v2935_v45 = vld [vmem:[%s4277_s5 + $0x230] ss:$8 sps:$4 sm:$0xff]  }
 0x1d3   :  { %1375 = vmatprep.mubr.bf16.mxu1 %v786_v21  ;;  %1387 = vmatpush1.bf16.msra.mxu1 %v2926_v31  ;;  %v2944_v21 = vld [vmem:[%s4277_s5 + $0x260] ss:$8 sps:$4 sm:$0xff]  }
 0x1d4   :  { %1388 = vmatprep.subr.bf16.mxu1 %v2931_v32 }
 0x1d7   :  { %1389 = vmatpush1.bf16.msra.mxu1 %v2929_v34 }
 0x1d8   :  { %1390 = vmatprep.subr.bf16.mxu1 %v2934_v40 }
 0x1da   :  { %1376 = vmatmul.mubr.bf16.gmra.mrb[4].mxu1 %v785_v22  ;;  %v2949_v22 = vld [vmem:[%s4277_s5 + $0x274] ss:$8 sps:$4 sm:$0xff]  }
 0x1db   :  { %1391 = vmatpush1.bf16.msra.mxu1 %v2932_v29  ;;  %2573 = vmatprep.mubr.msk.bf16.mxu1 %vm3611_vm9, %v2572_v41  ;;  %v2952_v41 = vld [vmem:[%s4277_s5 + $0x284] ss:$8 sps:$4 sm:$0xff]  }
 0x1dc   :  { %1392 = vmatprep.subr.bf16.mxu1 %v2937_v37 }
 0x1df   :  { %1393 = vmatpush1.bf16.msra.mxu1 %v2935_v45 }
 0x1e0   :  { %1394 = vmatprep.subr.bf16.mxu1 %v2940_v2 }
 0x1e3   :  { %1395 = vmatpush1.bf16.msra.mxu1 %v2938_v63 }
 0x1e4   :  { %1396 = vmatprep.subr.bf16.mxu1 %v2943_v62 }
 0x1e7   :  { %1397 = vmatpush1.bf16.msra.mxu1 %v2941_v8 }
 0x1e8   :  { %1398 = vmatprep.subr.bf16.mxu1 %v2946_v27 }
 0x1eb   :  { %1399 = vmatpush1.bf16.msra.mxu1 %v2944_v21 }
 0x1ec   :  { %1400 = vmatprep.subr.bf16.mxu1 %v2949_v22 }
 0x1ef   :  { %1401 = vmatpush1.bf16.msra.mxu1 %v2947_v36 }
 0x1f0   :  { %1402 = vmatprep.subr.bf16.mxu1 %v2952_v41 }
 0x1f3   :  { %1403 = vmatpush1.bf16.msra.mxu1 %v2950_v39 }
 0x1f4   :  { %1404 = vmatprep.subr.bf16.mxu1 %v2955_v46 }
 0x1f7   :  { %1405 = vmatpush1.bf16.msra.mxu1 %v2953_v55 }
 0x1f8   :  { %1406 = vmatprep.subr.bf16.mxu1 %v2958_v15 }
 0x1fb   :  { %1407 = vmatpush1.bf16.msra.mxu1 %v2956_v56 }
 0x1fc   :  { %1408 = vmatprep.subr.bf16.mxu1 %v2961_v57 }
 0x1ff   :  { %1409 = vmatpush1.bf16.msra.mxu1 %v2959_v59 }
 0x200   :  { %1410 = vmatprep.subr.bf16.mxu1 %v2964_v33 }
 0x203   :  { %1411 = vmatpush1.bf16.msra.mxu1 %v2962_v52 }
 0x204   :  { %1412 = vmatprep.subr.bf16.mxu1 %v2967_v60 }
 0x207   :  { %1413 = vmatpush1.bf16.msra.mxu1 %v2965_v61 }
 0x208   :  { %1414 = vmatprep.subr.bf16.mxu1 %v2970_v0 }
 0x20b   :  { %1415 = vmatpush1.bf16.msra.mxu1 %v2968_v1 }
 0x20c   :  { %1416 = vmatprep.subr.bf16.mxu1 %v2973_v5 }
 0x20f   :  { %1417 = vmatpush1.bf16.msra.mxu1 %v2971_v4 }
 0x212   :  { %2576 = vmatmul.mubr.msk.bf16.vlgmr.msra.gmra.mrb[0].mxu1 %vm3611_vm9, %v2575_v9  ;;  %v2978_v9 = vld [vmem:[%s4279_s7 + $0x50] sm:$0xff]  }
 0x213   :  { %2579 = vmatprep.mubr.msk.bf16.mxu1 %vm3619_vm10, %v2578_v49  ;;  %2660 = vmatprep.subr.bf16.mxu0 %v2978_v9  ;;  %v2983_v49 = vld [vmem:[%s4279_s7 + $0x20] sm:$0xff]  }
 0x214   :  { %2661 = vmatpush3.bf16.msra.mxu0 %v2979_v38 }
 0x215   :  { %2662 = vmatprep.subr.bf16.mxu0 %v2980_v42 }
 0x218   :  { %2663 = vmatpush3.bf16.msra.mxu0 %v2981_v43 }
 0x219   :  { %2664 = vmatprep.subr.bf16.mxu0 %v2982_v48 }
 0x21a   :  { %2582 = vmatmul.mubr.msk.bf16.gmra.mrb[4].mxu1 %vm3619_vm10, %v2581_v50  ;;  %v2984_v50 = vld [vmem:[%s4279_s7 + $0x68] sm:$0xff]  }
 0x21b   :  { %2246 = vmatprep.mubr.bf16.mxu1 %v3175_v58 }
 0x21c   :  { %2665 = vmatpush3.bf16.msra.mxu0 %v2983_v49 }
 0x21d   :  { %2666 = vmatprep.subr.bf16.mxu0 %v2984_v50 }
 0x220   :  { %2667 = vmatpush3.bf16.msra.mxu0 %v2985_v7 }
 0x221   :  { %2668 = vmatprep.subr.bf16.mxu0 %v2986_v35 }
 0x224   :  { %2669 = vmatpush3.bf16.msra.mxu0 %v2987_v44 }
 0x225   :  { %2670 = vmatprep.subr.bf16.mxu0 %v2988_v47 }
 0x228   :  { %2671 = vmatpush3.bf16.msra.mxu0 %v2989_v51 }
 0x229   :  { %1677 = vmatprep.subr.bf16.mxu0 %v2992_v53 }
 0x2e5   :  { %v1420_v12 = vpop.f32.mrb[0].mxu1 }
 0x2e6   :  { %v1422_v20 = vpop.f32.mrb[1].mxu1  ;;  %v4056_v24 = vadd.f32 %v1420_v12, %v793_v11 }
 0x2e7   :  { %v1424_v23 = vpop.f32.mrb[2].mxu1  ;;  %v4060_v31 = vadd.f32 %v1422_v20, %v797_v17 }
 0x2e8   :  { %v4058_v26 = vadd.f32 %v1424_v23, %v793_v11  ;;  %v1426_v28 = vpop.f32.mrb[3].mxu1  ;;  %v2990_v23 = vld [vmem:[%s4280_s8] ss:$8 sps:$4 sm:$0xff]  }
 0x2e9   :  { %v4062_v32 = vadd.f32 %v1426_v28, %v797_v17 }
 0x2ea   :  { %v1439_v34 = vadd.f32 %v4058_v26, %v4056_v24 }
 0x2eb   :  { %v1446_v40 = vadd.f32 %v4062_v32, %v4060_v31 }
 0x2ec   :  { %v1440_v29 = vrot.slane %v1439_v34, 4 }
 0x2ed   :  { %v1447_v37 = vrot.slane %v1446_v40, 4  ;;  %v1430_v45 = vpop.f32.mrb[4].mxu1 }
 0x2ee   :  { %v1441_v2 = vadd.f32 %v1440_v29, %v1439_v34  ;;  %v1432_v63 = vpop.f32.mrb[5].mxu1  ;;  %v4068_v21 = vadd.f32 %v1430_v45, %v793_v11  ;;  %v2993_v34 = vld [vmem:[%s4281_s9 + $0x40] sm:$0xff]  }
 0x2ef   :  { %v1448_v62 = vadd.f32 %v1447_v37, %v1446_v40  ;;  %v1434_v8 = vpop.f32.mrb[6].mxu1  ;;  %v4072_v39 = vadd.f32 %v1432_v63, %v797_v17 }
 0x2f0   :  { %v1442_v27 = vrot.slane %v1441_v2, 2  ;;  %v4070_v22 = vadd.f32 %v1434_v8, %v793_v11  ;;  %v1436_v36 = vpop.f32.mrb[7].mxu1 }
 0x2f1   :  { %v1449_v41 = vrot.slane %v1448_v62, 2  ;;  %v4074_v46 = vadd.f32 %v1436_v36, %v797_v17  ;;  %v2996_v36 = vld [vmem:[%s4281_s9 + $0x8] sm:$0xff]  }
 0x2f2   :  { %v1443_v55 = vadd.f32 %v1442_v27, %v1441_v2  ;;  %v1453_v15 = vadd.f32 %v4070_v22, %v4068_v21  ;;  %v2995_v27 = vld [vmem:[%s4281_s9 + $0x48] sm:$0xff]  }
 0x2f3   :  { %v1450_v56 = vadd.f32 %v1449_v41, %v1448_v62  ;;  %v1460_v57 = vadd.f32 %v4074_v46, %v4072_v39  ;;  %v2994_v62 = vld [vmem:[%s4281_s9] sm:$0xff]   ;;  %v2997_v41 = vld [vmem:[%s4281_s9 + $0x50] sm:$0xff]  }
 0x2f4   :  { %v1444_v59 = vrot.slane %v1443_v55, 1  ;;  %v1454_v33 = vrot.slane %v1453_v15, 4 }
 0x2f5   :  { %v1451_v52 = vrot.slane %v1450_v56, 1  ;;  %v1461_v60 = vrot.slane %v1460_v57, 4 }
 0x2f6   :  { %v1455_v61 = vadd.f32 %v1454_v33, %v1453_v15  ;;  %v1445_v1 = vadd.f32 %v1444_v59, %v1443_v55  ;;  %v2998_v55 = vld [vmem:[%s4281_s9 + $0x10] sm:$0xff]   ;;  %v2999_v15 = vld [vmem:[%s4281_s9 + $0x58] sm:$0xff]   ;;  %v3002_v59 = vld [vmem:[%s4281_s9 + $0x20] sm:$0xff]  }
 0x2f7   :  { %v1462_v0 = vadd.f32 %v1461_v60, %v1460_v57  ;;  %v1452_v4 = vadd.f32 %v1451_v52, %v1450_v56  ;;  %v3000_v56 = vld [vmem:[%s4281_s9 + $0x18] sm:$0xff]   ;;  %v3001_v57 = vld [vmem:[%s4281_s9 + $0x60] sm:$0xff]   ;;  %v3003_v33 = vld [vmem:[%s4281_s9 + $0x68] sm:$0xff]  }
 0x2f8   :  { %v1456_v5 = vrot.slane %v1455_v61, 2  ;;  %v1468_v6 = vmul.f32 0.0625, %v1445_v1  ;;  %v3004_v52 = vld [vmem:[%s4281_s9 + $0x28] sm:$0xff]   ;;  %v3005_v60 = vld [vmem:[%s4281_s9 + $0x70] sm:$0xff]   ;;  %v3008_v1 = vld [vmem:[%s4281_s9 + $0x38] sm:$0xff]  }
 0x2f9   :  { %v1463_v54 = vrot.slane %v1462_v0, 2  ;;  %v1469_v38 = vmul.f32 0.0625, %v1452_v4  ;;  %v3009_v4 = vld [vmem:[%s4282_s10] sm:$0xff]  }
 0x2fa   :  { %v1457_v3 = vadd.f32 %v1456_v5, %v1455_v61  ;;  %v1504_v49 = vpack.c.bf16 %v1468_v6, %v1468_v6  ;;  %v3006_v61 = vld [vmem:[%s4281_s9 + $0x30] sm:$0xff]   ;;  %v3176_v5 = vmov 0.0  }
 0x2fb   :  { %v1464_v30 = vadd.f32 %v1463_v54, %v1462_v0  ;;  %v1505_v35 = vpack.c.bf16 %v1469_v38, %v1469_v38  ;;  %v3007_v0 = vld [vmem:[%s4281_s9 + $0x78] sm:$0xff]   ;;  %v3012_v54 = vld [vmem:[%s4283_s11 + $0x4] ss:$8 sps:$4 sm:$0xff]  }
 0x2fc   :  { %v1458_v9 = vrot.slane %v1457_v3, 1  ;;  %v1512_v51 = vunpack.c.l.b16 %v1504_v49 }
 0x2fd   :  { %v1465_v42 = vrot.slane %v1464_v30, 1  ;;  %v1513_v10 = vunpack.c.l.b16 %v1505_v35 }
 0x2fe   :  { %v1459_v43 = vadd.f32 %v1458_v9, %v1457_v3  ;;  %v3031_v3 = vld [vmem:[%s4284_s12] ss:$8 sps:$4 sm:$0xff]  }
 0x2ff   :  { %v1466_v48 = vadd.f32 %v1465_v42, %v1464_v30  ;;  %v3033_v30 = vld [vmem:[%s4284_s12 + $0x4] ss:$8 sps:$4 sm:$0xff]  }
 0x300   :  { %v1470_v50 = vmul.f32 0.0625, %v1459_v43  ;;  %2214 = vmatprep.subr.bf16.mxu1 %v3033_v30 }
 0x301   :  { %v1471_v7 = vmul.f32 0.0625, %v1466_v48  ;;  %2215 = vmatpush1.bf16.msra.mxu1 %v3031_v3 }
 0x302   :  { %v1506_v44 = vpack.c.bf16 %v1470_v50, %v1470_v50 }
 0x303   :  { %v1507_v47 = vpack.c.bf16 %v1471_v7, %v1471_v7 }
 0x304   :  { %v1514_v53 = vunpack.c.l.b16 %v1506_v44  ;;  %v3010_v44 = vld [vmem:[%s4283_s11] ss:$8 sps:$4 sm:$0xff]  }
 0x305   :  { %v1515_v11 = vunpack.c.l.b16 %v1507_v47 }
 0x306   :  { %v1517_v12 = vsel %vm1516_vm11, %v1514_v53, %v1512_v51  ;;  %v3015_v51 = vld [vmem:[%s4283_s11 + $0x14] ss:$8 sps:$4 sm:$0xff]   ;;  %v3013_v53 = vld [vmem:[%s4283_s11 + $0x10] ss:$8 sps:$4 sm:$0xff]  }
 0x307   :  { %v1518_v17 = vsel %vm1516_vm11, %v1515_v11, %v1513_v10  ;;  %v1519_v28 = vpack.c.b16 %v1517_v12, %v1517_v12  ;;  %v3018_v10 = vld [vmem:[%s4283_s11 + $0x24] ss:$8 sps:$4 sm:$0xff]   ;;  %v3016_v11 = vld [vmem:[%s4283_s11 + $0x20] ss:$8 sps:$4 sm:$0xff]   ;;  %v3021_v12 = vld [vmem:[%s4283_s11 + $0x34] ss:$8 sps:$4 sm:$0xff]  }
 0x308   :  { %v1520_v20 = vpack.c.b16 %v1518_v17, %v1518_v17  ;;  %v3019_v17 = vld [vmem:[%s4283_s11 + $0x30] ss:$8 sps:$4 sm:$0xff]  }
 0x30a   :  { %1651 = vmatprep.mubr.bf16.mxu0 %v1520_v20 }
 0x30b   :  { %1652 = vmatmul.mubr.bf16.vlgmr.msra.gmra.mrb[8].mxu0 %v1519_v28 }
 0x30c   :  { %1678 = vmatpush1.bf16.msra.mxu0 %v2990_v23  ;;  %1709 = vmatprep.mubr.bf16.mxu0 %v3175_v58  ;;  %v3022_v23 = vld [vmem:[%s4283_s11 + $0x40] ss:$8 sps:$4 sm:$0xff]  }
 0x30d   :  { %2678 = vmatprep.subr.bf16.mxu0 %v2993_v34  ;;  %v3025_v34 = vld [vmem:[%s4283_s11 + $0x50] ss:$8 sps:$4 sm:$0xff]  }
 0x3de   :  { %v2672_v40 = vpop.f32.mrb[8].mxu0 }
 0x3df   :  { %v2673_v29 = vpop.f32.mrb[9].mxu0 }
 0x3e0   :  { %v2674_v37 = vadd.f32 %v2673_v29, %v2672_v40  ;;  %v2675_v45 = vpop.f32.mrb[10].mxu0  ;;  %v3030_v40 = vld [vmem:[%s4283_s11 + $0x64] ss:$8 sps:$4 sm:$0xff]   ;;  %v3028_v29 = vld [vmem:[%s4283_s11 + $0x60] ss:$8 sps:$4 sm:$0xff]  }
 0x3e1   :  { %v2676_v2 = vpop.f32.mrb[11].mxu0  ;;  %v3034_v45 = vld [vmem:[%s4283_s11 + $0x70] ss:$8 sps:$4 sm:$0xff]  }
 0x3e2   :  { %v1659_v63 = vmax.f32 %v2674_v37, 0.0  ;;  %v3036_v37 = vld [vmem:[%s4283_s11 + $0x74] ss:$8 sps:$4 sm:$0xff]  }
 0x3e3   :  { %v3039_v2 = vld [vmem:[%s4284_s12 + $0x14] ss:$8 sps:$4 sm:$0xff]  }
 0x3e4   :  { %v1662_v8 = vpack.c.bf16 %v1659_v63, %v1659_v63  ;;  %v3037_v63 = vld [vmem:[%s4284_s12 + $0x10] ss:$8 sps:$4 sm:$0xff]   ;;  %2216 = vmatprep.subr.bf16.mxu1 %v3039_v2 }
 0x3e5   :  { %2217 = vmatpush1.bf16.msra.mxu1 %v3037_v63 }
 0x3e6   :  { %2601 = vmatmul.mubr.msk.bf16.vlgmr.msra.gmra.mrb[12].mxu0 %vm1673_vm12, %v1662_v8  ;;  %v3042_v8 = vld [vmem:[%s4284_s12 + $0x24] ss:$8 sps:$4 sm:$0xff]  }
 0x3e7   :  { %2679 = vmatpush3.bf16.msra.mxu0 %v2994_v62  ;;  %1890 = vmatprep.mubr.bf16.mxu0 %v1520_v20  ;;  %v3024_v20 = vld [vmem:[%s4283_s11 + $0x44] ss:$8 sps:$4 sm:$0xff]   ;;  %v3040_v62 = vld [vmem:[%s4284_s12 + $0x20] ss:$8 sps:$4 sm:$0xff]  }
 0x3e8   :  { %2680 = vmatprep.subr.bf16.mxu0 %v2995_v27  ;;  %v3045_v27 = vld [vmem:[%s4284_s12 + $0x34] ss:$8 sps:$4 sm:$0xff]   ;;  %2218 = vmatprep.subr.bf16.mxu1 %v3042_v8  ;;  %v2122_v8 = vld [vmem:[#allocation7] sm:$0x3] }
 0x3e9   :  { %2219 = vmatpush1.bf16.msra.mxu1 %v3040_v62 }
 0x3ea   :  { %2220 = vmatprep.subr.bf16.mxu1 %v3045_v27 }
 0x3eb   :  { %2681 = vmatpush3.bf16.msra.mxu0 %v2996_v36  ;;  %v3043_v36 = vld [vmem:[%s4284_s12 + $0x30] ss:$8 sps:$4 sm:$0xff]  }
 0x3ec   :  { %2682 = vmatprep.subr.bf16.mxu0 %v2997_v41  ;;  %v3048_v41 = vld [vmem:[%s4284_s12 + $0x44] ss:$8 sps:$4 sm:$0xff]  }
 0x3ed   :  { %2221 = vmatpush1.bf16.msra.mxu1 %v3043_v36 }
 0x3ee   :  { %2222 = vmatprep.subr.bf16.mxu1 %v3048_v41  ;;  %v2127_v41 = vrot.slane %v2122_v8, %v3673_v16 }
 0x3ef   :  { %2683 = vmatpush3.bf16.msra.mxu0 %v2998_v55  ;;  %v3046_v55 = vld [vmem:[%s4284_s12 + $0x40] ss:$8 sps:$4 sm:$0xff]  }
 0x3f0   :  { %2684 = vmatprep.subr.bf16.mxu0 %v2999_v15  ;;  %v3051_v15 = vld [vmem:[%s4284_s12 + $0x54] ss:$8 sps:$4 sm:$0xff]  }
 0x3f1   :  { %2223 = vmatpush1.bf16.msra.mxu1 %v3046_v55 }
 0x3f2   :  { %2224 = vmatprep.subr.bf16.mxu1 %v3051_v15  ;;  %v2131_v15 = vrot.slane %v2122_v8, %v3676_v19 }
 0x3f3   :  { %2685 = vmatpush3.bf16.msra.mxu0 %v3000_v56  ;;  %v3049_v56 = vld [vmem:[%s4284_s12 + $0x50] ss:$8 sps:$4 sm:$0xff]  }
 0x3f4   :  { %2686 = vmatprep.subr.bf16.mxu0 %v3001_v57  ;;  %v3054_v57 = vld [vmem:[%s4284_s12 + $0x64] ss:$8 sps:$4 sm:$0xff]  }
 0x3f5   :  { %2225 = vmatpush1.bf16.msra.mxu1 %v3049_v56 }
 0x3f6   :  { %2226 = vmatprep.subr.bf16.mxu1 %v3054_v57 }
 0x3f7   :  { %2687 = vmatpush3.bf16.msra.mxu0 %v3002_v59  ;;  %v3052_v59 = vld [vmem:[%s4284_s12 + $0x60] ss:$8 sps:$4 sm:$0xff]  }
 0x3f8   :  { %2688 = vmatprep.subr.bf16.mxu0 %v3003_v33  ;;  %v3057_v33 = vld [vmem:[%s4284_s12 + $0x74] ss:$8 sps:$4 sm:$0xff]  }
 0x3f9   :  { %2227 = vmatpush1.bf16.msra.mxu1 %v3052_v59 }
 0x3fa   :  { %2228 = vmatprep.subr.bf16.mxu1 %v3057_v33 }
 0x3fb   :  { %2689 = vmatpush3.bf16.msra.mxu0 %v3004_v52  ;;  %v3055_v52 = vld [vmem:[%s4284_s12 + $0x70] ss:$8 sps:$4 sm:$0xff]  }
 0x3fc   :  { %2690 = vmatprep.subr.bf16.mxu0 %v3005_v60  ;;  %v3074_v60 = vld [vmem:[%s4272_s0 + $0x10] sm:$0xff] }
 0x3fd   :  { %2229 = vmatpush1.bf16.msra.mxu1 %v3055_v52 }
 0x3ff   :  { %2691 = vmatpush3.bf16.msra.mxu0 %v3006_v61  ;;  %v3075_v61 = vld [vmem:[%s4272_s0 + $0x18] sm:$0xff] }
 0x400   :  { %2692 = vmatprep.subr.bf16.mxu0 %v3007_v0  ;;  %2247 = vmatmul.mubr.bf16.vlgmr.msra.gmra.mrb[8].mxu1 %v2120_v18  ;;  %v2121_v0 = vpack.c.bf16 %v3075_v61, %v3074_v60 }
 0x401   :  { %2256 = vmatprep.mubr.bf16.mxu1 %v3175_v58 }
 0x403   :  { %2693 = vmatpush3.bf16.msra.mxu0 %v3008_v1 }
 0x404   :  { %2702 = vmatprep.subr.bf16.mxu0 %v3176_v5 }
 0x406   :  { %1891 = vmatmul.mubr.bf16.vlgmr.msra.gmra.mrb[16].mxu0 %v1519_v28  ;;  %v3027_v28 = vld [vmem:[%s4283_s11 + $0x54] ss:$8 sps:$4 sm:$0xff]  }
 0x407   :  { %2703 = vmatpush3.bf16.msra.mxu0 %v3009_v4  ;;  %2704 = vmatprep.mubr.msk.bf16.mxu0 %vm3177_vm13, %v3176_v5 }
 0x408   :  { %2049 = vmatprep.subr.bf16.mxu0 %v3012_v54  ;;  %2257 = vmatmul.mubr.bf16.gmra.mrb[12].mxu1 %v2121_v0 }
 0x4b9   :  { %v4147_v6 = vpop.f32.mrb[12].mxu0 }
 0x4ba   :  { %v4149_v9 = vpop.f32.mrb[13].mxu0 }
 0x4bb   :  { %v1715_v38 = vpop.f32.mrb[14].mxu0 }
 0x4bc   :  { %v1716_v42 = vpop.f32.mrb[15].mxu0 }
 0x4d3   :  { %v2248_v13 = vpop.f32.mrb[8].mxu1 }
 0x4d4   :  { %v2250_v14 = vpop.f32.mrb[9].mxu1  ;;  %v2249_v59 = vadd.f32 %v2248_v13, %v2127_v41 }
 0x4d5   :  { %v2252_v18 = vpop.f32.mrb[10].mxu1  ;;  %v2251_v52 = vadd.f32 %v2250_v14, %v2131_v15 }
 0x4d6   :  { %v2253_v0 = vadd.f32 %v2252_v18, %v2127_v41 }
 0x4d9   :  { %v2694_v43 = vpop.f32.mrb[16].mxu0 }
 0x4da   :  { %v2695_v48 = vpop.f32.mrb[17].mxu0 }
 0x4db   :  { %v2696_v49 = vadd.f32 %v2695_v48, %v2694_v43  ;;  %v2697_v50 = vpop.f32.mrb[18].mxu0 }
 0x4dc   :  { %v2698_v7 = vpop.f32.mrb[19].mxu0  ;;  %v2603_v50 = vmul.f32 -1.442695, %v4149_v9 }
 0x4dd   :  { %v1898_v35 = vmax.f32 %v2696_v49, 0.0  ;;  %v2602_v49 = vmul.f32 -1.442695, %v4147_v6 }
 0x4df   :  { %v1901_v47 = vpack.c.bf16 %v1898_v35, %v1898_v35  ;;  %3058 = vpow2.f32 %v2602_v49 }
 0x4e0   :  { %3060 = vpow2.f32 %v2603_v50 }
 0x4e1   :  { %2705 = vmatmul.mubr.msk.bf16.vlgmr.msra.gmra.mrb[20].mxu0 %vm1673_vm12, %v1901_v47 }
 0x4e2   :  { %2050 = vmatpush1.bf16.msra.mxu0 %v3010_v44  ;;  %2081 = vmatprep.mubr.bf16.mxu0 %v3175_v58  ;;  %v2254_v58 = vpop.f32.mrb[11].mxu1 }
 0x4e3   :  { %2051 = vmatprep.subr.bf16.mxu0 %v3015_v51  ;;  %v2258_v38 = vpop.f32.mrb[12].mxu1 }
 0x4e4   :  { %v2260_v42 = vpop.f32.mrb[13].mxu1 }
 0x4e5   :  { %v2262_v43 = vpop.f32.mrb[14].mxu1 }
 0x4e6   :  { %2052 = vmatpush1.bf16.msra.mxu0 %v3013_v53  ;;  %v2264_v48 = vpop.f32.mrb[15].mxu1  ;;  %v2263_v14 = vadd.f32 %v2262_v43, %v2127_v41 }
 0x4e7   :  { %2053 = vmatprep.subr.bf16.mxu0 %v3018_v10 }
 0x4e9   :  { %v3059_v10 = vpop.eup %3058 }
 0x4ea   :  { %2054 = vmatpush1.bf16.msra.mxu0 %v3016_v11  ;;  %v3061_v11 = vpop.eup %3060 }
 0x4eb   :  { %2055 = vmatprep.subr.bf16.mxu0 %v3021_v12  ;;  %v1724_v12 = vadd.f32 1.0, %v3059_v10 }
 0x4ee   :  { %2056 = vmatpush1.bf16.msra.mxu0 %v3019_v17  ;;  %v1725_v17 = vadd.f32 1.0, %v3061_v11 }
 0x4ef   :  { %2057 = vmatprep.subr.bf16.mxu0 %v3024_v20 }
 0x4f2   :  { %2058 = vmatpush1.bf16.msra.mxu0 %v3022_v23 }
 0x4f3   :  { %2059 = vmatprep.subr.bf16.mxu0 %v3027_v28  ;;  %v3178_v28 = vmov 1966171168  }
 0x4f6   :  { %2060 = vmatpush1.bf16.msra.mxu0 %v3025_v34  ;;  %v2271_v34 = vunpack.c.l.s4 %v3178_v28 }
 0x4f7   :  { %2061 = vmatprep.subr.bf16.mxu0 %v3030_v40 }
 0x4fa   :  { %2062 = vmatpush1.bf16.msra.mxu0 %v3028_v29  ;;  %v2272_v29 = vunpack.c.0.s8 %v2271_v34 }
 0x4fb   :  { %2063 = vmatprep.subr.bf16.mxu0 %v3036_v37 }
 0x4fc   :  { %v2275_v27 = vsub.s32 %v2272_v29, %v3369_v25  ;;  %v3179_v29 = vmov 1983009808  }
 0x4fe   :  { %2064 = vmatpush1.bf16.msra.mxu0 %v3034_v45 }
 0x5b4   :  { %v1945_v1 = vpop.f32.mrb[20].mxu0 }
 0x5b5   :  { %v1951_v5 = vmax.f32 %v1945_v1, 0.0  ;;  %v2706_v4 = vpop.f32.mrb[21].mxu0  ;;  %v2255_v1 = vadd.f32 %v2254_v58, %v2131_v15 }
 0x5b6   :  { %v1948_v54 = vpop.f32.mrb[22].mxu0  ;;  %v2261_v4 = vadd.f32 %v2260_v42, %v2131_v15 }
 0x5b7   :  { %v1968_v3 = vpack.c.bf16 %v1951_v5, %v1951_v5  ;;  %v2707_v30 = vpop.f32.mrb[23].mxu0  ;;  %v2259_v5 = vadd.f32 %v2258_v38, %v2127_v41 }
 0x5b9   :  { %2082 = vmatmul.mubr.bf16.vlgmr.msra.gmra.mrb[24].mxu0 %v1968_v3 }
 0x68c   :  { %v2083_v7 = vpop.f32.mrb[24].mxu0 }
 0x68d   :  { %v2638_v35 = vmul.f32 -1.442695, %v2083_v7  ;;  %v2085_v44 = vpop.f32.mrb[25].mxu0  ;;  %v2265_v7 = vadd.f32 %v2264_v48, %v2131_v15 }
 0x68e   :  { %v2639_v47 = vmul.f32 -1.442695, %v2085_v44  ;;  %v2087_v51 = vpop.f32.mrb[26].mxu0 }
 0x68f   :  { %3062 = vpow2.f32 %v2638_v35  ;;  %v2088_v53 = vpop.f32.mrb[27].mxu0 }
 0x690   :  { %3064 = vpow2.f32 %v2639_v47 }
 0x691   :  { %3066 = vrcp.f32 %v1724_v12 }
 0x692   :  { %3068 = vrcp.f32 %v1725_v17 }
 0x699   :  { %v3063_v20 = vpop.eup %3062 }
 0x69a   :  { %v3065_v23 = vpop.eup %3064  ;;  %v2096_v6 = vadd.f32 1.0, %v3063_v20 }
 0x69b   :  { %v2097_v9 = vadd.f32 1.0, %v3065_v23  ;;  %v3067_v40 = vpop.eup %3066 }
 0x69c   :  { %3070 = vrcp.f32 %v2096_v6  ;;  %v3069_v37 = vpop.eup %3068 }
 0x69d   :  { %3072 = vrcp.f32 %v2097_v9 }
 0x6a6   :  { %v3071_v45 = vpop.eup %3070 }
 0x6a7   :  { %v3073_v2 = vpop.eup %3072  ;;  %v2102_v63 = vadd.f32 %v3071_v45, %v3067_v40 }
 0x6a8   :  { %v2103_v62 = vadd.f32 %v3073_v2, %v3069_v37  ;;  %v2366_v37 = vunpack.c.l.s4 %v3179_v29 }
 0x6aa   :  { %v2269_v36 = vcombine.low %v2102_v63, %v2103_v62 }
 0x6ac   :  { %v2276_v55 = vrot.slane %v2269_v36, %v2275_v27 }
 0x6ae   :  { %v2284_v56 = vrot.slane %v2276_v55, %v2275_v27  ;;  %v2277_v57 = vcombine.high %v2276_v55, %v2276_v55  ;;  %v2367_v55 = vunpack.c.0.s8 %v2366_v37 }
 0x6b0   :  { %v2295_v33 = vrot.slane %v2284_v56, %v3673_v16  ;;  %v2299_v60 = vrot.slane %v2284_v56, %v3676_v19  ;;  %v2291_v61 = vrot.slane %v2277_v57, %v2275_v27 }
 0x6b2   :  { %v2312_v54 = vmul.f32 %v4056_v24, %v2295_v33  ;;  %v2313_v3 = vmul.f32 %v4060_v31, %v2299_v60  ;;  %v2314_v30 = vmul.f32 %v4058_v26, %v2295_v33  ;;  %v2315_v49 = vmul.f32 %v4062_v32, %v2299_v60 }
 0x6b3   :  { %v2303_v13 = vrot.slane %v2291_v61, %v3673_v16  ;;  %v2307_v50 = vrot.slane %v2291_v61, %v3676_v19 }
 0x6b4   :  { %v2320_v35 = vadd.f32 %v2312_v54, %v2249_v59  ;;  %v2321_v44 = vadd.f32 %v2313_v3, %v2251_v52  ;;  %v2322_v18 = vadd.f32 %v2314_v30, %v2253_v0  ;;  %v2323_v58 = vadd.f32 %v2315_v49, %v2255_v1 }
 0x6b5   :  { %v2316_v38 = vmul.f32 %v4068_v21, %v2303_v13  ;;  %v2317_v24 = vmul.f32 %v4072_v39, %v2307_v50  ;;  %v2318_v31 = vmul.f32 %v4070_v22, %v2303_v13  ;;  %v2319_v26 = vmul.f32 %v4074_v46, %v2307_v50 }
 0x6b6   :  { %v2328_v42 = vadd.f32 %v2322_v18, %v2320_v35  ;;  %v2335_v32 = vadd.f32 %v2323_v58, %v2321_v44  ;;  %v2370_v52 = vsub.s32 %v2367_v55, %v3369_v25 }
 0x6b7   :  { %v2324_v47 = vadd.f32 %v2316_v38, %v2259_v5  ;;  %v2325_v16 = vadd.f32 %v2317_v24, %v2261_v4  ;;  %v2326_v51 = vadd.f32 %v2318_v31, %v2263_v14  ;;  %v2327_v19 = vadd.f32 %v2319_v26, %v2265_v7 }
 0x6b8   :  { %v2329_v43 = vrot.slane %v2328_v42, 4  ;;  %v2336_v48 = vrot.slane %v2335_v32, 4 }
 0x6b9   :  { %v2342_v53 = vadd.f32 %v2326_v51, %v2324_v47  ;;  %v2349_v10 = vadd.f32 %v2327_v19, %v2325_v16 }
 0x6ba   :  { %v2330_v11 = vadd.f32 %v2329_v43, %v2328_v42  ;;  %v2337_v12 = vadd.f32 %v2336_v48, %v2335_v32 }
 0x6bb   :  { %v2343_v17 = vrot.slane %v2342_v53, 4  ;;  %v2350_v21 = vrot.slane %v2349_v10, 4 }
 0x6bc   :  { %v2331_v20 = vrot.slane %v2330_v11, 2  ;;  %v2338_v39 = vrot.slane %v2337_v12, 2 }
 0x6bd   :  { %v2344_v23 = vadd.f32 %v2343_v17, %v2342_v53  ;;  %v2351_v22 = vadd.f32 %v2350_v21, %v2349_v10 }
 0x6be   :  { %v2332_v6 = vadd.f32 %v2331_v20, %v2330_v11  ;;  %v2339_v46 = vadd.f32 %v2338_v39, %v2337_v12 }
 0x6bf   :  { %v2345_v9 = vrot.slane %v2344_v23, 2  ;;  %v2352_v28 = vrot.slane %v2351_v22, 2 }
 0x6c0   :  { %v2333_v34 = vrot.slane %v2332_v6, 1  ;;  %v2340_v40 = vrot.slane %v2339_v46, 1 }
 0x6c1   :  { %v2346_v45 = vadd.f32 %v2345_v9, %v2344_v23  ;;  %v2353_v2 = vadd.f32 %v2352_v28, %v2351_v22 }
 0x6c2   :  { %v2334_v63 = vadd.f32 %v2333_v34, %v2332_v6  ;;  %v2341_v62 = vadd.f32 %v2340_v40, %v2339_v46 }
 0x6c3   :  { %v2347_v8 = vrot.slane %v2346_v45, 1  ;;  %v2354_v27 = vrot.slane %v2353_v2, 1 }
 0x6c4   :  { %v2356_v36 = vmul.f32 0.0625, %v2334_v63  ;;  %v2357_v41 = vmul.f32 0.0625, %v2341_v62 }
 0x6c5   :  { %v2348_v15 = vadd.f32 %v2347_v8, %v2346_v45  ;;  %v2355_v56 = vadd.f32 %v2354_v27, %v2353_v2 }
 0x6c6   :  { %v2364_v57 = vcombine.low %v2356_v36, %v2357_v41 }
 0x6c7   :  { %v2358_v59 = vmul.f32 0.0625, %v2348_v15  ;;  %v2359_v33 = vmul.f32 0.0625, %v2355_v56 }
 0x6c8   :  { %v2371_v0 = vrot.slane %v2364_v57, %v2370_v52 }
 0x6c9   :  { %v2372_v60 = vcombine.low %v2358_v59, %v2359_v33 }
 0x6cb   :  { %v2379_v61 = vrot.slane %v2372_v60, %v2370_v52 }
 0x6cd   :  { %v2384_v1 = vrot.slane %v2379_v61, 7 }
 0x6cf   :  { %v2385_v5 = vsel %vm1516_vm11, %v2384_v1, %v2371_v0 }
 0x6d0   :  { %v2387_v4 = vsel %vm2386_vm14, %v2384_v1, %v2385_v5 }
 0x6d1   :  { %v2389_v54 = vsel %vm2388_vm15, %v2384_v1, %v2387_v4 }
 0x6d2   :  { %v2391_v3 = vsel %vm2390_vm0, %v2384_v1, %v2389_v54 }
 0x6d3   :  { %2393 = vst [vmem:[%s4286_s14] sm:$0xf] %v2391_v3 }
 0x6d4   :  { %2398 = vsyncpa [#allocation3], 1 }
 0x6d5   :  { %2399 = vsyncpa [#allocation5], 1 }
 0x6d6   :  { %2400 = vsyncpa [#allocation8], 1 }

</bundles_post_ra>
